<compile_context>
chip_gen: v5e
topology: v5e:2x2
jax: 0.10.0
libtpu: 0.0.40
codegen_flags: <defaults>
</compile_context>

<pallas_src>
import functools

import jax
import jax.numpy as jnp
from jax.experimental import pallas as pl
from jax.experimental.pallas import tpu as pltpu


def _cdiv(a, b):
    return -(-a // b)


def _round_up(a, m):
    return _cdiv(a, m) * m


# ---------------------------------------------------------------------------
# Pallas kernel: fused im2col + matmul for one (batch, row-tile) grid step.
# ---------------------------------------------------------------------------
def _dilated_conv_kernel(x_ref, w_ref, o_ref, *, kH, kW, d, wflat, rows):
    """x_ref: (Hblk*wflat, Cin)  flattened halo slab of the padded input
    w_ref: (kH*kW, Cin, Coutp)   per-tap weight matrices (lane-padded Coutp)
    o_ref: (rows, Coutp)         output rows for this tile, rows = th * wflat
    """
    for kh in range(kH):
        for kw in range(kW):
            start = (kh * d) * wflat + kw * d          # static offset
            xs = x_ref[pl.ds(start, rows), :]          # contiguous (rows, Cin)
            contrib = jnp.dot(xs, w_ref[kh * kW + kw],
                              preferred_element_type=jnp.float32)
            if kh == 0 and kw == 0:
                o_ref[...] = contrib
            else:
                o_ref[...] += contrib


# ---------------------------------------------------------------------------
# Wrapper: layout glue (circular pad, halo row grouping, channel padding).
# ---------------------------------------------------------------------------
def dilated_conv_forward(x_nchw, weight, *, stride=1, d=1, target_rows=1024):
    """Forward pass of DilatedConv.

    x_nchw : (N, Cin, H, W)      float32
    weight : (Cout, Cin, kH, kW) float32 (PyTorch Conv2d layout, bias=False)
    Returns (N, Cout, Ho, Wo)    float32
    """
    N, Cin, H, W = x_nchw.shape
    Cout, Cin_w, kH, kW = weight.shape
    assert Cin_w == Cin
    p = ((kH - 1) // 2) * d

    # NCHW -> NHWC + circular padding (== F.pad(..., mode='circular')).
    x = jnp.transpose(x_nchw, (0, 2, 3, 1)).astype(jnp.float32)
    xp = jnp.pad(x, ((0, 0), (p, p), (p, p), (0, 0)), mode="wrap")
    Hp, Wp = H + 2 * p, W + 2 * p

    # Dense (stride=1) output extents; stride>1 is sub-sampled afterwards.
    # TODO(synk): native strided taps in-kernel if stride>1 ever becomes hot.
    Ho_d = Hp - (kH - 1) * d
    Wo_d = Wp - (kW - 1) * d
    Ho = (Ho_d - 1) // stride + 1
    Wo = (Wo_d - 1) // stride + 1

    # ---- tiling -------------------------------------------------------------
    Coutp = _round_up(Cout, 128)                 # lane-dense output channels
    Wx = _round_up(Wp, 8)                        # computed columns per dense row
    th = max(1, min(Ho_d, target_rows // Wx))    # dense output rows per tile
    T = _cdiv(Ho_d, th)
    if N * T < 2 and th > 1:                     # >=2 grid steps for megacore
        th = _cdiv(th, 2)
        T = _cdiv(Ho_d, th)
    Hblk = th + (kH - 1) * d + 1                 # halo rows (+1: flat overhang)

    # Extend the padded input so every halo slab is in-bounds (extra rows/cols
    # only ever contribute to junk output columns that get sliced off).
    pad_b = T * th + (kH - 1) * d + 1 - Hp
    pad_r = Wx - Wp
    xp = jnp.pad(xp, ((0, 0), (0, pad_b), (0, pad_r), (0, 0)))

    # Halo row-slabs, flattened so each (kh, kw) tap is one contiguous slice:
    # (N*T, Hblk*Wx, Cin).  Only halo rows are duplicated.
    row_idx = (jnp.arange(T) * th)[:, None] + jnp.arange(Hblk)[None, :]
    xg = xp[:, row_idx, :, :].reshape(N * T, Hblk * Wx, Cin)

    # Per-tap weight matrices, lane-padded: (kH*kW, Cin, Coutp).
    wt = jnp.transpose(weight, (2, 3, 1, 0)).astype(jnp.float32)  # (kH,kW,Cin,Cout)
    wt = wt.reshape(kH * kW, Cin, Cout)
    if Coutp != Cout:
        wt = jnp.pad(wt, ((0, 0), (0, 0), (0, Coutp - Cout)))

    rows = th * Wx
    M = N * T * rows
    flat = Hblk * Wx

    kernel = functools.partial(_dilated_conv_kernel, kH=kH, kW=kW, d=d,
                               wflat=Wx, rows=rows)
    cost = pl.CostEstimate(
        flops=2 * M * kH * kW * Cin * Coutp,
        transcendentals=0,
        bytes_accessed=4 * (xg.size + wt.size + M * Coutp))

    out = pl.pallas_call(
        kernel,
        out_shape=jax.ShapeDtypeStruct((M, Coutp), jnp.float32),
        grid=(N * T,),
        in_specs=[
            pl.BlockSpec((None, flat, Cin), lambda g: (g, 0, 0)),
            pl.BlockSpec((kH * kW, Cin, Coutp), lambda g: (0, 0, 0)),
        ],
        out_specs=pl.BlockSpec((rows, Coutp), lambda g: (g, 0)),
        compiler_params=pltpu.CompilerParams(
            dimension_semantics=("parallel",),
            vmem_limit_bytes=32 * 1024 * 1024),
        cost_estimate=cost,
    )(xg, wt)

    # (M, Coutp) -> (N, dense rows, Wx cols, Coutp); crop junk columns/rows,
    # apply stride sub-sampling, drop channel padding, back to NCHW.
    out = out.reshape(N, T * th, Wx, Coutp)
    out = out[:, :Ho_d:stride, :Wo_d:stride, :Cout]
    return jnp.transpose(out, (0, 3, 1, 2))


# ---------------------------------------------------------------------------
# Pure-JAX reference for correctness checking.
# ---------------------------------------------------------------------------
def dilated_conv_reference(x_nchw, weight, *, stride=1, d=1):
    kH, kW = weight.shape[2], weight.shape[3]
    p = ((kH - 1) // 2) * d
    x = jnp.transpose(x_nchw, (0, 2, 3, 1)).astype(jnp.float32)
    xp = jnp.pad(x, ((0, 0), (p, p), (p, p), (0, 0)), mode="wrap")
    w_hwio = jnp.transpose(weight, (2, 3, 1, 0)).astype(jnp.float32)
    out = jax.lax.conv_general_dilated(
        xp, w_hwio, window_strides=(stride, stride), padding="VALID",
        rhs_dilation=(d, d), dimension_numbers=("NHWC", "HWIO", "NHWC"))
    return jnp.transpose(out, (0, 3, 1, 2))


# ---------------------------------------------------------------------------
if __name__ == "__main__":
    # DilatedConv(nIn=4, nOut=8, kSize=3) at small shapes.
    N, Cin, H, W = 2, 4, 16, 16
    Cout, k = 8, 3

    key = jax.random.PRNGKey(0)
    kx, kw_key = jax.random.split(key)
    x = jax.random.normal(kx, (N, Cin, H, W), dtype=jnp.float32)
    weight = (jax.random.normal(kw_key, (Cout, Cin, k, k), dtype=jnp.float32)
              * (1.0 / (Cin * k * k) ** 0.5))

    for stride, d in [(1, 1), (1, 2), (2, 1)]:
        fwd = jax.jit(functools.partial(dilated_conv_forward, stride=stride, d=d))
        out = jax.block_until_ready(fwd(x, weight))
        ref = dilated_conv_reference(x, weight, stride=stride, d=d)
        assert out.shape == ref.shape, (out.shape, ref.shape)
        err = float(jnp.max(jnp.abs(out - ref)))
        assert jnp.allclose(out, ref, rtol=1e-4, atol=1e-4), (stride, d, err)

    print("KERNEL_OK")
</pallas_src>

<mosaic_0001>
module attributes {stable_mosaic.version = 11 : i64} {
  func.func @_dilated_conv_kernel(%arg0: i32, %arg1: memref<1x456x4xf32, #tpu.memory_space<vmem>>, %arg2: memref<9x4x128xf32, #tpu.memory_space<vmem>>, %arg3: memref<384x128xf32, #tpu.memory_space<vmem>>) attributes {dimension_semantics = [#tpu.dimension_semantics<parallel>], iteration_bounds = array<i64: 2>, scalar_prefetch = 0 : i64, scratch_operands = 0 : i64, tpu.core_type = #tpu.core_type<tc>, window_params = [{transform_indices = @transform_0, window_bounds = array<i64: 1, 456, 4>}, {pipeline_mode = #tpu.pipeline_mode<synchronous>, transform_indices = @transform_1, window_bounds = array<i64: 9, 4, 128>}, {transform_indices = @transform_2, window_bounds = array<i64: 384, 128>}]} {
    %c0 = arith.constant 0 : index
    %c0_0 = arith.constant 0 : index
    %c0_1 = arith.constant 0 : index
    %0 = vector.load %arg1[%c0, %c0_0, %c0_1] : memref<1x456x4xf32, #tpu.memory_space<vmem>>, vector<1x384x4xf32>
    %1 = vector.shape_cast %0 : vector<1x384x4xf32> to vector<384x4xf32>
    %c0_2 = arith.constant 0 : index
    %c0_3 = arith.constant 0 : index
    %c0_4 = arith.constant 0 : index
    %2 = vector.load %arg2[%c0_2, %c0_3, %c0_4] : memref<9x4x128xf32, #tpu.memory_space<vmem>>, vector<1x4x128xf32>
    %3 = vector.shape_cast %2 : vector<1x4x128xf32> to vector<4x128xf32>
    %cst = arith.constant dense<0.000000e+00> : vector<384x128xf32>
    %4 = tpu.matmul %1, %3, %cst {dimension_numbers = #tpu.dot_dimension_numbers<[1], [0], [0], [1], [0, 0, 1, 1], [], []>} : vector<384x4xf32>, vector<4x128xf32>, vector<384x128xf32> -> vector<384x128xf32>
    %c0_5 = arith.constant 0 : index
    %c0_6 = arith.constant 0 : index
    %5 = vector.load %arg3[%c0_5, %c0_6] : memref<384x128xf32, #tpu.memory_space<vmem>>, vector<384x128xf32>
    tpu.vector_store %arg3[%c0_5, %c0_6], %4 {strides = array<i32>} : memref<384x128xf32, #tpu.memory_space<vmem>>, vector<384x128xf32>,
    %c0_7 = arith.constant 0 : index
    %c1 = arith.constant 1 : index
    %c0_8 = arith.constant 0 : index
    %6 = vector.load %arg1[%c0_7, %c1, %c0_8] : memref<1x456x4xf32, #tpu.memory_space<vmem>>, vector<1x384x4xf32>
    %7 = vector.shape_cast %6 : vector<1x384x4xf32> to vector<384x4xf32>
    %c1_9 = arith.constant 1 : index
    %c0_10 = arith.constant 0 : index
    %c0_11 = arith.constant 0 : index
    %8 = vector.load %arg2[%c1_9, %c0_10, %c0_11] : memref<9x4x128xf32, #tpu.memory_space<vmem>>, vector<1x4x128xf32>
    %9 = vector.shape_cast %8 : vector<1x4x128xf32> to vector<4x128xf32>
    %cst_12 = arith.constant dense<0.000000e+00> : vector<384x128xf32>
    %10 = tpu.matmul %7, %9, %cst_12 {dimension_numbers = #tpu.dot_dimension_numbers<[1], [0], [0], [1], [0, 0, 1, 1], [], []>} : vector<384x4xf32>, vector<4x128xf32>, vector<384x128xf32> -> vector<384x128xf32>
    %c0_13 = arith.constant 0 : index
    %c0_14 = arith.constant 0 : index
    %11 = vector.load %arg3[%c0_13, %c0_14] : memref<384x128xf32, #tpu.memory_space<vmem>>, vector<384x128xf32>
    %12 = arith.addf %11, %10 : vector<384x128xf32>
    %c0_15 = arith.constant 0 : index
    %c0_16 = arith.constant 0 : index
    %13 = vector.load %arg3[%c0_15, %c0_16] : memref<384x128xf32, #tpu.memory_space<vmem>>, vector<384x128xf32>
    tpu.vector_store %arg3[%c0_15, %c0_16], %12 {strides = array<i32>} : memref<384x128xf32, #tpu.memory_space<vmem>>, vector<384x128xf32>,
    %c0_17 = arith.constant 0 : index
    %c2 = arith.constant 2 : index
    %c0_18 = arith.constant 0 : index
    %14 = vector.load %arg1[%c0_17, %c2, %c0_18] : memref<1x456x4xf32, #tpu.memory_space<vmem>>, vector<1x384x4xf32>
    %15 = vector.shape_cast %14 : vector<1x384x4xf32> to vector<384x4xf32>
    %c2_19 = arith.constant 2 : index
    %c0_20 = arith.constant 0 : index
    %c0_21 = arith.constant 0 : index
    %16 = vector.load %arg2[%c2_19, %c0_20, %c0_21] : memref<9x4x128xf32, #tpu.memory_space<vmem>>, vector<1x4x128xf32>
    %17 = vector.shape_cast %16 : vector<1x4x128xf32> to vector<4x128xf32>
    %cst_22 = arith.constant dense<0.000000e+00> : vector<384x128xf32>
    %18 = tpu.matmul %15, %17, %cst_22 {dimension_numbers = #tpu.dot_dimension_numbers<[1], [0], [0], [1], [0, 0, 1, 1], [], []>} : vector<384x4xf32>, vector<4x128xf32>, vector<384x128xf32> -> vector<384x128xf32>
    %c0_23 = arith.constant 0 : index
    %c0_24 = arith.constant 0 : index
    %19 = vector.load %arg3[%c0_23, %c0_24] : memref<384x128xf32, #tpu.memory_space<vmem>>, vector<384x128xf32>
    %20 = arith.addf %19, %18 : vector<384x128xf32>
    %c0_25 = arith.constant 0 : index
    %c0_26 = arith.constant 0 : index
    %21 = vector.load %arg3[%c0_25, %c0_26] : memref<384x128xf32, #tpu.memory_space<vmem>>, vector<384x128xf32>
    tpu.vector_store %arg3[%c0_25, %c0_26], %20 {strides = array<i32>} : memref<384x128xf32, #tpu.memory_space<vmem>>, vector<384x128xf32>,
    %c0_27 = arith.constant 0 : index
    %c24 = arith.constant 24 : index
    %c0_28 = arith.constant 0 : index
    %22 = vector.load %arg1[%c0_27, %c24, %c0_28] : memref<1x456x4xf32, #tpu.memory_space<vmem>>, vector<1x384x4xf32>
    %23 = vector.shape_cast %22 : vector<1x384x4xf32> to vector<384x4xf32>
    %c3 = arith.constant 3 : index
    %c0_29 = arith.constant 0 : index
    %c0_30 = arith.constant 0 : index
    %24 = vector.load %arg2[%c3, %c0_29, %c0_30] : memref<9x4x128xf32, #tpu.memory_space<vmem>>, vector<1x4x128xf32>
    %25 = vector.shape_cast %24 : vector<1x4x128xf32> to vector<4x128xf32>
    %cst_31 = arith.constant dense<0.000000e+00> : vector<384x128xf32>
    %26 = tpu.matmul %23, %25, %cst_31 {dimension_numbers = #tpu.dot_dimension_numbers<[1], [0], [0], [1], [0, 0, 1, 1], [], []>} : vector<384x4xf32>, vector<4x128xf32>, vector<384x128xf32> -> vector<384x128xf32>
    %c0_32 = arith.constant 0 : index
    %c0_33 = arith.constant 0 : index
    %27 = vector.load %arg3[%c0_32, %c0_33] : memref<384x128xf32, #tpu.memory_space<vmem>>, vector<384x128xf32>
    %28 = arith.addf %27, %26 : vector<384x128xf32>
    %c0_34 = arith.constant 0 : index
    %c0_35 = arith.constant 0 : index
    %29 = vector.load %arg3[%c0_34, %c0_35] : memref<384x128xf32, #tpu.memory_space<vmem>>, vector<384x128xf32>
    tpu.vector_store %arg3[%c0_34, %c0_35], %28 {strides = array<i32>} : memref<384x128xf32, #tpu.memory_space<vmem>>, vector<384x128xf32>,
    %c0_36 = arith.constant 0 : index
    %c25 = arith.constant 25 : index
    %c0_37 = arith.constant 0 : index
    %30 = vector.load %arg1[%c0_36, %c25, %c0_37] : memref<1x456x4xf32, #tpu.memory_space<vmem>>, vector<1x384x4xf32>
    %31 = vector.shape_cast %30 : vector<1x384x4xf32> to vector<384x4xf32>
    %c4 = arith.constant 4 : index
    %c0_38 = arith.constant 0 : index
    %c0_39 = arith.constant 0 : index
    %32 = vector.load %arg2[%c4, %c0_38, %c0_39] : memref<9x4x128xf32, #tpu.memory_space<vmem>>, vector<1x4x128xf32>
    %33 = vector.shape_cast %32 : vector<1x4x128xf32> to vector<4x128xf32>
    %cst_40 = arith.constant dense<0.000000e+00> : vector<384x128xf32>
    %34 = tpu.matmul %31, %33, %cst_40 {dimension_numbers = #tpu.dot_dimension_numbers<[1], [0], [0], [1], [0, 0, 1, 1], [], []>} : vector<384x4xf32>, vector<4x128xf32>, vector<384x128xf32> -> vector<384x128xf32>
    %c0_41 = arith.constant 0 : index
    %c0_42 = arith.constant 0 : index
    %35 = vector.load %arg3[%c0_41, %c0_42] : memref<384x128xf32, #tpu.memory_space<vmem>>, vector<384x128xf32>
    %36 = arith.addf %35, %34 : vector<384x128xf32>
    %c0_43 = arith.constant 0 : index
    %c0_44 = arith.constant 0 : index
    %37 = vector.load %arg3[%c0_43, %c0_44] : memref<384x128xf32, #tpu.memory_space<vmem>>, vector<384x128xf32>
    tpu.vector_store %arg3[%c0_43, %c0_44], %36 {strides = array<i32>} : memref<384x128xf32, #tpu.memory_space<vmem>>, vector<384x128xf32>,
    %c0_45 = arith.constant 0 : index
    %c26 = arith.constant 26 : index
    %c0_46 = arith.constant 0 : index
    %38 = vector.load %arg1[%c0_45, %c26, %c0_46] : memref<1x456x4xf32, #tpu.memory_space<vmem>>, vector<1x384x4xf32>
    %39 = vector.shape_cast %38 : vector<1x384x4xf32> to vector<384x4xf32>
    %c5 = arith.constant 5 : index
    %c0_47 = arith.constant 0 : index
    %c0_48 = arith.constant 0 : index
    %40 = vector.load %arg2[%c5, %c0_47, %c0_48] : memref<9x4x128xf32, #tpu.memory_space<vmem>>, vector<1x4x128xf32>
    %41 = vector.shape_cast %40 : vector<1x4x128xf32> to vector<4x128xf32>
    %cst_49 = arith.constant dense<0.000000e+00> : vector<384x128xf32>
    %42 = tpu.matmul %39, %41, %cst_49 {dimension_numbers = #tpu.dot_dimension_numbers<[1], [0], [0], [1], [0, 0, 1, 1], [], []>} : vector<384x4xf32>, vector<4x128xf32>, vector<384x128xf32> -> vector<384x128xf32>
    %c0_50 = arith.constant 0 : index
    %c0_51 = arith.constant 0 : index
    %43 = vector.load %arg3[%c0_50, %c0_51] : memref<384x128xf32, #tpu.memory_space<vmem>>, vector<384x128xf32>
    %44 = arith.addf %43, %42 : vector<384x128xf32>
    %c0_52 = arith.constant 0 : index
    %c0_53 = arith.constant 0 : index
    %45 = vector.load %arg3[%c0_52, %c0_53] : memref<384x128xf32, #tpu.memory_space<vmem>>, vector<384x128xf32>
    tpu.vector_store %arg3[%c0_52, %c0_53], %44 {strides = array<i32>} : memref<384x128xf32, #tpu.memory_space<vmem>>, vector<384x128xf32>,
    %c0_54 = arith.constant 0 : index
    %c48 = arith.constant 48 : index
    %c0_55 = arith.constant 0 : index
    %46 = vector.load %arg1[%c0_54, %c48, %c0_55] : memref<1x456x4xf32, #tpu.memory_space<vmem>>, vector<1x384x4xf32>
    %47 = vector.shape_cast %46 : vector<1x384x4xf32> to vector<384x4xf32>
    %c6 = arith.constant 6 : index
    %c0_56 = arith.constant 0 : index
    %c0_57 = arith.constant 0 : index
    %48 = vector.load %arg2[%c6, %c0_56, %c0_57] : memref<9x4x128xf32, #tpu.memory_space<vmem>>, vector<1x4x128xf32>
    %49 = vector.shape_cast %48 : vector<1x4x128xf32> to vector<4x128xf32>
    %cst_58 = arith.constant dense<0.000000e+00> : vector<384x128xf32>
    %50 = tpu.matmul %47, %49, %cst_58 {dimension_numbers = #tpu.dot_dimension_numbers<[1], [0], [0], [1], [0, 0, 1, 1], [], []>} : vector<384x4xf32>, vector<4x128xf32>, vector<384x128xf32> -> vector<384x128xf32>
    %c0_59 = arith.constant 0 : index
    %c0_60 = arith.constant 0 : index
    %51 = vector.load %arg3[%c0_59, %c0_60] : memref<384x128xf32, #tpu.memory_space<vmem>>, vector<384x128xf32>
    %52 = arith.addf %51, %50 : vector<384x128xf32>
    %c0_61 = arith.constant 0 : index
    %c0_62 = arith.constant 0 : index
    %53 = vector.load %arg3[%c0_61, %c0_62] : memref<384x128xf32, #tpu.memory_space<vmem>>, vector<384x128xf32>
    tpu.vector_store %arg3[%c0_61, %c0_62], %52 {strides = array<i32>} : memref<384x128xf32, #tpu.memory_space<vmem>>, vector<384x128xf32>,
    %c0_63 = arith.constant 0 : index
    %c49 = arith.constant 49 : index
    %c0_64 = arith.constant 0 : index
    %54 = vector.load %arg1[%c0_63, %c49, %c0_64] : memref<1x456x4xf32, #tpu.memory_space<vmem>>, vector<1x384x4xf32>
    %55 = vector.shape_cast %54 : vector<1x384x4xf32> to vector<384x4xf32>
    %c7 = arith.constant 7 : index
    %c0_65 = arith.constant 0 : index
    %c0_66 = arith.constant 0 : index
    %56 = vector.load %arg2[%c7, %c0_65, %c0_66] : memref<9x4x128xf32, #tpu.memory_space<vmem>>, vector<1x4x128xf32>
    %57 = vector.shape_cast %56 : vector<1x4x128xf32> to vector<4x128xf32>
    %cst_67 = arith.constant dense<0.000000e+00> : vector<384x128xf32>
    %58 = tpu.matmul %55, %57, %cst_67 {dimension_numbers = #tpu.dot_dimension_numbers<[1], [0], [0], [1], [0, 0, 1, 1], [], []>} : vector<384x4xf32>, vector<4x128xf32>, vector<384x128xf32> -> vector<384x128xf32>
    %c0_68 = arith.constant 0 : index
    %c0_69 = arith.constant 0 : index
    %59 = vector.load %arg3[%c0_68, %c0_69] : memref<384x128xf32, #tpu.memory_space<vmem>>, vector<384x128xf32>
    %60 = arith.addf %59, %58 : vector<384x128xf32>
    %c0_70 = arith.constant 0 : index
    %c0_71 = arith.constant 0 : index
    %61 = vector.load %arg3[%c0_70, %c0_71] : memref<384x128xf32, #tpu.memory_space<vmem>>, vector<384x128xf32>
    tpu.vector_store %arg3[%c0_70, %c0_71], %60 {strides = array<i32>} : memref<384x128xf32, #tpu.memory_space<vmem>>, vector<384x128xf32>,
    %c0_72 = arith.constant 0 : index
    %c50 = arith.constant 50 : index
    %c0_73 = arith.constant 0 : index
    %62 = vector.load %arg1[%c0_72, %c50, %c0_73] : memref<1x456x4xf32, #tpu.memory_space<vmem>>, vector<1x384x4xf32>
    %63 = vector.shape_cast %62 : vector<1x384x4xf32> to vector<384x4xf32>
    %c8 = arith.constant 8 : index
    %c0_74 = arith.constant 0 : index
    %c0_75 = arith.constant 0 : index
    %64 = vector.load %arg2[%c8, %c0_74, %c0_75] : memref<9x4x128xf32, #tpu.memory_space<vmem>>, vector<1x4x128xf32>
    %65 = vector.shape_cast %64 : vector<1x4x128xf32> to vector<4x128xf32>
    %cst_76 = arith.constant dense<0.000000e+00> : vector<384x128xf32>
    %66 = tpu.matmul %63, %65, %cst_76 {dimension_numbers = #tpu.dot_dimension_numbers<[1], [0], [0], [1], [0, 0, 1, 1], [], []>} : vector<384x4xf32>, vector<4x128xf32>, vector<384x128xf32> -> vector<384x128xf32>
    %c0_77 = arith.constant 0 : index
    %c0_78 = arith.constant 0 : index
    %67 = vector.load %arg3[%c0_77, %c0_78] : memref<384x128xf32, #tpu.memory_space<vmem>>, vector<384x128xf32>
    %68 = arith.addf %67, %66 : vector<384x128xf32>
    %c0_79 = arith.constant 0 : index
    %c0_80 = arith.constant 0 : index
    %69 = vector.load %arg3[%c0_79, %c0_80] : memref<384x128xf32, #tpu.memory_space<vmem>>, vector<384x128xf32>
    tpu.vector_store %arg3[%c0_79, %c0_80], %68 {strides = array<i32>} : memref<384x128xf32, #tpu.memory_space<vmem>>, vector<384x128xf32>,
    return
  }
  func.func @transform_0(%arg0: i32) -> (i32, i32, i32) {
    %c0_i32 = arith.constant 0 : i32
    %c0_i32_0 = arith.constant 0 : i32
    %c0_i32_1 = arith.constant 0 : i32
    return %arg0, %c0_i32, %c0_i32_0 : i32, i32, i32
  }
  func.func @transform_1(%arg0: i32) -> (i32, i32, i32) {
    %c0_i32 = arith.constant 0 : i32
    %c0_i32_0 = arith.constant 0 : i32
    %c0_i32_1 = arith.constant 0 : i32
    %c0_i32_2 = arith.constant 0 : i32
    return %c0_i32, %c0_i32_0, %c0_i32_1 : i32, i32, i32
  }
  func.func @transform_2(%arg0: i32) -> (i32, i32) {
    %c0_i32 = arith.constant 0 : i32
    %c0_i32_0 = arith.constant 0 : i32
    return %arg0, %c0_i32 : i32, i32
  }
}

</mosaic_0001>

<bundles_post_ra>
// kernel: dilated_conv_forward.1
= control target key start
LH: loop header
LB: loop body
LE: loop exit
PB: predicated region body
PF: predicated region fallthrough
CT: control target
= control target key end

     0   :  { %s5117_s9 = smov 0   ;;  %s6286_s0 = inlined_call_operand.vmem [shape: f32[2,456,4], index: 0, kind: input, shape index: {}]   ;;  %s6287_s1 = inlined_call_operand.vmem [shape: f32[9,4,128], index: 1, kind: input, shape index: {}]   ;;  %s6288_s2 = inlined_call_operand.vmem [shape: f32[768,128], index: 2, kind: output, shape index: {}]  }
   0x1 LB: > { %s5123_s10 = sadd.s32 4294967295, %s5100_s9   ;;  %p4628_p0 = scmp.ge.s32.totalorder %s5100_s9, 1  ;;  %s5100_s9 = sphi %s5117_s9, %s12_s9  }
   0x2   : > { %p112_p1 = scmp.lt.s32.totalorder %s5100_s9, 3 }
   0x4   : > { %p113_p2 = pnand %p4628_p0, %p112_p1 }
   0x5   : > { %p134_p3 = scmp.lt.s32.totalorder (!%p113_p2), %s5123_s10, 1  ;;  %s139_s6 = smul.u32 (!%p113_p2), 48, %s5123_s10 }
   0x6   : > { %116 = sbr.rel (%p113_p2) target bundleno = 1013 (0x3f5), region = 28 }
   0x7   : > { %p140_p4 = scmp.lt.s32.totalorder (!%p113_p2), %s139_s6, 95 }
   0xb   : > { %v193_v0 = vld [vmem:[%s6287_s1] sm:$0xf]  ;;  %vm339_vm0 = vcmask 1043456   ;;  %v4680_v1 = vld [vmem:[%s6287_s1 + $0x4] sm:$0xf]  ;;  %s135_s19 = scalar_select %p134_p3, %s5123_s10, 1 }
   0xc   : > { %5082 = vmatpush.msk.msra.mxu1 %vm339_vm0, %v193_v0  ;;  %5083 = vmatpush.msk.msra.mxu2 %vm339_vm0, %v193_v0  ;;  %v4730_v2 = vld [vmem:[%s6287_s1 + $0x8] sm:$0xf]  ;;  %v4780_v3 = vld [vmem:[%s6287_s1 + $0xc] sm:$0xf]  ;;  %v4830_v4 = vld [vmem:[%s6287_s1 + $0x10] sm:$0xf] }
   0xd   : > { %5084 = vmatpush.msk.msra.mxu3 %vm339_vm0, %v193_v0  ;;  %4631 = vmatpush.msk.msra.mxu0 %vm339_vm0, %v193_v0  ;;  %s5085_s22 = smul.u32 456, %s135_s19  ;;  %vm194_vm1 = vcmask 31744   ;;  %v4880_v41 = vld [vmem:[%s6287_s1 + $0x14] sm:$0xf]  ;;  %v4930_v42 = vld [vmem:[%s6287_s1 + $0x18] sm:$0xf] }
   0xe   : > { %4681 = vmatpush.msk.msrb.mxu1 %vm339_vm0, %v4680_v1  ;;  %4731 = vmatpush.msk.msrb.mxu2 %vm339_vm0, %v4730_v2  ;;  %v4980_v47 = vld [vmem:[%s6287_s1 + $0x1c] sm:$0xf]  ;;  %v5030_v58 = vld [vmem:[%s6287_s1 + $0x20] sm:$0xf]  ;;  %s6290_s6 = smov (!%p140_p4, %s139_s6), 95 }
   0xf   : > { %4781 = vmatpush.msk.msrb.mxu3 %vm339_vm0, %v4780_v3  ;;  %4831 = vmatpush.msk.msrb.mxu0 %vm339_vm0, %v4830_v4  ;;  %s5155_s25 = scalar_lea.vmem %s6286_s0, %s5085_s22  ;;  %s4630_s7 = sshll.u32 %s6290_s6, 3 }
  0x10   : > { %v5158_v5 = vld [vmem:[%s5155_s25 + $0x60] sm:$0xff]  ;;  %v5172_v9 = vld [vmem:[%s5155_s25 + $0x68] sm:$0xff]  ;;  %v5186_v13 = vld [vmem:[%s5155_s25 + $0x70] sm:$0xff]  ;;  %s5384_s11 = scalar_lea.vmem %s6288_s2, %s4630_s7 }
  0x11   : > { %v5161_v6 = vld [vmem:[%s5155_s25 + $0xc0] sm:$0xff]  ;;  %4644 = vmatmul.msk.f32.vlgmr.msra.gmra.mxu1 %vm194_vm1, %v5158_v5  ;;  %v5175_v10 = vld [vmem:[%s5155_s25 + $0xc8] sm:$0xff]  ;;  %v5189_v14 = vld [vmem:[%s5155_s25 + $0xd0] sm:$0xff] }
  0x12   : > { %4656 = vmatmul.msk.f32.vlgmr.msra.gmra.mxu2 %vm194_vm1, %v5161_v6  ;;  %v181_v7 = vld [vmem:[%s5155_s25 + $0x120] sm:$0xff]  ;;  %v182_v11 = vld [vmem:[%s5155_s25 + $0x128] sm:$0xff]  ;;  %v183_v15 = vld [vmem:[%s5155_s25 + $0x130] sm:$0xff]  ;;  %4881 = vmatpush.msk.msra.mxu1 %vm339_vm0, %v4880_v41 }
  0x13   : > { %4668 = vmatmul.msk.f32.vlgmr.msra.gmra.mxu3 %vm194_vm1, %v181_v7  ;;  %v145_v8 = vld [vmem:[%s5155_s25] sm:$0xff]  ;;  %v146_v12 = vld [vmem:[%s5155_s25 + $0x8] sm:$0xff]  ;;  %v147_v16 = vld [vmem:[%s5155_s25 + $0x10] sm:$0xff]  ;;  %4931 = vmatpush.msk.msra.mxu2 %vm339_vm0, %v4930_v42 }
  0x14   : > { %4632 = vmatmul.msk.f32.vlgmr.msra.gmra.mxu0 %vm194_vm1, %v145_v8  ;;  %v5200_v17 = vld [vmem:[%s5155_s25 + $0x78] sm:$0xff]  ;;  %v5214_v21 = vld [vmem:[%s5155_s25 + $0x80] sm:$0xff]  ;;  %v5228_v25 = vld [vmem:[%s5155_s25 + $0x88] sm:$0xff]  ;;  %4981 = vmatpush.msk.msra.mxu3 %vm339_vm0, %v4980_v47 }
  0x15   : > { %v172_v18 = vld [vmem:[%s5155_s25 + $0xd8] sm:$0xff]  ;;  %v173_v22 = vld [vmem:[%s5155_s25 + $0xe0] sm:$0xff]  ;;  %v174_v26 = vld [vmem:[%s5155_s25 + $0xe8] sm:$0xff]  ;;  %5031 = vmatpush.msk.msra.mxu0 %vm339_vm0, %v5030_v58 }
  0x16   : > { %v184_v19 = vld [vmem:[%s5155_s25 + $0x138] sm:$0xff]  ;;  %v185_v23 = vld [vmem:[%s5155_s25 + $0x140] sm:$0xff]  ;;  %v186_v27 = vld [vmem:[%s5155_s25 + $0x148] sm:$0xff] }
  0x17   : > { %v5208_v20 = vld [vmem:[%s5155_s25 + $0x18] sm:$0xff]  ;;  %v5222_v24 = vld [vmem:[%s5155_s25 + $0x20] sm:$0xff]  ;;  %v5236_v28 = vld [vmem:[%s5155_s25 + $0x28] sm:$0xff] }
  0x18   : > { %v5242_v29 = vld [vmem:[%s5155_s25 + $0x90] sm:$0xff]  ;;  %v5256_v33 = vld [vmem:[%s5155_s25 + $0x98] sm:$0xff]  ;;  %v5270_v37 = vld [vmem:[%s5155_s25 + $0xa0] sm:$0xff] }
  0x19   : > { %4645 = vmatmul.msk.f32.gmra.mxu1 %vm194_vm1, %v5172_v9  ;;  %v175_v30 = vld [vmem:[%s5155_s25 + $0xf0] sm:$0xff]  ;;  %v176_v34 = vld [vmem:[%s5155_s25 + $0xf8] sm:$0xff]  ;;  %v177_v38 = vld [vmem:[%s5155_s25 + $0x100] sm:$0xff] }
  0x1a   : > { %4657 = vmatmul.msk.f32.gmra.mxu2 %vm194_vm1, %v5175_v10  ;;  %v187_v31 = vld [vmem:[%s5155_s25 + $0x150] sm:$0xff]  ;;  %v188_v35 = vld [vmem:[%s5155_s25 + $0x158] sm:$0xff]  ;;  %v189_v39 = vld [vmem:[%s5155_s25 + $0x160] sm:$0xff] }
  0x1b   : > { %4669 = vmatmul.msk.f32.gmra.mxu3 %vm194_vm1, %v182_v11  ;;  %v5250_v32 = vld [vmem:[%s5155_s25 + $0x30] sm:$0xff]  ;;  %v5264_v36 = vld [vmem:[%s5155_s25 + $0x38] sm:$0xff]  ;;  %v5278_v40 = vld [vmem:[%s5155_s25 + $0x40] sm:$0xff] }
  0x1c   : > { %4633 = vmatmul.msk.f32.gmra.mxu0 %vm194_vm1, %v146_v12  ;;  %v5292_v43 = vld [vmem:[%s5155_s25 + $0xa8] sm:$0xff]  ;;  %v5310_v48 = vld [vmem:[%s5155_s25 + $0xb0] sm:$0xff]  ;;  %v5324_v52 = vld [vmem:[%s5155_s25 + $0xb8] sm:$0xff] }
  0x1d   : > { %v178_v44 = vld [vmem:[%s5155_s25 + $0x108] sm:$0xff]  ;;  %v179_v49 = vld [vmem:[%s5155_s25 + $0x110] sm:$0xff]  ;;  %v180_v53 = vld [vmem:[%s5155_s25 + $0x118] sm:$0xff] }
  0x1e   : > { %v190_v45 = vld [vmem:[%s5155_s25 + $0x168] sm:$0xff]  ;;  %v191_v50 = vld [vmem:[%s5155_s25 + $0x170] sm:$0xff]  ;;  %v192_v54 = vld [vmem:[%s5155_s25 + $0x178] sm:$0xff] }
  0x1f   : > { %v5300_v46 = vld [vmem:[%s5155_s25 + $0x48] sm:$0xff]  ;;  %v5318_v51 = vld [vmem:[%s5155_s25 + $0x50] sm:$0xff]  ;;  %v5332_v55 = vld [vmem:[%s5155_s25 + $0x58] sm:$0xff] }
  0x20   : > { %v552_v56 = vld [vmem:[%s5155_s25 + $0x1] sm:$0xff]  ;;  %v555_v59 = vld [vmem:[%s5155_s25 + $0x19] sm:$0xff]  ;;  %v553_v60 = vld [vmem:[%s5155_s25 + $0x9] sm:$0xff] }
  0x21   : > { %4646 = vmatmul.msk.f32.gmra.mxu1 %vm194_vm1, %v5186_v13  ;;  %v1054_v57 = vld [vmem:[%s5155_s25 + $0x2] sm:$0xff]  ;;  %v1055_v61 = vld [vmem:[%s5155_s25 + $0xa] sm:$0xff]  ;;  %v1056_v0 = vld [vmem:[%s5155_s25 + $0x12] sm:$0xff] }
  0x22   : > { %4658 = vmatmul.msk.f32.gmra.mxu2 %vm194_vm1, %v5189_v14  ;;  %v556_v62 = vld [vmem:[%s5155_s25 + $0x21] sm:$0xff]  ;;  %v554_v63 = vld [vmem:[%s5155_s25 + $0x11] sm:$0xff]  ;;  %v557_v1 = vld [vmem:[%s5155_s25 + $0x29] sm:$0xff] }
  0x23   : > { %4670 = vmatmul.msk.f32.gmra.mxu3 %vm194_vm1, %v183_v15  ;;  %v1057_v2 = vld [vmem:[%s5155_s25 + $0x1a] sm:$0xff]  ;;  %v558_v3 = vld [vmem:[%s5155_s25 + $0x31] sm:$0xff]  ;;  %v1058_v7 = vld [vmem:[%s5155_s25 + $0x22] sm:$0xff] }
  0x24   : > { %4634 = vmatmul.msk.f32.gmra.mxu0 %vm194_vm1, %v147_v16  ;;  %v559_v8 = vld [vmem:[%s5155_s25 + $0x39] sm:$0xff]  ;;  %v1062_v41 = vld [vmem:[%s5155_s25 + $0x42] sm:$0xff] }
  0x25   : > { %v563_v42 = vld [vmem:[%s5155_s25 + $0x59] sm:$0xff] }
  0x29   : > { %4647 = vmatmul.msk.f32.gmra.mxu1 %vm194_vm1, %v5200_v17 }
  0x2a   : > { %4659 = vmatmul.msk.f32.gmra.mxu2 %vm194_vm1, %v172_v18  ;;  %v1059_v18 = vld [vmem:[%s5155_s25 + $0x2a] sm:$0xff] }
  0x2b   : > { %4671 = vmatmul.msk.f32.gmra.mxu3 %vm194_vm1, %v184_v19  ;;  %v560_v19 = vld [vmem:[%s5155_s25 + $0x41] sm:$0xff] }
  0x2c   : > { %4635 = vmatmul.msk.f32.gmra.mxu0 %vm194_vm1, %v5208_v20 }
  0x31   : > { %4648 = vmatmul.msk.f32.gmra.mxu1 %vm194_vm1, %v5214_v21 }
  0x32   : > { %4660 = vmatmul.msk.f32.gmra.mxu2 %vm194_vm1, %v173_v22 }
  0x33   : > { %4672 = vmatmul.msk.f32.gmra.mxu3 %vm194_vm1, %v185_v23 }
  0x34   : > { %4636 = vmatmul.msk.f32.gmra.mxu0 %vm194_vm1, %v5222_v24 }
  0x39   : > { %4649 = vmatmul.msk.f32.gmra.mxu1 %vm194_vm1, %v5228_v25 }
  0x3a   : > { %4661 = vmatmul.msk.f32.gmra.mxu2 %vm194_vm1, %v174_v26  ;;  %v1060_v26 = vld [vmem:[%s5155_s25 + $0x32] sm:$0xff] }
  0x3b   : > { %4673 = vmatmul.msk.f32.gmra.mxu3 %vm194_vm1, %v186_v27  ;;  %v561_v27 = vld [vmem:[%s5155_s25 + $0x49] sm:$0xff] }
  0x3c   : > { %4637 = vmatmul.msk.f32.gmra.mxu0 %vm194_vm1, %v5236_v28 }
  0x41   : > { %4650 = vmatmul.msk.f32.gmra.mxu1 %vm194_vm1, %v5242_v29 }
  0x42   : > { %4662 = vmatmul.msk.f32.gmra.mxu2 %vm194_vm1, %v175_v30 }
  0x43   : > { %4674 = vmatmul.msk.f32.gmra.mxu3 %vm194_vm1, %v187_v31 }
  0x44   : > { %4638 = vmatmul.msk.f32.gmra.mxu0 %vm194_vm1, %v5250_v32 }
  0x49   : > { %4651 = vmatmul.msk.f32.gmra.mxu1 %vm194_vm1, %v5256_v33 }
  0x4a   : > { %4663 = vmatmul.msk.f32.gmra.mxu2 %vm194_vm1, %v176_v34  ;;  %v1061_v34 = vld [vmem:[%s5155_s25 + $0x3a] sm:$0xff] }
  0x4b   : > { %4675 = vmatmul.msk.f32.gmra.mxu3 %vm194_vm1, %v188_v35  ;;  %v562_v35 = vld [vmem:[%s5155_s25 + $0x51] sm:$0xff] }
  0x4c   : > { %4639 = vmatmul.msk.f32.gmra.mxu0 %vm194_vm1, %v5264_v36 }
  0x51   : > { %4652 = vmatmul.msk.f32.gmra.mxu1 %vm194_vm1, %v5270_v37 }
  0x52   : > { %4664 = vmatmul.msk.f32.gmra.mxu2 %vm194_vm1, %v177_v38 }
  0x53   : > { %4676 = vmatmul.msk.f32.gmra.mxu3 %vm194_vm1, %v189_v39 }
  0x54   : > { %4640 = vmatmul.msk.f32.gmra.mxu0 %vm194_vm1, %v5278_v40 }
  0x59   : > { %4653 = vmatmul.msk.f32.gmra.mxu1 %vm194_vm1, %v5292_v43 }
  0x5a   : > { %4665 = vmatmul.msk.f32.gmra.mxu2 %vm194_vm1, %v178_v44 }
  0x5b   : > { %4677 = vmatmul.msk.f32.gmra.mxu3 %vm194_vm1, %v190_v45 }
  0x5c   : > { %4641 = vmatmul.msk.f32.gmra.mxu0 %vm194_vm1, %v5300_v46 }
  0x61   : > { %4654 = vmatmul.msk.f32.gmra.mxu1 %vm194_vm1, %v5310_v48 }
  0x62   : > { %4666 = vmatmul.msk.f32.gmra.mxu2 %vm194_vm1, %v179_v49  ;;  %v1063_v49 = vld [vmem:[%s5155_s25 + $0x4a] sm:$0xff] }
  0x63   : > { %4678 = vmatmul.msk.f32.gmra.mxu3 %vm194_vm1, %v191_v50  ;;  %v564_v50 = vld [vmem:[%s5155_s25 + $0x61] sm:$0xff] }
  0x64   : > { %4642 = vmatmul.msk.f32.gmra.mxu0 %vm194_vm1, %v5318_v51 }
  0x69   : > { %4655 = vmatmul.msk.f32.gmra.mxu1 %vm194_vm1, %v5324_v52 }
  0x6a   : > { %4667 = vmatmul.msk.f32.gmra.mxu2 %vm194_vm1, %v180_v53 }
  0x6b   : > { %4679 = vmatmul.msk.f32.gmra.mxu3 %vm194_vm1, %v192_v54 }
  0x6c   : > { %4643 = vmatmul.msk.f32.gmra.mxu0 %vm194_vm1, %v5332_v55 }
  0x71   : > { %4682 = vmatmul.msk.f32.vlgmr.msrb.gmra.mxu1 %vm194_vm1, %v552_v56  ;;  %v1064_v56 = vld [vmem:[%s5155_s25 + $0x52] sm:$0xff] }
  0x72   : > { %4732 = vmatmul.msk.f32.vlgmr.msrb.gmra.mxu2 %vm194_vm1, %v1054_v57  ;;  %v565_v57 = vld [vmem:[%s5155_s25 + $0x69] sm:$0xff] }
  0x73   : > { %4782 = vmatmul.msk.f32.vlgmr.msrb.gmra.mxu3 %vm194_vm1, %v5208_v20 }
  0x74   : > { %4832 = vmatmul.msk.f32.vlgmr.msrb.gmra.mxu0 %vm194_vm1, %v555_v59 }
  0x79   : > { %4683 = vmatmul.msk.f32.gmra.mxu1 %vm194_vm1, %v553_v60 }
  0x7a   : > { %4733 = vmatmul.msk.f32.gmra.mxu2 %vm194_vm1, %v1055_v61  ;;  %v1065_v61 = vld [vmem:[%s5155_s25 + $0x5a] sm:$0xff] }
  0x7b   : > { %4783 = vmatmul.msk.f32.gmra.mxu3 %vm194_vm1, %v5222_v24 }
  0x7c   : > { %4833 = vmatmul.msk.f32.gmra.mxu0 %vm194_vm1, %v556_v62 }
  0x81   : > { %4684 = vmatmul.msk.f32.gmra.mxu1 %vm194_vm1, %v554_v63 }
  0x82   : > { %4734 = vmatmul.msk.f32.gmra.mxu2 %vm194_vm1, %v1056_v0 }
  0x83   : > { %4784 = vmatmul.msk.f32.gmra.mxu3 %vm194_vm1, %v5236_v28 }
  0x84   : > { %4834 = vmatmul.msk.f32.gmra.mxu0 %vm194_vm1, %v557_v1 }
  0x89   : > { %4685 = vmatmul.msk.f32.gmra.mxu1 %vm194_vm1, %v555_v59 }
  0x8a   : > { %4735 = vmatmul.msk.f32.gmra.mxu2 %vm194_vm1, %v1057_v2  ;;  %v1066_v2 = vld [vmem:[%s5155_s25 + $0x62] sm:$0xff] }
  0x8b   : > { %4785 = vmatmul.msk.f32.gmra.mxu3 %vm194_vm1, %v5250_v32 }
  0x8c   : > { %4835 = vmatmul.msk.f32.gmra.mxu0 %vm194_vm1, %v558_v3 }
  0x8e   : > { %v5373_v4 = vpop.f32.mrf.mxu1 }
  0x91   : > { %4686 = vmatmul.msk.f32.gmra.mxu1 %vm194_vm1, %v556_v62  ;;  %v5379_v11 = vpop.f32.mrf.mxu0  ;;  %v566_v62 = vld [vmem:[%s5155_s25 + $0x71] sm:$0xff] }
  0x92   : > { %4736 = vmatmul.msk.f32.gmra.mxu2 %vm194_vm1, %v1058_v7 }
  0x93   : > { %4786 = vmatmul.msk.f32.gmra.mxu3 %vm194_vm1, %v5264_v36 }
  0x94   : > { %4836 = vmatmul.msk.f32.gmra.mxu0 %vm194_vm1, %v559_v8 }
  0x95   : > { %v432_v12 = vpop.f32.mrf.mxu2 }
  0x96   : > { %528 = vst [vmem:[%s5384_s11 + $0xc0] sm:$0xff] %v432_v12  ;;  %v468_v15 = vpop.f32.mrf.mxu3  ;;  %v5390_v16 = vpop.f32.mrf.mxu1 }
  0x97   : > { %540 = vst [vmem:[%s5384_s11 + $0x120] sm:$0xff] %v468_v15  ;;  %v1067_v15 = vld [vmem:[%s5155_s25 + $0x6a] sm:$0xff] }
  0x99   : > { %4687 = vmatmul.msk.f32.gmra.mxu1 %vm194_vm1, %v557_v1  ;;  %v5397_v20 = vpop.f32.mrf.mxu0 }
  0x9a   : > { %4737 = vmatmul.msk.f32.gmra.mxu2 %vm194_vm1, %v1059_v18  ;;  %v568_v18 = vld [vmem:[%s5155_s25 + $0x81] sm:$0xff] }
  0x9b   : > { %4787 = vmatmul.msk.f32.gmra.mxu3 %vm194_vm1, %v5278_v40 }
  0x9c   : > { %4837 = vmatmul.msk.f32.gmra.mxu0 %vm194_vm1, %v560_v19 }
  0x9d   : > { %v435_v22 = vpop.f32.mrf.mxu2 }
  0x9e   : > { %529 = vst [vmem:[%s5384_s11 + $0xc8] sm:$0xff] %v435_v22  ;;  %v471_v23 = vpop.f32.mrf.mxu3  ;;  %v5403_v24 = vpop.f32.mrf.mxu1 }
  0x9f   : > { %541 = vst [vmem:[%s5384_s11 + $0x128] sm:$0xff] %v471_v23 }
  0xa1   : > { %4688 = vmatmul.msk.f32.gmra.mxu1 %vm194_vm1, %v558_v3  ;;  %v5410_v28 = vpop.f32.mrf.mxu0  ;;  %v567_v3 = vld [vmem:[%s5155_s25 + $0x79] sm:$0xff] }
  0xa2   : > { %4738 = vmatmul.msk.f32.gmra.mxu2 %vm194_vm1, %v1060_v26  ;;  %v1068_v26 = vld [vmem:[%s5155_s25 + $0x72] sm:$0xff] }
  0xa3   : > { %4788 = vmatmul.msk.f32.gmra.mxu3 %vm194_vm1, %v5300_v46 }
  0xa4   : > { %4838 = vmatmul.msk.f32.gmra.mxu0 %vm194_vm1, %v561_v27 }
  0xa5   : > { %v438_v30 = vpop.f32.mrf.mxu2 }
  0xa6   : > { %530 = vst [vmem:[%s5384_s11 + $0xd0] sm:$0xff] %v438_v30  ;;  %v474_v31 = vpop.f32.mrf.mxu3  ;;  %v5416_v32 = vpop.f32.mrf.mxu1 }
  0xa7   : > { %542 = vst [vmem:[%s5384_s11 + $0x130] sm:$0xff] %v474_v31 }
  0xa9   : > { %4689 = vmatmul.msk.f32.gmra.mxu1 %vm194_vm1, %v559_v8  ;;  %v5423_v36 = vpop.f32.mrf.mxu0 }
  0xaa   : > { %4739 = vmatmul.msk.f32.gmra.mxu2 %vm194_vm1, %v1061_v34 }
  0xab   : > { %4789 = vmatmul.msk.f32.gmra.mxu3 %vm194_vm1, %v5318_v51 }
  0xac   : > { %4839 = vmatmul.msk.f32.gmra.mxu0 %vm194_vm1, %v562_v35 }
  0xad   : > { %v441_v38 = vpop.f32.mrf.mxu2 }
  0xae   : > { %531 = vst [vmem:[%s5384_s11 + $0xd8] sm:$0xff] %v441_v38  ;;  %v477_v39 = vpop.f32.mrf.mxu3  ;;  %v5429_v40 = vpop.f32.mrf.mxu1  ;;  %v570_v38 = vld [vmem:[%s5155_s25 + $0x91] sm:$0xff] }
  0xaf   : > { %543 = vst [vmem:[%s5384_s11 + $0x138] sm:$0xff] %v477_v39 }
  0xb1   : > { %4690 = vmatmul.msk.f32.gmra.mxu1 %vm194_vm1, %v560_v19  ;;  %v5436_v44 = vpop.f32.mrf.mxu0 }
  0xb2   : > { %4740 = vmatmul.msk.f32.gmra.mxu2 %vm194_vm1, %v1062_v41 }
  0xb3   : > { %4790 = vmatmul.msk.f32.gmra.mxu3 %vm194_vm1, %v5332_v55 }
  0xb4   : > { %4840 = vmatmul.msk.f32.gmra.mxu0 %vm194_vm1, %v563_v42 }
  0xb5   : > { %v444_v45 = vpop.f32.mrf.mxu2 }
  0xb6   : > { %532 = vst [vmem:[%s5384_s11 + $0xe0] sm:$0xff] %v444_v45  ;;  %v480_v46 = vpop.f32.mrf.mxu3  ;;  %v5442_v47 = vpop.f32.mrf.mxu1  ;;  %v1070_v45 = vld [vmem:[%s5155_s25 + $0x82] sm:$0xff] }
  0xb7   : > { %544 = vst [vmem:[%s5384_s11 + $0x140] sm:$0xff] %v480_v46  ;;  %v571_v46 = vld [vmem:[%s5155_s25 + $0x99] sm:$0xff] }
  0xb9   : > { %4691 = vmatmul.msk.f32.gmra.mxu1 %vm194_vm1, %v561_v27  ;;  %v5449_v51 = vpop.f32.mrf.mxu0  ;;  %v569_v27 = vld [vmem:[%s5155_s25 + $0x89] sm:$0xff] }
  0xba   : > { %4741 = vmatmul.msk.f32.gmra.mxu2 %vm194_vm1, %v1063_v49 }
  0xbb   : > { %4791 = vmatmul.msk.f32.gmra.mxu3 %vm194_vm1, %v5158_v5 }
  0xbc   : > { %4841 = vmatmul.msk.f32.gmra.mxu0 %vm194_vm1, %v564_v50 }
  0xbd   : > { %v447_v53 = vpop.f32.mrf.mxu2 }
  0xbe   : > { %533 = vst [vmem:[%s5384_s11 + $0xe8] sm:$0xff] %v447_v53  ;;  %v483_v54 = vpop.f32.mrf.mxu3  ;;  %v414_v55 = vpop.f32.mrf.mxu1 }
  0xbf   : > { %545 = vst [vmem:[%s5384_s11 + $0x148] sm:$0xff] %v483_v54 }
  0xc0   : > { %522 = vst [vmem:[%s5384_s11 + $0x90] sm:$0xff] %v414_v55 }
  0xc1   : > { %4692 = vmatmul.msk.f32.gmra.mxu1 %vm194_vm1, %v562_v35  ;;  %v5461_v5 = vpop.f32.mrf.mxu0  ;;  %v1069_v35 = vld [vmem:[%s5155_s25 + $0x7a] sm:$0xff] }
  0xc2   : > { %4742 = vmatmul.msk.f32.gmra.mxu2 %vm194_vm1, %v1064_v56  ;;  %v1071_v56 = vld [vmem:[%s5155_s25 + $0x8a] sm:$0xff] }
  0xc3   : > { %4792 = vmatmul.msk.f32.gmra.mxu3 %vm194_vm1, %v5172_v9 }
  0xc4   : > { %4842 = vmatmul.msk.f32.gmra.mxu0 %vm194_vm1, %v565_v57 }
  0xc5   : > { %v450_v58 = vpop.f32.mrf.mxu2 }
  0xc6   : > { %534 = vst [vmem:[%s5384_s11 + $0xf0] sm:$0xff] %v450_v58  ;;  %v486_v59 = vpop.f32.mrf.mxu3  ;;  %v417_v60 = vpop.f32.mrf.mxu1 }
  0xc7   : > { %546 = vst [vmem:[%s5384_s11 + $0x150] sm:$0xff] %v486_v59  ;;  %v572_v59 = vld [vmem:[%s5155_s25 + $0xa1] sm:$0xff] }
  0xc8   : > { %523 = vst [vmem:[%s5384_s11 + $0x98] sm:$0xff] %v417_v60 }
  0xc9   : > { %4693 = vmatmul.msk.f32.gmra.mxu1 %vm194_vm1, %v563_v42  ;;  %v5473_v9 = vpop.f32.mrf.mxu0 }
  0xca   : > { %4743 = vmatmul.msk.f32.gmra.mxu2 %vm194_vm1, %v1065_v61 }
  0xcb   : > { %4793 = vmatmul.msk.f32.gmra.mxu3 %vm194_vm1, %v5186_v13 }
  0xcc   : > { %4843 = vmatmul.msk.f32.gmra.mxu0 %vm194_vm1, %v566_v62 }
  0xcd   : > { %v453_v63 = vpop.f32.mrf.mxu2 }
  0xce   : > { %535 = vst [vmem:[%s5384_s11 + $0xf8] sm:$0xff] %v453_v63  ;;  %v489_v0 = vpop.f32.mrf.mxu3  ;;  %v420_v1 = vpop.f32.mrf.mxu1 }
  0xcf   : > { %547 = vst [vmem:[%s5384_s11 + $0x158] sm:$0xff] %v489_v0  ;;  %v1072_v0 = vld [vmem:[%s5155_s25 + $0x92] sm:$0xff] }
  0xd0   : > { %524 = vst [vmem:[%s5384_s11 + $0xa0] sm:$0xff] %v420_v1 }
  0xd1   : > { %4694 = vmatmul.msk.f32.gmra.mxu1 %vm194_vm1, %v564_v50  ;;  %v5485_v13 = vpop.f32.mrf.mxu0 }
  0xd2   : > { %4744 = vmatmul.msk.f32.gmra.mxu2 %vm194_vm1, %v1066_v2 }
  0xd3   : > { %4794 = vmatmul.msk.f32.gmra.mxu3 %vm194_vm1, %v5200_v17 }
  0xd4   : > { %4844 = vmatmul.msk.f32.gmra.mxu0 %vm194_vm1, %v567_v3 }
  0xd5   : > { %v456_v7 = vpop.f32.mrf.mxu2 }
  0xd6   : > { %536 = vst [vmem:[%s5384_s11 + $0x100] sm:$0xff] %v456_v7  ;;  %v492_v8 = vpop.f32.mrf.mxu3  ;;  %v423_v12 = vpop.f32.mrf.mxu1 }
  0xd7   : > { %548 = vst [vmem:[%s5384_s11 + $0x160] sm:$0xff] %v492_v8 }
  0xd8   : > { %525 = vst [vmem:[%s5384_s11 + $0xa8] sm:$0xff] %v423_v12 }
  0xd9   : > { %4695 = vmatmul.msk.f32.gmra.mxu1 %vm194_vm1, %v565_v57  ;;  %v5497_v17 = vpop.f32.mrf.mxu0 }
  0xda   : > { %4745 = vmatmul.msk.f32.gmra.mxu2 %vm194_vm1, %v1067_v15 }
  0xdb   : > { %4795 = vmatmul.msk.f32.gmra.mxu3 %vm194_vm1, %v5214_v21 }
  0xdc   : > { %4845 = vmatmul.msk.f32.gmra.mxu0 %vm194_vm1, %v568_v18 }
  0xdd   : > { %v459_v19 = vpop.f32.mrf.mxu2 }
  0xde   : > { %537 = vst [vmem:[%s5384_s11 + $0x108] sm:$0xff] %v459_v19  ;;  %v495_v22 = vpop.f32.mrf.mxu3  ;;  %v426_v23 = vpop.f32.mrf.mxu1 }
  0xdf   : > { %549 = vst [vmem:[%s5384_s11 + $0x168] sm:$0xff] %v495_v22 }
  0xe0   : > { %526 = vst [vmem:[%s5384_s11 + $0xb0] sm:$0xff] %v426_v23 }
  0xe1   : > { %4696 = vmatmul.msk.f32.gmra.mxu1 %vm194_vm1, %v566_v62  ;;  %v5509_v21 = vpop.f32.mrf.mxu0 }
  0xe2   : > { %4746 = vmatmul.msk.f32.gmra.mxu2 %vm194_vm1, %v1068_v26 }
  0xe3   : > { %4796 = vmatmul.msk.f32.gmra.mxu3 %vm194_vm1, %v5228_v25 }
  0xe4   : > { %4846 = vmatmul.msk.f32.gmra.mxu0 %vm194_vm1, %v569_v27 }
  0xe5   : > { %v462_v30 = vpop.f32.mrf.mxu2 }
  0xe6   : > { %538 = vst [vmem:[%s5384_s11 + $0x110] sm:$0xff] %v462_v30  ;;  %v498_v31 = vpop.f32.mrf.mxu3  ;;  %v429_v34 = vpop.f32.mrf.mxu1 }
  0xe7   : > { %550 = vst [vmem:[%s5384_s11 + $0x170] sm:$0xff] %v498_v31 }
  0xe8   : > { %527 = vst [vmem:[%s5384_s11 + $0xb8] sm:$0xff] %v429_v34  ;;  %v1074_v34 = vld [vmem:[%s5155_s25 + $0xa2] sm:$0xff] }
  0xe9   : > { %4697 = vmatmul.msk.f32.gmra.mxu1 %vm194_vm1, %v567_v3  ;;  %v5521_v39 = vpop.f32.mrf.mxu0 }
  0xea   : > { %4747 = vmatmul.msk.f32.gmra.mxu2 %vm194_vm1, %v1069_v35 }
  0xeb   : > { %4797 = vmatmul.msk.f32.gmra.mxu3 %vm194_vm1, %v5242_v29 }
  0xec   : > { %4847 = vmatmul.msk.f32.gmra.mxu0 %vm194_vm1, %v570_v38 }
  0xed   : > { %v465_v25 = vpop.f32.mrf.mxu2 }
  0xee   : > { %539 = vst [vmem:[%s5384_s11 + $0x118] sm:$0xff] %v465_v25  ;;  %v501_v41 = vpop.f32.mrf.mxu3  ;;  %v766_v42 = vpop.f32.mrf.mxu1 }
  0xef   : > { %551 = vst [vmem:[%s5384_s11 + $0x178] sm:$0xff] %v501_v41  ;;  %v958_v29 = vadd.f32 %v766_v42, %v5379_v11 }
  0xf1   : > { %4698 = vmatmul.msk.f32.gmra.mxu1 %vm194_vm1, %v568_v18  ;;  %v2272_v49 = vpop.f32.mrf.mxu0  ;;  %v1073_v18 = vld [vmem:[%s5155_s25 + $0x9a] sm:$0xff] }
  0xf2   : > { %4748 = vmatmul.msk.f32.gmra.mxu2 %vm194_vm1, %v1070_v45 }
  0xf3   : > { %4798 = vmatmul.msk.f32.gmra.mxu3 %vm194_vm1, %v5256_v33 }
  0xf4   : > { %4848 = vmatmul.msk.f32.gmra.mxu0 %vm194_vm1, %v571_v46 }
  0xf5   : > { %v1268_v50 = vpop.f32.mrf.mxu2 }
  0xf6   : > { %v1460_v53 = vadd.f32 %v1268_v50, %v958_v29  ;;  %v1770_v54 = vpop.f32.mrf.mxu3  ;;  %v769_v55 = vpop.f32.mrf.mxu1 }
  0xf7   : > { %v959_v11 = vadd.f32 %v769_v55, %v5397_v20 }
  0xf8   : > { %v1962_v57 = vadd.f32 %v1770_v54, %v1460_v53 }
  0xf9   : > { %4699 = vmatmul.msk.f32.gmra.mxu1 %vm194_vm1, %v569_v27  ;;  %v2275_v33 = vpop.f32.mrf.mxu0 }
  0xfa   : > { %4749 = vmatmul.msk.f32.gmra.mxu2 %vm194_vm1, %v1071_v56  ;;  %v2464_v58 = vadd.f32 %v2272_v49, %v1962_v57  ;;  %v1075_v49 = vld [vmem:[%s5155_s25 + $0xaa] sm:$0xff] }
  0xfb   : > { %4799 = vmatmul.msk.f32.gmra.mxu3 %vm194_vm1, %v5270_v37  ;;  %v573_v37 = vld [vmem:[%s5155_s25 + $0xa9] sm:$0xff] }
  0xfc   : > { %2512 = vst [vmem:[%s5384_s11] sm:$0xff] %v2464_v58  ;;  %4849 = vmatmul.msk.f32.gmra.mxu0 %vm194_vm1, %v572_v59  ;;  %v1076_v58 = vld [vmem:[%s5155_s25 + $0xb2] sm:$0xff] }
  0xfd   : > { %v1271_v60 = vpop.f32.mrf.mxu2 }
  0xfe   : > { %v1461_v61 = vadd.f32 %v1271_v60, %v959_v11  ;;  %v1773_v62 = vpop.f32.mrf.mxu3  ;;  %v772_v63 = vpop.f32.mrf.mxu1 }
  0xff   : > { %v960_v20 = vadd.f32 %v772_v63, %v5410_v28 }
 0x100   : > { %v1963_v1 = vadd.f32 %v1773_v62, %v1461_v61 }
 0x101   : > { %4700 = vmatmul.msk.f32.gmra.mxu1 %vm194_vm1, %v570_v38  ;;  %v2278_v3 = vpop.f32.mrf.mxu0 }
 0x102   : > { %4750 = vmatmul.msk.f32.gmra.mxu2 %vm194_vm1, %v1072_v0  ;;  %v2465_v2 = vadd.f32 %v2275_v33, %v1963_v1  ;;  %v1077_v0 = vld [vmem:[%s5155_s25 + $0xba] sm:$0xff] }
 0x103   : > { %4800 = vmatmul.msk.f32.gmra.mxu3 %vm194_vm1, %v5292_v43  ;;  %v574_v43 = vld [vmem:[%s5155_s25 + $0xb1] sm:$0xff] }
 0x104   : > { %2513 = vst [vmem:[%s5384_s11 + $0x8] sm:$0xff] %v2465_v2  ;;  %4850 = vmatmul.msk.f32.gmra.mxu0 %vm194_vm1, %v573_v37 }
 0x105   : > { %v1274_v7 = vpop.f32.mrf.mxu2 }
 0x106   : > { %v1462_v8 = vadd.f32 %v1274_v7, %v960_v20  ;;  %v1776_v12 = vpop.f32.mrf.mxu3  ;;  %v775_v15 = vpop.f32.mrf.mxu1 }
 0x107   : > { %v961_v28 = vadd.f32 %v775_v15, %v5423_v36 }
 0x108   : > { %v1964_v19 = vadd.f32 %v1776_v12, %v1462_v8  ;;  %v1078_v12 = vld [vmem:[%s5155_s25 + $0xc2] sm:$0xff] }
 0x109   : > { %4701 = vmatmul.msk.f32.gmra.mxu1 %vm194_vm1, %v571_v46  ;;  %v2281_v23 = vpop.f32.mrf.mxu0 }
 0x10a   : > { %4751 = vmatmul.msk.f32.gmra.mxu2 %vm194_vm1, %v1073_v18  ;;  %v2466_v22 = vadd.f32 %v2278_v3, %v1964_v19  ;;  %v1580_v18 = vld [vmem:[%s5155_s25 + $0xd8] sm:$0xff] }
 0x10b   : > { %4801 = vmatmul.msk.f32.gmra.mxu3 %vm194_vm1, %v5310_v48  ;;  %v575_v48 = vld [vmem:[%s5155_s25 + $0xb9] sm:$0xff] }
 0x10c   : > { %2514 = vst [vmem:[%s5384_s11 + $0x10] sm:$0xff] %v2466_v22  ;;  %4851 = vmatmul.msk.f32.gmra.mxu0 %vm194_vm1, %v574_v43  ;;  %v579_v19 = vld [vmem:[%s5155_s25 + $0xd9] sm:$0xff] }
 0x10d   : > { %v1277_v26 = vpop.f32.mrf.mxu2 }
 0x10e   : > { %v1463_v27 = vadd.f32 %v1277_v26, %v961_v28  ;;  %v1779_v30 = vpop.f32.mrf.mxu3  ;;  %v778_v31 = vpop.f32.mrf.mxu1 }
 0x10f   : > { %v962_v36 = vadd.f32 %v778_v31, %v5436_v44  ;;  %v1581_v31 = vld [vmem:[%s5155_s25 + $0xe0] sm:$0xff] }
 0x110   : > { %v1965_v35 = vadd.f32 %v1779_v30, %v1463_v27  ;;  %v1079_v27 = vld [vmem:[%s5155_s25 + $0xca] sm:$0xff] }
 0x111   : > { %4702 = vmatmul.msk.f32.gmra.mxu1 %vm194_vm1, %v572_v59  ;;  %v2284_v25 = vpop.f32.mrf.mxu0 }
 0x112   : > { %4752 = vmatmul.msk.f32.gmra.mxu2 %vm194_vm1, %v1074_v34  ;;  %v2467_v38 = vadd.f32 %v2281_v23, %v1965_v35  ;;  %v580_v35 = vld [vmem:[%s5155_s25 + $0xe1] sm:$0xff] }
 0x113   : > { %4802 = vmatmul.msk.f32.gmra.mxu3 %vm194_vm1, %v5324_v52  ;;  %v576_v52 = vld [vmem:[%s5155_s25 + $0xc1] sm:$0xff] }
 0x114   : > { %2515 = vst [vmem:[%s5384_s11 + $0x18] sm:$0xff] %v2467_v38  ;;  %4852 = vmatmul.msk.f32.gmra.mxu0 %vm194_vm1, %v575_v48 }
 0x115   : > { %v1280_v41 = vpop.f32.mrf.mxu2 }
 0x116   : > { %v1464_v42 = vadd.f32 %v1280_v41, %v962_v36  ;;  %v1782_v45 = vpop.f32.mrf.mxu3  ;;  %v781_v46 = vpop.f32.mrf.mxu1 }
 0x117   : > { %v963_v44 = vadd.f32 %v781_v46, %v5449_v51  ;;  %v1582_v46 = vld [vmem:[%s5155_s25 + $0xe8] sm:$0xff] }
 0x118   : > { %v1966_v29 = vadd.f32 %v1782_v45, %v1464_v42  ;;  %v1080_v42 = vld [vmem:[%s5155_s25 + $0xd2] sm:$0xff] }
 0x119   : > { %4703 = vmatmul.msk.f32.gmra.mxu1 %vm194_vm1, %v573_v37  ;;  %v2287_v53 = vpop.f32.mrf.mxu0 }
 0x11a   : > { %4753 = vmatmul.msk.f32.gmra.mxu2 %vm194_vm1, %v1075_v49  ;;  %v2468_v50 = vadd.f32 %v2284_v25, %v1966_v29  ;;  %v581_v29 = vld [vmem:[%s5155_s25 + $0xe9] sm:$0xff] }
 0x11b   : > { %4803 = vmatmul.msk.f32.gmra.mxu3 %vm194_vm1, %v5161_v6  ;;  %v577_v6 = vld [vmem:[%s5155_s25 + $0xc9] sm:$0xff] }
 0x11c   : > { %2516 = vst [vmem:[%s5384_s11 + $0x20] sm:$0xff] %v2468_v50  ;;  %4853 = vmatmul.msk.f32.gmra.mxu0 %vm194_vm1, %v576_v52 }
 0x11d   : > { %v1283_v54 = vpop.f32.mrf.mxu2 }
 0x11e   : > { %v1465_v55 = vadd.f32 %v1283_v54, %v963_v44  ;;  %v1785_v56 = vpop.f32.mrf.mxu3  ;;  %v784_v57 = vpop.f32.mrf.mxu1 }
 0x11f   : > { %v964_v51 = vadd.f32 %v784_v57, %v5461_v5  ;;  %v1583_v57 = vld [vmem:[%s5155_s25 + $0xf0] sm:$0xff] }
 0x120   : > { %v1967_v59 = vadd.f32 %v1785_v56, %v1465_v55  ;;  %v1081_v55 = vld [vmem:[%s5155_s25 + $0xda] sm:$0xff] }
 0x121   : > { %4704 = vmatmul.msk.f32.gmra.mxu1 %vm194_vm1, %v574_v43  ;;  %v2290_v11 = vpop.f32.mrf.mxu0 }
 0x122   : > { %4754 = vmatmul.msk.f32.gmra.mxu2 %vm194_vm1, %v1076_v58  ;;  %v2469_v33 = vadd.f32 %v2287_v53, %v1967_v59  ;;  %v582_v59 = vld [vmem:[%s5155_s25 + $0xf1] sm:$0xff] }
 0x123   : > { %4804 = vmatmul.msk.f32.gmra.mxu3 %vm194_vm1, %v5175_v10  ;;  %v578_v10 = vld [vmem:[%s5155_s25 + $0xd1] sm:$0xff] }
 0x124   : > { %2517 = vst [vmem:[%s5384_s11 + $0x28] sm:$0xff] %v2469_v33  ;;  %4854 = vmatmul.msk.f32.gmra.mxu0 %vm194_vm1, %v577_v6 }
 0x125   : > { %v1286_v60 = vpop.f32.mrf.mxu2 }
 0x126   : > { %v1466_v61 = vadd.f32 %v1286_v60, %v964_v51  ;;  %v1788_v62 = vpop.f32.mrf.mxu3  ;;  %v787_v63 = vpop.f32.mrf.mxu1 }
 0x127   : > { %v965_v37 = vadd.f32 %v787_v63, %v5473_v9  ;;  %v1584_v63 = vld [vmem:[%s5155_s25 + $0xf8] sm:$0xff] }
 0x128   : > { %v1968_v1 = vadd.f32 %v1788_v62, %v1466_v61  ;;  %v1082_v61 = vld [vmem:[%s5155_s25 + $0xe2] sm:$0xff] }
 0x129   : > { %4705 = vmatmul.msk.f32.gmra.mxu1 %vm194_vm1, %v575_v48  ;;  %v2293_v5 = vpop.f32.mrf.mxu0 }
 0x12a   : > { %4755 = vmatmul.msk.f32.gmra.mxu2 %vm194_vm1, %v1077_v0  ;;  %v2470_v2 = vadd.f32 %v2290_v11, %v1968_v1  ;;  %v583_v1 = vld [vmem:[%s5155_s25 + $0xf9] sm:$0xff] }
 0x12b   : > { %4805 = vmatmul.msk.f32.gmra.mxu3 %vm194_vm1, %v5189_v14 }
 0x12c   : > { %2518 = vst [vmem:[%s5384_s11 + $0x30] sm:$0xff] %v2470_v2  ;;  %4855 = vmatmul.msk.f32.gmra.mxu0 %vm194_vm1, %v578_v10 }
 0x12d   : > { %v1289_v3 = vpop.f32.mrf.mxu2 }
 0x12e   : > { %v1467_v20 = vadd.f32 %v1289_v3, %v965_v37  ;;  %v1791_v7 = vpop.f32.mrf.mxu3  ;;  %v790_v8 = vpop.f32.mrf.mxu1 }
 0x12f   : > { %v966_v22 = vadd.f32 %v790_v8, %v5485_v13  ;;  %v1585_v8 = vld [vmem:[%s5155_s25 + $0x100] sm:$0xff] }
 0x130   : > { %v1969_v15 = vadd.f32 %v1791_v7, %v1467_v20  ;;  %v1083_v20 = vld [vmem:[%s5155_s25 + $0xea] sm:$0xff] }
 0x131   : > { %4706 = vmatmul.msk.f32.gmra.mxu1 %vm194_vm1, %v576_v52  ;;  %v2296_v9 = vpop.f32.mrf.mxu0 }
 0x132   : > { %4756 = vmatmul.msk.f32.gmra.mxu2 %vm194_vm1, %v1078_v12  ;;  %v2471_v14 = vadd.f32 %v2293_v5, %v1969_v15  ;;  %v584_v15 = vld [vmem:[%s5155_s25 + $0x101] sm:$0xff] }
 0x133   : > { %4806 = vmatmul.msk.f32.gmra.mxu3 %vm194_vm1, %v1580_v18 }
 0x134   : > { %2519 = vst [vmem:[%s5384_s11 + $0x38] sm:$0xff] %v2471_v14  ;;  %4856 = vmatmul.msk.f32.gmra.mxu0 %vm194_vm1, %v579_v19 }
 0x135   : > { %v1292_v43 = vpop.f32.mrf.mxu2 }
 0x136   : > { %v1468_v23 = vadd.f32 %v1292_v43, %v966_v22  ;;  %v1794_v28 = vpop.f32.mrf.mxu3  ;;  %v793_v26 = vpop.f32.mrf.mxu1  ;;  %v1084_v43 = vld [vmem:[%s5155_s25 + $0xf2] sm:$0xff] }
 0x137   : > { %v967_v38 = vadd.f32 %v793_v26, %v5497_v17 }
 0x138   : > { %v1970_v30 = vadd.f32 %v1794_v28, %v1468_v23  ;;  %v1586_v28 = vld [vmem:[%s5155_s25 + $0x108] sm:$0xff] }
 0x139   : > { %4707 = vmatmul.msk.f32.gmra.mxu1 %vm194_vm1, %v577_v6  ;;  %v2299_v13 = vpop.f32.mrf.mxu0 }
 0x13a   : > { %4757 = vmatmul.msk.f32.gmra.mxu2 %vm194_vm1, %v1079_v27  ;;  %v2472_v34 = vadd.f32 %v2296_v9, %v1970_v30  ;;  %v585_v27 = vld [vmem:[%s5155_s25 + $0x109] sm:$0xff] }
 0x13b   : > { %4807 = vmatmul.msk.f32.gmra.mxu3 %vm194_vm1, %v1581_v31 }
 0x13c   : > { %2520 = vst [vmem:[%s5384_s11 + $0x40] sm:$0xff] %v2472_v34  ;;  %4857 = vmatmul.msk.f32.gmra.mxu0 %vm194_vm1, %v580_v35 }
 0x13d   : > { %v1295_v48 = vpop.f32.mrf.mxu2 }
 0x13e   : > { %v1469_v25 = vadd.f32 %v1295_v48, %v967_v38  ;;  %v1797_v36 = vpop.f32.mrf.mxu3  ;;  %v796_v41 = vpop.f32.mrf.mxu1  ;;  %v1085_v38 = vld [vmem:[%s5155_s25 + $0xfa] sm:$0xff] }
 0x13f   : > { %v968_v50 = vadd.f32 %v796_v41, %v5509_v21  ;;  %v586_v41 = vld [vmem:[%s5155_s25 + $0x111] sm:$0xff] }
 0x140   : > { %v1971_v45 = vadd.f32 %v1797_v36, %v1469_v25  ;;  %v1587_v25 = vld [vmem:[%s5155_s25 + $0x110] sm:$0xff] }
 0x141   : > { %4708 = vmatmul.msk.f32.gmra.mxu1 %vm194_vm1, %v578_v10  ;;  %v2302_v17 = vpop.f32.mrf.mxu0 }
 0x142   : > { %4758 = vmatmul.msk.f32.gmra.mxu2 %vm194_vm1, %v1080_v42  ;;  %v2473_v49 = vadd.f32 %v2299_v13, %v1971_v45 }
 0x143   : > { %4808 = vmatmul.msk.f32.gmra.mxu3 %vm194_vm1, %v1582_v46 }
 0x144   : > { %2521 = vst [vmem:[%s5384_s11 + $0x48] sm:$0xff] %v2473_v49  ;;  %4858 = vmatmul.msk.f32.gmra.mxu0 %vm194_vm1, %v581_v29 }
 0x145   : > { %v1298_v52 = vpop.f32.mrf.mxu2 }
 0x146   : > { %v1470_v53 = vadd.f32 %v1298_v52, %v968_v50  ;;  %v1800_v44 = vpop.f32.mrf.mxu3  ;;  %v799_v54 = vpop.f32.mrf.mxu1  ;;  %v1588_v52 = vld [vmem:[%s5155_s25 + $0x118] sm:$0xff] }
 0x147   : > { %v969_v33 = vadd.f32 %v799_v54, %v5521_v39 }
 0x148   : > { %v1972_v56 = vadd.f32 %v1800_v44, %v1470_v53  ;;  %v587_v44 = vld [vmem:[%s5155_s25 + $0x119] sm:$0xff] }
 0x149   : > { %4709 = vmatmul.msk.f32.gmra.mxu1 %vm194_vm1, %v579_v19  ;;  %v2305_v21 = vpop.f32.mrf.mxu0 }
 0x14a   : > { %4759 = vmatmul.msk.f32.gmra.mxu2 %vm194_vm1, %v1081_v55  ;;  %v2474_v58 = vadd.f32 %v2302_v17, %v1972_v56  ;;  %v1086_v17 = vld [vmem:[%s5155_s25 + $0x102] sm:$0xff] }
 0x14b   : > { %4809 = vmatmul.msk.f32.gmra.mxu3 %vm194_vm1, %v1583_v57 }
 0x14c   : > { %2522 = vst [vmem:[%s5384_s11 + $0x50] sm:$0xff] %v2474_v58  ;;  %4859 = vmatmul.msk.f32.gmra.mxu0 %vm194_vm1, %v582_v59 }
 0x14d   : > { %v1301_v6 = vpop.f32.mrf.mxu2 }
 0x14e   : > { %v1471_v11 = vadd.f32 %v1301_v6, %v969_v33  ;;  %v1803_v51 = vpop.f32.mrf.mxu3  ;;  %v802_v60 = vpop.f32.mrf.mxu1  ;;  %v1589_v33 = vld [vmem:[%s5155_s25 + $0x120] sm:$0xff] }
 0x14f   : > { %v970_v2 = vadd.f32 %v802_v60, %v5373_v4 }
 0x150   : > { %v1973_v62 = vadd.f32 %v1803_v51, %v1471_v11  ;;  %v588_v11 = vld [vmem:[%s5155_s25 + $0x121] sm:$0xff] }
 0x151   : > { %4710 = vmatmul.msk.f32.gmra.mxu1 %vm194_vm1, %v580_v35  ;;  %v2308_v39 = vpop.f32.mrf.mxu0 }
 0x152   : > { %4760 = vmatmul.msk.f32.gmra.mxu2 %vm194_vm1, %v1082_v61  ;;  %v2475_v0 = vadd.f32 %v2305_v21, %v1973_v62 }
 0x153   : > { %4810 = vmatmul.msk.f32.gmra.mxu3 %vm194_vm1, %v1584_v63 }
 0x154   : > { %2523 = vst [vmem:[%s5384_s11 + $0x58] sm:$0xff] %v2475_v0  ;;  %4860 = vmatmul.msk.f32.gmra.mxu0 %vm194_vm1, %v583_v1  ;;  %v1088_v0 = vld [vmem:[%s5155_s25 + $0x112] sm:$0xff] }
 0x155   : > { %v1304_v10 = vpop.f32.mrf.mxu2 }
 0x156   : > { %v1472_v5 = vadd.f32 %v1304_v10, %v970_v2  ;;  %v1806_v37 = vpop.f32.mrf.mxu3  ;;  %v805_v3 = vpop.f32.mrf.mxu1  ;;  %v589_v10 = vld [vmem:[%s5155_s25 + $0x129] sm:$0xff] }
 0x157   : > { %v971_v18 = vadd.f32 %v805_v3, %v5390_v16 }
 0x158   : > { %v1974_v7 = vadd.f32 %v1806_v37, %v1472_v5  ;;  %v928_v5 = vld [vmem:[%s5384_s11 + $0x90] sm:$0xff] }
 0x159   : > { %4711 = vmatmul.msk.f32.gmra.mxu1 %vm194_vm1, %v581_v29  ;;  %v2311_v4 = vpop.f32.mrf.mxu0 }
 0x15a   : > { %4761 = vmatmul.msk.f32.gmra.mxu2 %vm194_vm1, %v1083_v20  ;;  %v2476_v12 = vadd.f32 %v2308_v39, %v1974_v7  ;;  %v1590_v39 = vld [vmem:[%s5155_s25 + $0x128] sm:$0xff] }
 0x15b   : > { %4811 = vmatmul.msk.f32.gmra.mxu3 %vm194_vm1, %v1585_v8 }
 0x15c   : > { %2524 = vst [vmem:[%s5384_s11 + $0x60] sm:$0xff] %v2476_v12  ;;  %4861 = vmatmul.msk.f32.gmra.mxu0 %vm194_vm1, %v584_v15  ;;  %v1089_v12 = vld [vmem:[%s5155_s25 + $0x11a] sm:$0xff] }
 0x15d   : > { %v1307_v14 = vpop.f32.mrf.mxu2 }
 0x15e   : > { %v1473_v19 = vadd.f32 %v1307_v14, %v971_v18  ;;  %v1809_v9 = vpop.f32.mrf.mxu3  ;;  %v808_v22 = vpop.f32.mrf.mxu1  ;;  %v590_v14 = vld [vmem:[%s5155_s25 + $0x131] sm:$0xff] }
 0x15f   : > { %v972_v30 = vadd.f32 %v808_v22, %v5403_v24 }
 0x160   : > { %v1975_v23 = vadd.f32 %v1809_v9, %v1473_v19  ;;  %v929_v9 = vld [vmem:[%s5384_s11 + $0x98] sm:$0xff] }
 0x161   : > { %4712 = vmatmul.msk.f32.gmra.mxu1 %vm194_vm1, %v582_v59  ;;  %v2314_v16 = vpop.f32.mrf.mxu0  ;;  %v1087_v59 = vld [vmem:[%s5155_s25 + $0x10a] sm:$0xff] }
 0x162   : > { %4762 = vmatmul.msk.f32.gmra.mxu2 %vm194_vm1, %v1084_v43  ;;  %v2477_v26 = vadd.f32 %v2311_v4, %v1975_v23  ;;  %v1591_v4 = vld [vmem:[%s5155_s25 + $0x130] sm:$0xff] }
 0x163   : > { %4812 = vmatmul.msk.f32.gmra.mxu3 %vm194_vm1, %v1586_v28 }
 0x164   : > { %2525 = vst [vmem:[%s5384_s11 + $0x68] sm:$0xff] %v2477_v26  ;;  %4862 = vmatmul.msk.f32.gmra.mxu0 %vm194_vm1, %v585_v27 }
 0x165   : > { %v1310_v31 = vpop.f32.mrf.mxu2 }
 0x166   : > { %v1474_v34 = vadd.f32 %v1310_v31, %v972_v30  ;;  %v1812_v35 = vpop.f32.mrf.mxu3  ;;  %v811_v13 = vpop.f32.mrf.mxu1  ;;  %v1592_v30 = vld [vmem:[%s5155_s25 + $0x138] sm:$0xff] }
 0x167   : > { %v973_v42 = vadd.f32 %v811_v13, %v5416_v32  ;;  %v930_v13 = vld [vmem:[%s5384_s11 + $0xa0] sm:$0xff] }
 0x168   : > { %v1976_v48 = vadd.f32 %v1812_v35, %v1474_v34  ;;  %v591_v34 = vld [vmem:[%s5155_s25 + $0x139] sm:$0xff] }
 0x169   : > { %4713 = vmatmul.msk.f32.gmra.mxu1 %vm194_vm1, %v583_v1  ;;  %v2317_v24 = vpop.f32.mrf.mxu0 }
 0x16a   : > { %4763 = vmatmul.msk.f32.gmra.mxu2 %vm194_vm1, %v1085_v38  ;;  %v2478_v36 = vadd.f32 %v2314_v16, %v1976_v48 }
 0x16b   : > { %4813 = vmatmul.msk.f32.gmra.mxu3 %vm194_vm1, %v1587_v25 }
 0x16c   : > { %2526 = vst [vmem:[%s5384_s11 + $0x70] sm:$0xff] %v2478_v36  ;;  %4863 = vmatmul.msk.f32.gmra.mxu0 %vm194_vm1, %v586_v41 }
 0x16d   : > { %v1313_v45 = vpop.f32.mrf.mxu2 }
 0x16e   : > { %v1475_v46 = vadd.f32 %v1313_v45, %v973_v42  ;;  %v1815_v49 = vpop.f32.mrf.mxu3  ;;  %v814_v29 = vpop.f32.mrf.mxu1  ;;  %v1593_v45 = vld [vmem:[%s5155_s25 + $0x140] sm:$0xff] }
 0x16f   : > { %v974_v54 = vadd.f32 %v814_v29, %v5429_v40 }
 0x170   : > { %v1977_v50 = vadd.f32 %v1815_v49, %v1475_v46  ;;  %v592_v49 = vld [vmem:[%s5155_s25 + $0x141] sm:$0xff] }
 0x171   : > { %4714 = vmatmul.msk.f32.gmra.mxu1 %vm194_vm1, %v584_v15  ;;  %v2320_v32 = vpop.f32.mrf.mxu0 }
 0x172   : > { %4764 = vmatmul.msk.f32.gmra.mxu2 %vm194_vm1, %v1086_v17  ;;  %v2479_v53 = vadd.f32 %v2317_v24, %v1977_v50  ;;  %v1091_v24 = vld [vmem:[%s5155_s25 + $0x12a] sm:$0xff] }
 0x173   : > { %4814 = vmatmul.msk.f32.gmra.mxu3 %vm194_vm1, %v1588_v52  ;;  %v931_v17 = vld [vmem:[%s5384_s11 + $0xa8] sm:$0xff] }
 0x174   : > { %2527 = vst [vmem:[%s5384_s11 + $0x78] sm:$0xff] %v2479_v53  ;;  %4864 = vmatmul.msk.f32.gmra.mxu0 %vm194_vm1, %v587_v44 }
 0x175   : > { %v1316_v55 = vpop.f32.mrf.mxu2 }
 0x176   : > { %v1476_v56 = vadd.f32 %v1316_v55, %v974_v54  ;;  %v1818_v57 = vpop.f32.mrf.mxu3  ;;  %v817_v58 = vpop.f32.mrf.mxu1  ;;  %v1092_v54 = vld [vmem:[%s5155_s25 + $0x132] sm:$0xff] }
 0x177   : > { %v975_v51 = vadd.f32 %v817_v58, %v5442_v47  ;;  %v593_v58 = vld [vmem:[%s5155_s25 + $0x149] sm:$0xff] }
 0x178   : > { %v1978_v21 = vadd.f32 %v1818_v57, %v1476_v56  ;;  %v1594_v56 = vld [vmem:[%s5155_s25 + $0x148] sm:$0xff] }
 0x179   : > { %4715 = vmatmul.msk.f32.gmra.mxu1 %vm194_vm1, %v585_v27  ;;  %v2323_v40 = vpop.f32.mrf.mxu0  ;;  %v1090_v27 = vld [vmem:[%s5155_s25 + $0x122] sm:$0xff] }
 0x17a   : > { %4765 = vmatmul.msk.f32.gmra.mxu2 %vm194_vm1, %v1087_v59  ;;  %v2480_v6 = vadd.f32 %v2320_v32, %v1978_v21  ;;  %v932_v21 = vld [vmem:[%s5384_s11 + $0xb0] sm:$0xff] }
 0x17b   : > { %4815 = vmatmul.msk.f32.gmra.mxu3 %vm194_vm1, %v1589_v33 }
 0x17c   : > { %2528 = vst [vmem:[%s5384_s11 + $0x80] sm:$0xff] %v2480_v6  ;;  %4865 = vmatmul.msk.f32.gmra.mxu0 %vm194_vm1, %v588_v11 }
 0x17d   : > { %v1319_v60 = vpop.f32.mrf.mxu2 }
 0x17e   : > { %v1477_v61 = vadd.f32 %v1319_v60, %v975_v51  ;;  %v1821_v62 = vpop.f32.mrf.mxu3  ;;  %v820_v63 = vpop.f32.mrf.mxu1  ;;  %v1093_v60 = vld [vmem:[%s5155_s25 + $0x13a] sm:$0xff] }
 0x17f   : > { %v976_v37 = vadd.f32 %v928_v5, %v820_v63 }
 0x180   : > { %v1979_v1 = vadd.f32 %v1821_v62, %v1477_v61  ;;  %v1595_v62 = vld [vmem:[%s5155_s25 + $0x150] sm:$0xff] }
 0x181   : > { %4716 = vmatmul.msk.f32.gmra.mxu1 %vm194_vm1, %v586_v41  ;;  %v2326_v47 = vpop.f32.mrf.mxu0 }
 0x182   : > { %4766 = vmatmul.msk.f32.gmra.mxu2 %vm194_vm1, %v1088_v0  ;;  %v2481_v2 = vadd.f32 %v2323_v40, %v1979_v1  ;;  %v594_v0 = vld [vmem:[%s5155_s25 + $0x151] sm:$0xff] }
 0x183   : > { %4816 = vmatmul.msk.f32.gmra.mxu3 %vm194_vm1, %v1590_v39  ;;  %v933_v39 = vld [vmem:[%s5384_s11 + $0xb8] sm:$0xff] }
 0x184   : > { %2529 = vst [vmem:[%s5384_s11 + $0x88] sm:$0xff] %v2481_v2  ;;  %4866 = vmatmul.msk.f32.gmra.mxu0 %vm194_vm1, %v589_v10 }
 0x185   : > { %v1322_v3 = vpop.f32.mrf.mxu2 }
 0x186   : > { %v1478_v20 = vadd.f32 %v1322_v3, %v976_v37  ;;  %v1824_v7 = vpop.f32.mrf.mxu3  ;;  %v823_v8 = vpop.f32.mrf.mxu1  ;;  %v1094_v3 = vld [vmem:[%s5155_s25 + $0x142] sm:$0xff] }
 0x187   : > { %v977_v22 = vadd.f32 %v929_v9, %v823_v8 }
 0x188   : > { %v1980_v15 = vadd.f32 %v1824_v7, %v1478_v20  ;;  %v1596_v7 = vld [vmem:[%s5155_s25 + $0x158] sm:$0xff] }
 0x189   : > { %4717 = vmatmul.msk.f32.gmra.mxu1 %vm194_vm1, %v587_v44  ;;  %v2329_v19 = vpop.f32.mrf.mxu0 }
 0x18a   : > { %4767 = vmatmul.msk.f32.gmra.mxu2 %vm194_vm1, %v1089_v12  ;;  %v2482_v18 = vadd.f32 %v2326_v47, %v1980_v15  ;;  %v595_v12 = vld [vmem:[%s5155_s25 + $0x159] sm:$0xff] }
 0x18b   : > { %4817 = vmatmul.msk.f32.gmra.mxu3 %vm194_vm1, %v1591_v4  ;;  %v934_v4 = vld [vmem:[%s5384_s11 + $0xc0] sm:$0xff] }
 0x18c   : > { %2530 = vst [vmem:[%s5384_s11 + $0x90] sm:$0xff] %v2482_v18  ;;  %4867 = vmatmul.msk.f32.gmra.mxu0 %vm194_vm1, %v590_v14 }
 0x18d   : > { %v1325_v43 = vpop.f32.mrf.mxu2 }
 0x18e   : > { %v1479_v23 = vadd.f32 %v1325_v43, %v977_v22  ;;  %v1827_v28 = vpop.f32.mrf.mxu3  ;;  %v826_v26 = vpop.f32.mrf.mxu1  ;;  %v1095_v43 = vld [vmem:[%s5155_s25 + $0x14a] sm:$0xff] }
 0x18f   : > { %v978_v38 = vadd.f32 %v930_v13, %v826_v26 }
 0x190   : > { %v1981_v16 = vadd.f32 %v1827_v28, %v1479_v23  ;;  %v1597_v28 = vld [vmem:[%s5155_s25 + $0x160] sm:$0xff] }
 0x191   : > { %4718 = vmatmul.msk.f32.gmra.mxu1 %vm194_vm1, %v588_v11  ;;  %v2332_v35 = vpop.f32.mrf.mxu0 }
 0x192   : > { %4768 = vmatmul.msk.f32.gmra.mxu2 %vm194_vm1, %v1090_v27  ;;  %v2483_v31 = vadd.f32 %v2329_v19, %v1981_v16  ;;  %v596_v27 = vld [vmem:[%s5155_s25 + $0x161] sm:$0xff] }
 0x193   : > { %4818 = vmatmul.msk.f32.gmra.mxu3 %vm194_vm1, %v1592_v30  ;;  %v935_v30 = vld [vmem:[%s5384_s11 + $0xc8] sm:$0xff] }
 0x194   : > { %2531 = vst [vmem:[%s5384_s11 + $0x98] sm:$0xff] %v2483_v31  ;;  %4868 = vmatmul.msk.f32.gmra.mxu0 %vm194_vm1, %v591_v34 }
 0x195   : > { %v1328_v48 = vpop.f32.mrf.mxu2 }
 0x196   : > { %v1480_v25 = vadd.f32 %v1328_v48, %v978_v38  ;;  %v1830_v36 = vpop.f32.mrf.mxu3  ;;  %v829_v41 = vpop.f32.mrf.mxu1  ;;  %v1096_v48 = vld [vmem:[%s5155_s25 + $0x152] sm:$0xff] }
 0x197   : > { %v979_v50 = vadd.f32 %v931_v17, %v829_v41 }
 0x198   : > { %v1982_v42 = vadd.f32 %v1830_v36, %v1480_v25  ;;  %v1598_v36 = vld [vmem:[%s5155_s25 + $0x168] sm:$0xff] }
 0x199   : > { %4719 = vmatmul.msk.f32.gmra.mxu1 %vm194_vm1, %v589_v10  ;;  %v2335_v29 = vpop.f32.mrf.mxu0 }
 0x19a   : > { %4769 = vmatmul.msk.f32.gmra.mxu2 %vm194_vm1, %v1091_v24  ;;  %v2484_v46 = vadd.f32 %v2332_v35, %v1982_v42  ;;  %v597_v24 = vld [vmem:[%s5155_s25 + $0x169] sm:$0xff] }
 0x19b   : > { %4819 = vmatmul.msk.f32.gmra.mxu3 %vm194_vm1, %v1593_v45  ;;  %v936_v45 = vld [vmem:[%s5384_s11 + $0xd0] sm:$0xff] }
 0x19c   : > { %2532 = vst [vmem:[%s5384_s11 + $0xa0] sm:$0xff] %v2484_v46  ;;  %4869 = vmatmul.msk.f32.gmra.mxu0 %vm194_vm1, %v592_v49 }
 0x19d   : > { %v1331_v52 = vpop.f32.mrf.mxu2 }
 0x19e   : > { %v1481_v53 = vadd.f32 %v1331_v52, %v979_v50  ;;  %v1833_v44 = vpop.f32.mrf.mxu3  ;;  %v832_v32 = vpop.f32.mrf.mxu1  ;;  %v1097_v52 = vld [vmem:[%s5155_s25 + $0x15a] sm:$0xff] }
 0x19f   : > { %v980_v33 = vadd.f32 %v932_v21, %v832_v32 }
 0x1a0   : > { %v1983_v55 = vadd.f32 %v1833_v44, %v1481_v53  ;;  %v1599_v44 = vld [vmem:[%s5155_s25 + $0x170] sm:$0xff] }
 0x1a1   : > { %4720 = vmatmul.msk.f32.gmra.mxu1 %vm194_vm1, %v590_v14  ;;  %v2338_v59 = vpop.f32.mrf.mxu0 }
 0x1a2   : > { %4770 = vmatmul.msk.f32.gmra.mxu2 %vm194_vm1, %v1092_v54  ;;  %v2485_v57 = vadd.f32 %v2335_v29, %v1983_v55  ;;  %v598_v54 = vld [vmem:[%s5155_s25 + $0x171] sm:$0xff] }
 0x1a3   : > { %4820 = vmatmul.msk.f32.gmra.mxu3 %vm194_vm1, %v1594_v56  ;;  %v937_v56 = vld [vmem:[%s5384_s11 + $0xd8] sm:$0xff] }
 0x1a4   : > { %2533 = vst [vmem:[%s5384_s11 + $0xa8] sm:$0xff] %v2485_v57  ;;  %4870 = vmatmul.msk.f32.gmra.mxu0 %vm194_vm1, %v593_v58 }
 0x1a5   : > { %v1334_v6 = vpop.f32.mrf.mxu2 }
 0x1a6   : > { %v1482_v11 = vadd.f32 %v1334_v6, %v980_v33  ;;  %v1836_v40 = vpop.f32.mrf.mxu3  ;;  %v835_v51 = vpop.f32.mrf.mxu1  ;;  %v1098_v6 = vld [vmem:[%s5155_s25 + $0x162] sm:$0xff] }
 0x1a7   : > { %v981_v2 = vadd.f32 %v933_v39, %v835_v51 }
 0x1a8   : > { %v1984_v61 = vadd.f32 %v1836_v40, %v1482_v11  ;;  %v1600_v40 = vld [vmem:[%s5155_s25 + $0x178] sm:$0xff] }
 0x1a9   : > { %4721 = vmatmul.msk.f32.gmra.mxu1 %vm194_vm1, %v591_v34  ;;  %v2341_v1 = vpop.f32.mrf.mxu0 }
 0x1aa   : > { %4771 = vmatmul.msk.f32.gmra.mxu2 %vm194_vm1, %v1093_v60  ;;  %v2486_v63 = vadd.f32 %v2338_v59, %v1984_v61  ;;  %v599_v60 = vld [vmem:[%s5155_s25 + $0x179] sm:$0xff] }
 0x1ab   : > { %4821 = vmatmul.msk.f32.gmra.mxu3 %vm194_vm1, %v1595_v62  ;;  %v938_v62 = vld [vmem:[%s5384_s11 + $0xe0] sm:$0xff] }
 0x1ac   : > { %2534 = vst [vmem:[%s5384_s11 + $0xb0] sm:$0xff] %v2486_v63  ;;  %4871 = vmatmul.msk.f32.gmra.mxu0 %vm194_vm1, %v594_v0 }
 0x1ad   : > { %v1337_v10 = vpop.f32.mrf.mxu2 }
 0x1ae   : > { %v1483_v47 = vadd.f32 %v1337_v10, %v981_v2  ;;  %v1839_v5 = vpop.f32.mrf.mxu3  ;;  %v838_v37 = vpop.f32.mrf.mxu1  ;;  %v1099_v10 = vld [vmem:[%s5155_s25 + $0x16a] sm:$0xff] }
 0x1af   : > { %v982_v18 = vadd.f32 %v934_v4, %v838_v37 }
 0x1b0   : > { %v1985_v20 = vadd.f32 %v1839_v5, %v1483_v47  ;;  %v1601_v5 = vld [vmem:[%s5155_s25 + $0x180] sm:$0xff] }
 0x1b1   : > { %4722 = vmatmul.msk.f32.gmra.mxu1 %vm194_vm1, %v592_v49  ;;  %v2344_v15 = vpop.f32.mrf.mxu0 }
 0x1b2   : > { %4772 = vmatmul.msk.f32.gmra.mxu2 %vm194_vm1, %v1094_v3  ;;  %v2487_v8 = vadd.f32 %v2341_v1, %v1985_v20  ;;  %v2103_v20 = vld [vmem:[%s5155_s25 + $0x181] sm:$0xff] }
 0x1b3   : > { %4822 = vmatmul.msk.f32.gmra.mxu3 %vm194_vm1, %v1596_v7  ;;  %v939_v7 = vld [vmem:[%s5384_s11 + $0xe8] sm:$0xff] }
 0x1b4   : > { %2535 = vst [vmem:[%s5384_s11 + $0xb8] sm:$0xff] %v2487_v8  ;;  %4872 = vmatmul.msk.f32.gmra.mxu0 %vm194_vm1, %v595_v12 }
 0x1b5   : > { %v1340_v14 = vpop.f32.mrf.mxu2 }
 0x1b6   : > { %v1484_v19 = vadd.f32 %v1340_v14, %v982_v18  ;;  %v1842_v9 = vpop.f32.mrf.mxu3  ;;  %v841_v22 = vpop.f32.mrf.mxu1  ;;  %v1100_v14 = vld [vmem:[%s5155_s25 + $0x172] sm:$0xff] }
 0x1b7   : > { %v983_v31 = vadd.f32 %v935_v30, %v841_v22 }
 0x1b8   : > { %v1986_v23 = vadd.f32 %v1842_v9, %v1484_v19  ;;  %v1602_v9 = vld [vmem:[%s5155_s25 + $0x188] sm:$0xff] }
 0x1b9   : > { %4723 = vmatmul.msk.f32.gmra.mxu1 %vm194_vm1, %v593_v58  ;;  %v2347_v16 = vpop.f32.mrf.mxu0 }
 0x1ba   : > { %4773 = vmatmul.msk.f32.gmra.mxu2 %vm194_vm1, %v1095_v43  ;;  %v2488_v26 = vadd.f32 %v2344_v15, %v1986_v23  ;;  %v2104_v23 = vld [vmem:[%s5155_s25 + $0x189] sm:$0xff] }
 0x1bb   : > { %4823 = vmatmul.msk.f32.gmra.mxu3 %vm194_vm1, %v1597_v28  ;;  %v940_v28 = vld [vmem:[%s5384_s11 + $0xf0] sm:$0xff] }
 0x1bc   : > { %2536 = vst [vmem:[%s5384_s11 + $0xc0] sm:$0xff] %v2488_v26  ;;  %4873 = vmatmul.msk.f32.gmra.mxu0 %vm194_vm1, %v596_v27 }
 0x1bd   : > { %v1343_v34 = vpop.f32.mrf.mxu2 }
 0x1be   : > { %v1485_v35 = vadd.f32 %v1343_v34, %v983_v31  ;;  %v1845_v13 = vpop.f32.mrf.mxu3  ;;  %v844_v38 = vpop.f32.mrf.mxu1  ;;  %v1101_v34 = vld [vmem:[%s5155_s25 + $0x17a] sm:$0xff] }
 0x1bf   : > { %v984_v46 = vadd.f32 %v936_v45, %v844_v38 }
 0x1c0   : > { %v1987_v25 = vadd.f32 %v1845_v13, %v1485_v35  ;;  %v1603_v13 = vld [vmem:[%s5155_s25 + $0x190] sm:$0xff] }
 0x1c1   : > { %4724 = vmatmul.msk.f32.gmra.mxu1 %vm194_vm1, %v594_v0  ;;  %v2350_v42 = vpop.f32.mrf.mxu0 }
 0x1c2   : > { %4774 = vmatmul.msk.f32.gmra.mxu2 %vm194_vm1, %v1096_v48  ;;  %v2489_v41 = vadd.f32 %v2347_v16, %v1987_v25  ;;  %v2105_v25 = vld [vmem:[%s5155_s25 + $0x191] sm:$0xff] }
 0x1c3   : > { %4824 = vmatmul.msk.f32.gmra.mxu3 %vm194_vm1, %v1598_v36  ;;  %v941_v36 = vld [vmem:[%s5384_s11 + $0xf8] sm:$0xff] }
 0x1c4   : > { %2537 = vst [vmem:[%s5384_s11 + $0xc8] sm:$0xff] %v2489_v41  ;;  %4874 = vmatmul.msk.f32.gmra.mxu0 %vm194_vm1, %v597_v24 }
 0x1c5   : > { %v1346_v49 = vpop.f32.mrf.mxu2 }
 0x1c6   : > { %v1486_v29 = vadd.f32 %v1346_v49, %v984_v46  ;;  %v1848_v17 = vpop.f32.mrf.mxu3  ;;  %v847_v50 = vpop.f32.mrf.mxu1  ;;  %v2560_v49 = vld [vmem:[%s5155_s25 + $0x1a] sm:$0xff] }
 0x1c7   : > { %v985_v57 = vadd.f32 %v937_v56, %v847_v50  ;;  %v3564_v50 = vld [vmem:[%s5155_s25 + $0x31] sm:$0xff] }
 0x1c8   : > { %v1988_v53 = vadd.f32 %v1848_v17, %v1486_v29  ;;  %v3062_v29 = vld [vmem:[%s5155_s25 + $0x30] sm:$0xff] }
 0x1c9   : > { %4725 = vmatmul.msk.f32.gmra.mxu1 %vm194_vm1, %v595_v12  ;;  %v2353_v55 = vpop.f32.mrf.mxu0 }
 0x1ca   : > { %4775 = vmatmul.msk.f32.gmra.mxu2 %vm194_vm1, %v1097_v52  ;;  %v2490_v32 = vadd.f32 %v2350_v42, %v1988_v53  ;;  %v2563_v53 = vld [vmem:[%s5155_s25 + $0x32] sm:$0xff] }
 0x1cb   : > { %4825 = vmatmul.msk.f32.gmra.mxu3 %vm194_vm1, %v1599_v44 }
 0x1cc   : > { %2538 = vst [vmem:[%s5384_s11 + $0xd0] sm:$0xff] %v2490_v32  ;;  %4875 = vmatmul.msk.f32.gmra.mxu0 %vm194_vm1, %v598_v54  ;;  %v942_v32 = vld [vmem:[%s5384_s11 + $0x100] sm:$0xff] }
 0x1cd   : > { %v1349_v58 = vpop.f32.mrf.mxu2 }
 0x1ce   : > { %v1487_v59 = vadd.f32 %v1349_v58, %v985_v57  ;;  %v1851_v21 = vpop.f32.mrf.mxu3  ;;  %v850_v33 = vpop.f32.mrf.mxu1 }
 0x1cf   : > { %v986_v63 = vadd.f32 %v938_v62, %v850_v33 }
 0x1d0   : > { %v1989_v11 = vadd.f32 %v1851_v21, %v1487_v59  ;;  %v2561_v59 = vld [vmem:[%s5155_s25 + $0x22] sm:$0xff]  ;;  %v3063_v21 = vld [vmem:[%s5155_s25 + $0x38] sm:$0xff] }
 0x1d1   : > { %4726 = vmatmul.msk.f32.gmra.mxu1 %vm194_vm1, %v596_v27  ;;  %v2356_v61 = vpop.f32.mrf.mxu0 }
 0x1d2   : > { %4776 = vmatmul.msk.f32.gmra.mxu2 %vm194_vm1, %v1098_v6  ;;  %v2491_v51 = vadd.f32 %v2353_v55, %v1989_v11  ;;  %v3565_v6 = vld [vmem:[%s5155_s25 + $0x39] sm:$0xff] }
 0x1d3   : > { %4826 = vmatmul.msk.f32.gmra.mxu3 %vm194_vm1, %v1600_v40  ;;  %v2564_v40 = vld [vmem:[%s5155_s25 + $0x3a] sm:$0xff] }
 0x1d4   : > { %2539 = vst [vmem:[%s5384_s11 + $0xd8] sm:$0xff] %v2491_v51  ;;  %4876 = vmatmul.msk.f32.gmra.mxu0 %vm194_vm1, %v599_v60 }
 0x1d5   : > { %v1352_v0 = vpop.f32.mrf.mxu2 }
 0x1d6   : > { %v1488_v1 = vadd.f32 %v1352_v0, %v986_v63  ;;  %v1854_v39 = vpop.f32.mrf.mxu3  ;;  %v853_v2 = vpop.f32.mrf.mxu1 }
 0x1d7   : > { %v987_v8 = vadd.f32 %v939_v7, %v853_v2  ;;  %v3064_v2 = vld [vmem:[%s5155_s25 + $0x40] sm:$0xff] }
 0x1d8   : > { %v1990_v47 = vadd.f32 %v1854_v39, %v1488_v1  ;;  %v2562_v39 = vld [vmem:[%s5155_s25 + $0x2a] sm:$0xff] }
 0x1d9   : > { %4727 = vmatmul.msk.f32.gmra.mxu1 %vm194_vm1, %v597_v24  ;;  %v2359_v3 = vpop.f32.mrf.mxu0 }
 0x1da   : > { %4777 = vmatmul.msk.f32.gmra.mxu2 %vm194_vm1, %v1099_v10  ;;  %v2492_v37 = vadd.f32 %v2356_v61, %v1990_v47  ;;  %v3566_v47 = vld [vmem:[%s5155_s25 + $0x41] sm:$0xff] }
 0x1db   : > { %4827 = vmatmul.msk.f32.gmra.mxu3 %vm194_vm1, %v1601_v5 }
 0x1dc   : > { %2540 = vst [vmem:[%s5384_s11 + $0xe0] sm:$0xff] %v2492_v37  ;;  %4877 = vmatmul.msk.f32.gmra.mxu0 %vm194_vm1, %v2103_v20  ;;  %v2565_v37 = vld [vmem:[%s5155_s25 + $0x42] sm:$0xff]  ;;  %v944_v20 = vld [vmem:[%s5384_s11 + $0x110] sm:$0xff] }
 0x1dd   : > { %v1355_v12 = vpop.f32.mrf.mxu2 }
 0x1de   : > { %v1489_v15 = vadd.f32 %v1355_v12, %v987_v8  ;;  %v1857_v4 = vpop.f32.mrf.mxu3  ;;  %v856_v18 = vpop.f32.mrf.mxu1 }
 0x1df   : > { %v988_v26 = vadd.f32 %v940_v28, %v856_v18  ;;  %v3065_v18 = vld [vmem:[%s5155_s25 + $0x48] sm:$0xff] }
 0x1e0   : > { %v1991_v19 = vadd.f32 %v1857_v4, %v1489_v15 }
 0x1e1   : > { %4728 = vmatmul.msk.f32.gmra.mxu1 %vm194_vm1, %v598_v54  ;;  %v2362_v43 = vpop.f32.mrf.mxu0 }
 0x1e2   : > { %4778 = vmatmul.msk.f32.gmra.mxu2 %vm194_vm1, %v1100_v14  ;;  %v2493_v22 = vadd.f32 %v2359_v3, %v1991_v19  ;;  %v3567_v19 = vld [vmem:[%s5155_s25 + $0x49] sm:$0xff] }
 0x1e3   : > { %4828 = vmatmul.msk.f32.gmra.mxu3 %vm194_vm1, %v1602_v9 }
 0x1e4   : > { %2541 = vst [vmem:[%s5384_s11 + $0xe8] sm:$0xff] %v2493_v22  ;;  %4878 = vmatmul.msk.f32.gmra.mxu0 %vm194_vm1, %v2104_v23  ;;  %v2566_v22 = vld [vmem:[%s5155_s25 + $0x4a] sm:$0xff]  ;;  %v945_v23 = vld [vmem:[%s5384_s11 + $0x118] sm:$0xff] }
 0x1e5   : > { %v1358_v27 = vpop.f32.mrf.mxu2 }
 0x1e6   : > { %v1490_v16 = vadd.f32 %v1358_v27, %v988_v26  ;;  %v1860_v30 = vpop.f32.mrf.mxu3  ;;  %v859_v31 = vpop.f32.mrf.mxu1 }
 0x1e7   : > { %v989_v41 = vadd.f32 %v941_v36, %v859_v31  ;;  %v3066_v31 = vld [vmem:[%s5155_s25 + $0x50] sm:$0xff] }
 0x1e8   : > { %v1992_v35 = vadd.f32 %v1860_v30, %v1490_v16 }
 0x1e9   : > { %4729 = vmatmul.msk.f32.gmra.mxu1 %vm194_vm1, %v599_v60  ;;  %v2365_v48 = vpop.f32.mrf.mxu0  ;;  %v943_v60 = vld [vmem:[%s5384_s11 + $0x108] sm:$0xff] }
 0x1ea   : > { %4779 = vmatmul.msk.f32.gmra.mxu2 %vm194_vm1, %v1101_v34  ;;  %v2494_v38 = vadd.f32 %v2362_v43, %v1992_v35  ;;  %v3568_v35 = vld [vmem:[%s5155_s25 + $0x51] sm:$0xff] }
 0x1eb   : > { %4829 = vmatmul.msk.f32.gmra.mxu3 %vm194_vm1, %v1603_v13 }
 0x1ec   : > { %2542 = vst [vmem:[%s5384_s11 + $0xf0] sm:$0xff] %v2494_v38  ;;  %4879 = vmatmul.msk.f32.gmra.mxu0 %vm194_vm1, %v2105_v25  ;;  %v2567_v38 = vld [vmem:[%s5155_s25 + $0x52] sm:$0xff]  ;;  %v946_v25 = vld [vmem:[%s5384_s11 + $0x120] sm:$0xff] }
 0x1ed   : > { %v1361_v24 = vpop.f32.mrf.mxu2 }
 0x1ee   : > { %v1491_v42 = vadd.f32 %v1361_v24, %v989_v41  ;;  %v1863_v45 = vpop.f32.mrf.mxu3  ;;  %v862_v46 = vpop.f32.mrf.mxu1 }
 0x1ef   : > { %v990_v54 = vadd.f32 %v942_v32, %v862_v46  ;;  %v3067_v46 = vld [vmem:[%s5155_s25 + $0x58] sm:$0xff] }
 0x1f0   : > { %v1993_v17 = vadd.f32 %v1863_v45, %v1491_v42 }
 0x1f1   : > { %4882 = vmatmul.msk.f32.vlgmr.msra.gmra.mxu1 %vm194_vm1, %v2560_v49  ;;  %v2368_v44 = vpop.f32.mrf.mxu0 }
 0x1f2   : > { %4932 = vmatmul.msk.f32.vlgmr.msra.gmra.mxu2 %vm194_vm1, %v3062_v29  ;;  %v2495_v52 = vadd.f32 %v2365_v48, %v1993_v17  ;;  %v3569_v29 = vld [vmem:[%s5155_s25 + $0x59] sm:$0xff] }
 0x1f3   : > { %4982 = vmatmul.msk.f32.vlgmr.msra.gmra.mxu3 %vm194_vm1, %v3564_v50  ;;  %v2568_v50 = vld [vmem:[%s5155_s25 + $0x5a] sm:$0xff] }
 0x1f4   : > { %2543 = vst [vmem:[%s5384_s11 + $0xf8] sm:$0xff] %v2495_v52  ;;  %5032 = vmatmul.msk.f32.vlgmr.msra.gmra.mxu0 %vm194_vm1, %v2563_v53 }
 0x1f5   : > { %v1364_v55 = vpop.f32.mrf.mxu2 }
 0x1f6   : > { %v1492_v56 = vadd.f32 %v1364_v55, %v990_v54  ;;  %v1866_v57 = vpop.f32.mrf.mxu3  ;;  %v865_v58 = vpop.f32.mrf.mxu1 }
 0x1f7   : > { %v991_v61 = vadd.f32 %v943_v60, %v865_v58 }
 0x1f8   : > { %v1994_v33 = vadd.f32 %v1866_v57, %v1492_v56  ;;  %v3068_v57 = vld [vmem:[%s5155_s25 + $0x60] sm:$0xff] }
 0x1f9   : > { %4883 = vmatmul.msk.f32.gmra.mxu1 %vm194_vm1, %v2561_v59  ;;  %v2371_v51 = vpop.f32.mrf.mxu0  ;;  %v3570_v59 = vld [vmem:[%s5155_s25 + $0x61] sm:$0xff] }
 0x1fa   : > { %4933 = vmatmul.msk.f32.gmra.mxu2 %vm194_vm1, %v3063_v21  ;;  %v2496_v11 = vadd.f32 %v2368_v44, %v1994_v33  ;;  %v2569_v33 = vld [vmem:[%s5155_s25 + $0x62] sm:$0xff] }
 0x1fb   : > { %4983 = vmatmul.msk.f32.gmra.mxu3 %vm194_vm1, %v3565_v6 }
 0x1fc   : > { %2544 = vst [vmem:[%s5384_s11 + $0x100] sm:$0xff] %v2496_v11  ;;  %5033 = vmatmul.msk.f32.gmra.mxu0 %vm194_vm1, %v2564_v40  ;;  %v948_v11 = vld [vmem:[%s5384_s11 + $0x130] sm:$0xff] }
 0x1fd   : > { %v1367_v62 = vpop.f32.mrf.mxu2 }
 0x1fe   : > { %v1493_v63 = vadd.f32 %v1367_v62, %v991_v61  ;;  %v1869_v0 = vpop.f32.mrf.mxu3  ;;  %v868_v1 = vpop.f32.mrf.mxu1 }
 0x1ff   : > { %v992_v7 = vadd.f32 %v944_v20, %v868_v1  ;;  %v3571_v1 = vld [vmem:[%s5155_s25 + $0x69] sm:$0xff] }
 0x200   : > { %v1995_v10 = vadd.f32 %v1869_v0, %v1493_v63  ;;  %v3069_v63 = vld [vmem:[%s5155_s25 + $0x68] sm:$0xff] }
 0x201   : > { %4884 = vmatmul.msk.f32.gmra.mxu1 %vm194_vm1, %v2562_v39  ;;  %v2374_v3 = vpop.f32.mrf.mxu0 }
 0x202   : > { %4934 = vmatmul.msk.f32.gmra.mxu2 %vm194_vm1, %v3064_v2  ;;  %v2497_v5 = vadd.f32 %v2371_v51, %v1995_v10  ;;  %v2570_v2 = vld [vmem:[%s5155_s25 + $0x6a] sm:$0xff] }
 0x203   : > { %4984 = vmatmul.msk.f32.gmra.mxu3 %vm194_vm1, %v3566_v47  ;;  %v949_v47 = vld [vmem:[%s5384_s11 + $0x138] sm:$0xff] }
 0x204   : > { %2545 = vst [vmem:[%s5384_s11 + $0x108] sm:$0xff] %v2497_v5  ;;  %5034 = vmatmul.msk.f32.gmra.mxu0 %vm194_vm1, %v2565_v37 }
 0x205   : > { %v1370_v8 = vpop.f32.mrf.mxu2 }
 0x206   : > { %v1494_v12 = vadd.f32 %v1370_v8, %v992_v7  ;;  %v1872_v15 = vpop.f32.mrf.mxu3  ;;  %v871_v4 = vpop.f32.mrf.mxu1  ;;  %v3070_v8 = vld [vmem:[%s5155_s25 + $0x70] sm:$0xff] }
 0x207   : > { %v993_v28 = vadd.f32 %v945_v23, %v871_v4 }
 0x208   : > { %v1996_v14 = vadd.f32 %v1872_v15, %v1494_v12  ;;  %v3572_v15 = vld [vmem:[%s5155_s25 + $0x71] sm:$0xff] }
 0x209   : > { %4885 = vmatmul.msk.f32.gmra.mxu1 %vm194_vm1, %v2563_v53  ;;  %v2377_v43 = vpop.f32.mrf.mxu0  ;;  %v947_v53 = vld [vmem:[%s5384_s11 + $0x128] sm:$0xff] }
 0x20a   : > { %4935 = vmatmul.msk.f32.gmra.mxu2 %vm194_vm1, %v3065_v18  ;;  %v2498_v9 = vadd.f32 %v2374_v3, %v1996_v14  ;;  %v2571_v18 = vld [vmem:[%s5155_s25 + $0x72] sm:$0xff] }
 0x20b   : > { %4985 = vmatmul.msk.f32.gmra.mxu3 %vm194_vm1, %v3567_v19  ;;  %v950_v19 = vld [vmem:[%s5384_s11 + $0x140] sm:$0xff] }
 0x20c   : > { %2546 = vst [vmem:[%s5384_s11 + $0x110] sm:$0xff] %v2498_v9  ;;  %5035 = vmatmul.msk.f32.gmra.mxu0 %vm194_vm1, %v2566_v22 }
 0x20d   : > { %v1373_v26 = vpop.f32.mrf.mxu2 }
 0x20e   : > { %v1495_v27 = vadd.f32 %v1373_v26, %v993_v28  ;;  %v1875_v16 = vpop.f32.mrf.mxu3  ;;  %v874_v30 = vpop.f32.mrf.mxu1  ;;  %v3071_v26 = vld [vmem:[%s5155_s25 + $0x78] sm:$0xff] }
 0x20f   : > { %v994_v36 = vadd.f32 %v946_v25, %v874_v30 }
 0x210   : > { %v1997_v34 = vadd.f32 %v1875_v16, %v1495_v27  ;;  %v3573_v16 = vld [vmem:[%s5155_s25 + $0x79] sm:$0xff] }
 0x211   : > { %4886 = vmatmul.msk.f32.gmra.mxu1 %vm194_vm1, %v2564_v40  ;;  %v2380_v48 = vpop.f32.mrf.mxu0 }
 0x212   : > { %4936 = vmatmul.msk.f32.gmra.mxu2 %vm194_vm1, %v3066_v31  ;;  %v2499_v13 = vadd.f32 %v2377_v43, %v1997_v34  ;;  %v2572_v31 = vld [vmem:[%s5155_s25 + $0x7a] sm:$0xff] }
 0x213   : > { %4986 = vmatmul.msk.f32.gmra.mxu3 %vm194_vm1, %v3568_v35  ;;  %v951_v35 = vld [vmem:[%s5384_s11 + $0x148] sm:$0xff] }
 0x214   : > { %2547 = vst [vmem:[%s5384_s11 + $0x118] sm:$0xff] %v2499_v13  ;;  %5036 = vmatmul.msk.f32.gmra.mxu0 %vm194_vm1, %v2567_v38 }
 0x215   : > { %v1376_v41 = vpop.f32.mrf.mxu2 }
 0x216   : > { %v1496_v24 = vadd.f32 %v1376_v41, %v994_v36  ;;  %v1878_v42 = vpop.f32.mrf.mxu3  ;;  %v877_v45 = vpop.f32.mrf.mxu1  ;;  %v3072_v41 = vld [vmem:[%s5155_s25 + $0x80] sm:$0xff] }
 0x217   : > { %v995_v44 = vadd.f32 %v947_v53, %v877_v45 }
 0x218   : > { %v1998_v49 = vadd.f32 %v1878_v42, %v1496_v24  ;;  %v3574_v42 = vld [vmem:[%s5155_s25 + $0x81] sm:$0xff] }
 0x219   : > { %4887 = vmatmul.msk.f32.gmra.mxu1 %vm194_vm1, %v2565_v37  ;;  %v2383_v52 = vpop.f32.mrf.mxu0 }
 0x21a   : > { %4937 = vmatmul.msk.f32.gmra.mxu2 %vm194_vm1, %v3067_v46  ;;  %v2500_v17 = vadd.f32 %v2380_v48, %v1998_v49  ;;  %v2573_v46 = vld [vmem:[%s5155_s25 + $0x82] sm:$0xff] }
 0x21b   : > { %4987 = vmatmul.msk.f32.gmra.mxu3 %vm194_vm1, %v3569_v29  ;;  %v952_v29 = vld [vmem:[%s5384_s11 + $0x150] sm:$0xff] }
 0x21c   : > { %2548 = vst [vmem:[%s5384_s11 + $0x120] sm:$0xff] %v2500_v17  ;;  %5037 = vmatmul.msk.f32.gmra.mxu0 %vm194_vm1, %v2568_v50 }
 0x21d   : > { %v1379_v32 = vpop.f32.mrf.mxu2 }
 0x21e   : > { %v1497_v54 = vadd.f32 %v1379_v32, %v995_v44  ;;  %v1881_v55 = vpop.f32.mrf.mxu3  ;;  %v880_v56 = vpop.f32.mrf.mxu1  ;;  %v3073_v32 = vld [vmem:[%s5155_s25 + $0x88] sm:$0xff] }
 0x21f   : > { %v996_v40 = vadd.f32 %v948_v11, %v880_v56 }
 0x220   : > { %v1999_v58 = vadd.f32 %v1881_v55, %v1497_v54  ;;  %v3575_v55 = vld [vmem:[%s5155_s25 + $0x89] sm:$0xff] }
 0x221   : > { %4888 = vmatmul.msk.f32.gmra.mxu1 %vm194_vm1, %v2566_v22  ;;  %v2386_v6 = vpop.f32.mrf.mxu0 }
 0x222   : > { %4938 = vmatmul.msk.f32.gmra.mxu2 %vm194_vm1, %v3068_v57  ;;  %v2501_v21 = vadd.f32 %v2383_v52, %v1999_v58  ;;  %v2574_v57 = vld [vmem:[%s5155_s25 + $0x8a] sm:$0xff] }
 0x223   : > { %4988 = vmatmul.msk.f32.gmra.mxu3 %vm194_vm1, %v3570_v59  ;;  %v953_v59 = vld [vmem:[%s5384_s11 + $0x158] sm:$0xff] }
 0x224   : > { %2549 = vst [vmem:[%s5384_s11 + $0x128] sm:$0xff] %v2501_v21  ;;  %5038 = vmatmul.msk.f32.gmra.mxu0 %vm194_vm1, %v2569_v33 }
 0x225   : > { %v1382_v51 = vpop.f32.mrf.mxu2 }
 0x226   : > { %v1498_v60 = vadd.f32 %v1382_v51, %v996_v40  ;;  %v1884_v61 = vpop.f32.mrf.mxu3  ;;  %v883_v62 = vpop.f32.mrf.mxu1  ;;  %v3074_v51 = vld [vmem:[%s5155_s25 + $0x90] sm:$0xff] }
 0x227   : > { %v997_v5 = vadd.f32 %v949_v47, %v883_v62 }
 0x228   : > { %v2000_v0 = vadd.f32 %v1884_v61, %v1498_v60  ;;  %v3576_v61 = vld [vmem:[%s5155_s25 + $0x91] sm:$0xff] }
 0x229   : > { %4889 = vmatmul.msk.f32.gmra.mxu1 %vm194_vm1, %v2567_v38  ;;  %v2389_v10 = vpop.f32.mrf.mxu0 }
 0x22a   : > { %4939 = vmatmul.msk.f32.gmra.mxu2 %vm194_vm1, %v3069_v63  ;;  %v2502_v39 = vadd.f32 %v2386_v6, %v2000_v0  ;;  %v2575_v63 = vld [vmem:[%s5155_s25 + $0x92] sm:$0xff] }
 0x22b   : > { %4989 = vmatmul.msk.f32.gmra.mxu3 %vm194_vm1, %v3571_v1  ;;  %v954_v1 = vld [vmem:[%s5384_s11 + $0x160] sm:$0xff] }
 0x22c   : > { %2550 = vst [vmem:[%s5384_s11 + $0x130] sm:$0xff] %v2502_v39  ;;  %5039 = vmatmul.msk.f32.gmra.mxu0 %vm194_vm1, %v2570_v2 }
 0x22d   : > { %v1385_v37 = vpop.f32.mrf.mxu2 }
 0x22e   : > { %v1499_v3 = vadd.f32 %v1385_v37, %v997_v5  ;;  %v1887_v20 = vpop.f32.mrf.mxu3  ;;  %v886_v7 = vpop.f32.mrf.mxu1  ;;  %v3075_v37 = vld [vmem:[%s5155_s25 + $0x98] sm:$0xff] }
 0x22f   : > { %v998_v9 = vadd.f32 %v950_v19, %v886_v7 }
 0x230   : > { %v2001_v12 = vadd.f32 %v1887_v20, %v1499_v3  ;;  %v3577_v20 = vld [vmem:[%s5155_s25 + $0x99] sm:$0xff] }
 0x231   : > { %4890 = vmatmul.msk.f32.gmra.mxu1 %vm194_vm1, %v2568_v50  ;;  %v2392_v14 = vpop.f32.mrf.mxu0 }
 0x232   : > { %4940 = vmatmul.msk.f32.gmra.mxu2 %vm194_vm1, %v3070_v8  ;;  %v2503_v4 = vadd.f32 %v2389_v10, %v2001_v12  ;;  %v2576_v8 = vld [vmem:[%s5155_s25 + $0x9a] sm:$0xff] }
 0x233   : > { %4990 = vmatmul.msk.f32.gmra.mxu3 %vm194_vm1, %v3572_v15  ;;  %v955_v15 = vld [vmem:[%s5384_s11 + $0x168] sm:$0xff] }
 0x234   : > { %2551 = vst [vmem:[%s5384_s11 + $0x138] sm:$0xff] %v2503_v4  ;;  %5040 = vmatmul.msk.f32.gmra.mxu0 %vm194_vm1, %v2571_v18 }
 0x235   : > { %v1388_v22 = vpop.f32.mrf.mxu2 }
 0x236   : > { %v1500_v43 = vadd.f32 %v1388_v22, %v998_v9  ;;  %v1890_v23 = vpop.f32.mrf.mxu3  ;;  %v889_v28 = vpop.f32.mrf.mxu1  ;;  %v3076_v22 = vld [vmem:[%s5155_s25 + $0xa0] sm:$0xff] }
 0x237   : > { %v999_v13 = vadd.f32 %v951_v35, %v889_v28 }
 0x238   : > { %v2002_v27 = vadd.f32 %v1890_v23, %v1500_v43  ;;  %v3578_v23 = vld [vmem:[%s5155_s25 + $0xa1] sm:$0xff] }
 0x239   : > { %4891 = vmatmul.msk.f32.gmra.mxu1 %vm194_vm1, %v2569_v33  ;;  %v2395_v34 = vpop.f32.mrf.mxu0 }
 0x23a   : > { %4941 = vmatmul.msk.f32.gmra.mxu2 %vm194_vm1, %v3071_v26  ;;  %v2504_v30 = vadd.f32 %v2392_v14, %v2002_v27  ;;  %v2577_v26 = vld [vmem:[%s5155_s25 + $0xa2] sm:$0xff] }
 0x23b   : > { %4991 = vmatmul.msk.f32.gmra.mxu3 %vm194_vm1, %v3573_v16  ;;  %v956_v16 = vld [vmem:[%s5384_s11 + $0x170] sm:$0xff] }
 0x23c   : > { %2552 = vst [vmem:[%s5384_s11 + $0x140] sm:$0xff] %v2504_v30  ;;  %5041 = vmatmul.msk.f32.gmra.mxu0 %vm194_vm1, %v2572_v31 }
 0x23d   : > { %v1391_v38 = vpop.f32.mrf.mxu2 }
 0x23e   : > { %v1501_v48 = vadd.f32 %v1391_v38, %v999_v13  ;;  %v1893_v25 = vpop.f32.mrf.mxu3  ;;  %v892_v36 = vpop.f32.mrf.mxu1  ;;  %v3077_v38 = vld [vmem:[%s5155_s25 + $0xa8] sm:$0xff] }
 0x23f   : > { %v1000_v17 = vadd.f32 %v952_v29, %v892_v36 }
 0x240   : > { %v2003_v24 = vadd.f32 %v1893_v25, %v1501_v48  ;;  %v3579_v25 = vld [vmem:[%s5155_s25 + $0xa9] sm:$0xff] }
 0x241   : > { %4892 = vmatmul.msk.f32.gmra.mxu1 %vm194_vm1, %v2570_v2  ;;  %v2398_v49 = vpop.f32.mrf.mxu0 }
 0x242   : > { %4942 = vmatmul.msk.f32.gmra.mxu2 %vm194_vm1, %v3072_v41  ;;  %v2505_v45 = vadd.f32 %v2395_v34, %v2003_v24  ;;  %v2578_v41 = vld [vmem:[%s5155_s25 + $0xaa] sm:$0xff] }
 0x243   : > { %4992 = vmatmul.msk.f32.gmra.mxu3 %vm194_vm1, %v3574_v42  ;;  %v957_v42 = vld [vmem:[%s5384_s11 + $0x178] sm:$0xff] }
 0x244   : > { %2553 = vst [vmem:[%s5384_s11 + $0x148] sm:$0xff] %v2505_v45  ;;  %5042 = vmatmul.msk.f32.gmra.mxu0 %vm194_vm1, %v2573_v46 }
 0x245   : > { %v1394_v50 = vpop.f32.mrf.mxu2 }
 0x246   : > { %v1502_v52 = vadd.f32 %v1394_v50, %v1000_v17  ;;  %v1896_v53 = vpop.f32.mrf.mxu3  ;;  %v895_v44 = vpop.f32.mrf.mxu1  ;;  %v3078_v50 = vld [vmem:[%s5155_s25 + $0xb0] sm:$0xff] }
 0x247   : > { %v1001_v21 = vadd.f32 %v953_v59, %v895_v44 }
 0x248   : > { %v2004_v54 = vadd.f32 %v1896_v53, %v1502_v52  ;;  %v3580_v53 = vld [vmem:[%s5155_s25 + $0xb1] sm:$0xff] }
 0x249   : > { %4893 = vmatmul.msk.f32.gmra.mxu1 %vm194_vm1, %v2571_v18  ;;  %v2401_v58 = vpop.f32.mrf.mxu0 }
 0x24a   : > { %4943 = vmatmul.msk.f32.gmra.mxu2 %vm194_vm1, %v3073_v32  ;;  %v2506_v56 = vadd.f32 %v2398_v49, %v2004_v54  ;;  %v2579_v32 = vld [vmem:[%s5155_s25 + $0xb2] sm:$0xff] }
 0x24b   : > { %4993 = vmatmul.msk.f32.gmra.mxu3 %vm194_vm1, %v3575_v55  ;;  %v2918_v55 = vld [vmem:[%s5384_s11] sm:$0xff] }
 0x24c   : > { %2554 = vst [vmem:[%s5384_s11 + $0x150] sm:$0xff] %v2506_v56  ;;  %5043 = vmatmul.msk.f32.gmra.mxu0 %vm194_vm1, %v2574_v57 }
 0x24d   : > { %v1397_v33 = vpop.f32.mrf.mxu2 }
 0x24e   : > { %v1503_v6 = vadd.f32 %v1397_v33, %v1001_v21  ;;  %v1899_v11 = vpop.f32.mrf.mxu3  ;;  %v898_v40 = vpop.f32.mrf.mxu1  ;;  %v3079_v33 = vld [vmem:[%s5155_s25 + $0xb8] sm:$0xff] }
 0x24f   : > { %v1002_v39 = vadd.f32 %v954_v1, %v898_v40 }
 0x250   : > { %v2005_v60 = vadd.f32 %v1899_v11, %v1503_v6  ;;  %v3581_v11 = vld [vmem:[%s5155_s25 + $0xb9] sm:$0xff] }
 0x251   : > { %4894 = vmatmul.msk.f32.gmra.mxu1 %vm194_vm1, %v2572_v31  ;;  %v2404_v0 = vpop.f32.mrf.mxu0 }
 0x252   : > { %4944 = vmatmul.msk.f32.gmra.mxu2 %vm194_vm1, %v3074_v51  ;;  %v2507_v62 = vadd.f32 %v2401_v58, %v2005_v60  ;;  %v2580_v51 = vld [vmem:[%s5155_s25 + $0xba] sm:$0xff] }
 0x253   : > { %4994 = vmatmul.msk.f32.gmra.mxu3 %vm194_vm1, %v3576_v61  ;;  %v2919_v61 = vld [vmem:[%s5384_s11 + $0x8] sm:$0xff] }
 0x254   : > { %2555 = vst [vmem:[%s5384_s11 + $0x158] sm:$0xff] %v2507_v62  ;;  %5044 = vmatmul.msk.f32.gmra.mxu0 %vm194_vm1, %v2575_v63 }
 0x255   : > { %v1400_v2 = vpop.f32.mrf.mxu2 }
 0x256   : > { %v1504_v10 = vadd.f32 %v1400_v2, %v1002_v39  ;;  %v1902_v47 = vpop.f32.mrf.mxu3  ;;  %v901_v5 = vpop.f32.mrf.mxu1  ;;  %v3080_v2 = vld [vmem:[%s5155_s25 + $0xc0] sm:$0xff] }
 0x257   : > { %v1003_v4 = vadd.f32 %v955_v15, %v901_v5 }
 0x258   : > { %v2006_v3 = vadd.f32 %v1902_v47, %v1504_v10  ;;  %v3582_v47 = vld [vmem:[%s5155_s25 + $0xc1] sm:$0xff] }
 0x259   : > { %4895 = vmatmul.msk.f32.gmra.mxu1 %vm194_vm1, %v2573_v46  ;;  %v2407_v12 = vpop.f32.mrf.mxu0 }
 0x25a   : > { %4945 = vmatmul.msk.f32.gmra.mxu2 %vm194_vm1, %v3075_v37  ;;  %v2508_v7 = vadd.f32 %v2404_v0, %v2006_v3  ;;  %v2581_v37 = vld [vmem:[%s5155_s25 + $0xc2] sm:$0xff] }
 0x25b   : > { %4995 = vmatmul.msk.f32.gmra.mxu3 %vm194_vm1, %v3577_v20  ;;  %v2920_v20 = vld [vmem:[%s5384_s11 + $0x10] sm:$0xff] }
 0x25c   : > { %2556 = vst [vmem:[%s5384_s11 + $0x160] sm:$0xff] %v2508_v7  ;;  %5045 = vmatmul.msk.f32.gmra.mxu0 %vm194_vm1, %v2576_v8 }
 0x25d   : > { %v1403_v18 = vpop.f32.mrf.mxu2 }
 0x25e   : > { %v1505_v14 = vadd.f32 %v1403_v18, %v1003_v4  ;;  %v1905_v19 = vpop.f32.mrf.mxu3  ;;  %v904_v9 = vpop.f32.mrf.mxu1  ;;  %v3081_v18 = vld [vmem:[%s5155_s25 + $0xc8] sm:$0xff] }
 0x25f   : > { %v1004_v30 = vadd.f32 %v956_v16, %v904_v9 }
 0x260   : > { %v2007_v43 = vadd.f32 %v1905_v19, %v1505_v14  ;;  %v3583_v19 = vld [vmem:[%s5155_s25 + $0xc9] sm:$0xff] }
 0x261   : > { %4896 = vmatmul.msk.f32.gmra.mxu1 %vm194_vm1, %v2574_v57  ;;  %v2410_v27 = vpop.f32.mrf.mxu0 }
 0x262   : > { %4946 = vmatmul.msk.f32.gmra.mxu2 %vm194_vm1, %v3076_v22  ;;  %v2509_v28 = vadd.f32 %v2407_v12, %v2007_v43  ;;  %v2582_v22 = vld [vmem:[%s5155_s25 + $0xca] sm:$0xff] }
 0x263   : > { %4996 = vmatmul.msk.f32.gmra.mxu3 %vm194_vm1, %v3578_v23  ;;  %v2921_v23 = vld [vmem:[%s5384_s11 + $0x18] sm:$0xff] }
 0x264   : > { %2557 = vst [vmem:[%s5384_s11 + $0x168] sm:$0xff] %v2509_v28  ;;  %5046 = vmatmul.msk.f32.gmra.mxu0 %vm194_vm1, %v2577_v26 }
 0x265   : > { %v1406_v31 = vpop.f32.mrf.mxu2 }
 0x266   : > { %v1506_v34 = vadd.f32 %v1406_v31, %v1004_v30  ;;  %v1908_v35 = vpop.f32.mrf.mxu3  ;;  %v907_v13 = vpop.f32.mrf.mxu1  ;;  %v3082_v31 = vld [vmem:[%s5155_s25 + $0xd0] sm:$0xff] }
 0x267   : > { %v1005_v45 = vadd.f32 %v957_v42, %v907_v13 }
 0x268   : > { %v2008_v48 = vadd.f32 %v1908_v35, %v1506_v34  ;;  %v3584_v35 = vld [vmem:[%s5155_s25 + $0xd1] sm:$0xff] }
 0x269   : > { %4897 = vmatmul.msk.f32.gmra.mxu1 %vm194_vm1, %v2575_v63  ;;  %v2413_v24 = vpop.f32.mrf.mxu0 }
 0x26a   : > { %4947 = vmatmul.msk.f32.gmra.mxu2 %vm194_vm1, %v3077_v38  ;;  %v2510_v36 = vadd.f32 %v2410_v27, %v2008_v48  ;;  %v2583_v38 = vld [vmem:[%s5155_s25 + $0xd2] sm:$0xff] }
 0x26b   : > { %4997 = vmatmul.msk.f32.gmra.mxu3 %vm194_vm1, %v3579_v25  ;;  %v2922_v25 = vld [vmem:[%s5384_s11 + $0x20] sm:$0xff] }
 0x26c   : > { %2558 = vst [vmem:[%s5384_s11 + $0x170] sm:$0xff] %v2510_v36  ;;  %5047 = vmatmul.msk.f32.gmra.mxu0 %vm194_vm1, %v2578_v41 }
 0x26d   : > { %v1409_v46 = vpop.f32.mrf.mxu2 }
 0x26e   : > { %v1507_v49 = vadd.f32 %v1409_v46, %v1005_v45  ;;  %v1911_v29 = vpop.f32.mrf.mxu3  ;;  %v2774_v17 = vpop.f32.mrf.mxu1  ;;  %v3083_v46 = vld [vmem:[%s5155_s25 + $0xd8] sm:$0xff] }
 0x26f   : > { %v2966_v56 = vadd.f32 %v2918_v55, %v2774_v17 }
 0x270   : > { %v2009_v52 = vadd.f32 %v1911_v29, %v1507_v49  ;;  %v3585_v29 = vld [vmem:[%s5155_s25 + $0xd9] sm:$0xff] }
 0x271   : > { %4898 = vmatmul.msk.f32.gmra.mxu1 %vm194_vm1, %v2576_v8  ;;  %v4280_v54 = vpop.f32.mrf.mxu0 }
 0x272   : > { %4948 = vmatmul.msk.f32.gmra.mxu2 %vm194_vm1, %v3078_v50  ;;  %v2511_v44 = vadd.f32 %v2413_v24, %v2009_v52  ;;  %v2584_v50 = vld [vmem:[%s5155_s25 + $0xda] sm:$0xff] }
 0x273   : > { %4998 = vmatmul.msk.f32.gmra.mxu3 %vm194_vm1, %v3580_v53  ;;  %v2923_v53 = vld [vmem:[%s5384_s11 + $0x28] sm:$0xff] }
 0x274   : > { %2559 = vst [vmem:[%s5384_s11 + $0x178] sm:$0xff] %v2511_v44  ;;  %5048 = vmatmul.msk.f32.gmra.mxu0 %vm194_vm1, %v2579_v32 }
 0x275   : > { %v3276_v57 = vpop.f32.mrf.mxu2 }
 0x276   : > { %v3468_v58 = vadd.f32 %v3276_v57, %v2966_v56  ;;  %v3778_v59 = vpop.f32.mrf.mxu3  ;;  %v2777_v21 = vpop.f32.mrf.mxu1  ;;  %v3084_v57 = vld [vmem:[%s5155_s25 + $0xe0] sm:$0xff] }
 0x277   : > { %v2967_v62 = vadd.f32 %v2919_v61, %v2777_v21 }
 0x278   : > { %v3970_v6 = vadd.f32 %v3778_v59, %v3468_v58  ;;  %v3586_v59 = vld [vmem:[%s5155_s25 + $0xe1] sm:$0xff] }
 0x279   : > { %4899 = vmatmul.msk.f32.gmra.mxu1 %vm194_vm1, %v2577_v26  ;;  %v4283_v60 = vpop.f32.mrf.mxu0 }
 0x27a   : > { %4949 = vmatmul.msk.f32.gmra.mxu2 %vm194_vm1, %v3079_v33  ;;  %v4472_v40 = vadd.f32 %v4280_v54, %v3970_v6  ;;  %v2585_v33 = vld [vmem:[%s5155_s25 + $0xe2] sm:$0xff] }
 0x27b   : > { %4999 = vmatmul.msk.f32.gmra.mxu3 %vm194_vm1, %v3581_v11  ;;  %v2924_v11 = vld [vmem:[%s5384_s11 + $0x30] sm:$0xff] }
 0x27c   : > { %4520 = vst [vmem:[%s5384_s11] sm:$0xff] %v4472_v40  ;;  %5049 = vmatmul.msk.f32.gmra.mxu0 %vm194_vm1, %v2580_v51 }
 0x27d   : > { %v3279_v63 = vpop.f32.mrf.mxu2 }
 0x27e   : > { %v3469_v0 = vadd.f32 %v3279_v63, %v2967_v62  ;;  %v3781_v1 = vpop.f32.mrf.mxu3  ;;  %v2780_v39 = vpop.f32.mrf.mxu1  ;;  %v3085_v63 = vld [vmem:[%s5155_s25 + $0xe8] sm:$0xff] }
 0x27f   : > { %v2968_v7 = vadd.f32 %v2920_v20, %v2780_v39 }
 0x280   : > { %v3971_v10 = vadd.f32 %v3781_v1, %v3469_v0  ;;  %v3587_v1 = vld [vmem:[%s5155_s25 + $0xe9] sm:$0xff] }
 0x281   : > { %4900 = vmatmul.msk.f32.gmra.mxu1 %vm194_vm1, %v2578_v41  ;;  %v4286_v3 = vpop.f32.mrf.mxu0 }
 0x282   : > { %4950 = vmatmul.msk.f32.gmra.mxu2 %vm194_vm1, %v3080_v2  ;;  %v4473_v5 = vadd.f32 %v4283_v60, %v3971_v10  ;;  %v2586_v2 = vld [vmem:[%s5155_s25 + $0xea] sm:$0xff] }
 0x283   : > { %5000 = vmatmul.msk.f32.gmra.mxu3 %vm194_vm1, %v3582_v47  ;;  %v2925_v47 = vld [vmem:[%s5384_s11 + $0x38] sm:$0xff] }
 0x284   : > { %4521 = vst [vmem:[%s5384_s11 + $0x8] sm:$0xff] %v4473_v5  ;;  %5050 = vmatmul.msk.f32.gmra.mxu0 %vm194_vm1, %v2581_v37 }
 0x285   : > { %v3282_v8 = vpop.f32.mrf.mxu2 }
 0x286   : > { %v3470_v12 = vadd.f32 %v3282_v8, %v2968_v7  ;;  %v3784_v15 = vpop.f32.mrf.mxu3  ;;  %v2783_v4 = vpop.f32.mrf.mxu1  ;;  %v3086_v8 = vld [vmem:[%s5155_s25 + $0xf0] sm:$0xff] }
 0x287   : > { %v2969_v28 = vadd.f32 %v2921_v23, %v2783_v4 }
 0x288   : > { %v3972_v14 = vadd.f32 %v3784_v15, %v3470_v12  ;;  %v3588_v15 = vld [vmem:[%s5155_s25 + $0xf1] sm:$0xff] }
 0x289   : > { %4901 = vmatmul.msk.f32.gmra.mxu1 %vm194_vm1, %v2579_v32  ;;  %v4289_v43 = vpop.f32.mrf.mxu0 }
 0x28a   : > { %4951 = vmatmul.msk.f32.gmra.mxu2 %vm194_vm1, %v3081_v18  ;;  %v4474_v9 = vadd.f32 %v4286_v3, %v3972_v14  ;;  %v2587_v18 = vld [vmem:[%s5155_s25 + $0xf2] sm:$0xff] }
 0x28b   : > { %5001 = vmatmul.msk.f32.gmra.mxu3 %vm194_vm1, %v3583_v19  ;;  %v2926_v19 = vld [vmem:[%s5384_s11 + $0x40] sm:$0xff] }
 0x28c   : > { %4522 = vst [vmem:[%s5384_s11 + $0x10] sm:$0xff] %v4474_v9  ;;  %5051 = vmatmul.msk.f32.gmra.mxu0 %vm194_vm1, %v2582_v22 }
 0x28d   : > { %v3285_v26 = vpop.f32.mrf.mxu2 }
 0x28e   : > { %v3471_v27 = vadd.f32 %v3285_v26, %v2969_v28  ;;  %v3787_v16 = vpop.f32.mrf.mxu3  ;;  %v2786_v30 = vpop.f32.mrf.mxu1  ;;  %v3087_v26 = vld [vmem:[%s5155_s25 + $0xf8] sm:$0xff] }
 0x28f   : > { %v2970_v36 = vadd.f32 %v2922_v25, %v2786_v30 }
 0x290   : > { %v3973_v34 = vadd.f32 %v3787_v16, %v3471_v27  ;;  %v3589_v16 = vld [vmem:[%s5155_s25 + $0xf9] sm:$0xff] }
 0x291   : > { %4902 = vmatmul.msk.f32.gmra.mxu1 %vm194_vm1, %v2580_v51  ;;  %v4292_v48 = vpop.f32.mrf.mxu0 }
 0x292   : > { %4952 = vmatmul.msk.f32.gmra.mxu2 %vm194_vm1, %v3082_v31  ;;  %v4475_v13 = vadd.f32 %v4289_v43, %v3973_v34  ;;  %v2588_v31 = vld [vmem:[%s5155_s25 + $0xfa] sm:$0xff] }
 0x293   : > { %5002 = vmatmul.msk.f32.gmra.mxu3 %vm194_vm1, %v3584_v35  ;;  %v2927_v35 = vld [vmem:[%s5384_s11 + $0x48] sm:$0xff] }
 0x294   : > { %4523 = vst [vmem:[%s5384_s11 + $0x18] sm:$0xff] %v4475_v13  ;;  %5052 = vmatmul.msk.f32.gmra.mxu0 %vm194_vm1, %v2583_v38 }
 0x295   : > { %v3288_v41 = vpop.f32.mrf.mxu2 }
 0x296   : > { %v3472_v24 = vadd.f32 %v3288_v41, %v2970_v36  ;;  %v3790_v42 = vpop.f32.mrf.mxu3  ;;  %v2789_v45 = vpop.f32.mrf.mxu1  ;;  %v3088_v41 = vld [vmem:[%s5155_s25 + $0x100] sm:$0xff] }
 0x297   : > { %v2971_v44 = vadd.f32 %v2923_v53, %v2789_v45 }
 0x298   : > { %v3974_v49 = vadd.f32 %v3790_v42, %v3472_v24  ;;  %v3590_v42 = vld [vmem:[%s5155_s25 + $0x101] sm:$0xff] }
 0x299   : > { %4903 = vmatmul.msk.f32.gmra.mxu1 %vm194_vm1, %v2581_v37  ;;  %v4295_v52 = vpop.f32.mrf.mxu0 }
 0x29a   : > { %4953 = vmatmul.msk.f32.gmra.mxu2 %vm194_vm1, %v3083_v46  ;;  %v4476_v17 = vadd.f32 %v4292_v48, %v3974_v49  ;;  %v2589_v46 = vld [vmem:[%s5155_s25 + $0x102] sm:$0xff] }
 0x29b   : > { %5003 = vmatmul.msk.f32.gmra.mxu3 %vm194_vm1, %v3585_v29  ;;  %v2928_v29 = vld [vmem:[%s5384_s11 + $0x50] sm:$0xff] }
 0x29c   : > { %4524 = vst [vmem:[%s5384_s11 + $0x20] sm:$0xff] %v4476_v17  ;;  %5053 = vmatmul.msk.f32.gmra.mxu0 %vm194_vm1, %v2584_v50 }
 0x29d   : > { %v3291_v32 = vpop.f32.mrf.mxu2 }
 0x29e   : > { %v3473_v54 = vadd.f32 %v3291_v32, %v2971_v44  ;;  %v3793_v55 = vpop.f32.mrf.mxu3  ;;  %v2792_v56 = vpop.f32.mrf.mxu1  ;;  %v3089_v32 = vld [vmem:[%s5155_s25 + $0x108] sm:$0xff] }
 0x29f   : > { %v2972_v40 = vadd.f32 %v2924_v11, %v2792_v56 }
 0x2a0   : > { %v3975_v58 = vadd.f32 %v3793_v55, %v3473_v54  ;;  %v3591_v55 = vld [vmem:[%s5155_s25 + $0x109] sm:$0xff] }
 0x2a1   : > { %4904 = vmatmul.msk.f32.gmra.mxu1 %vm194_vm1, %v2582_v22  ;;  %v4298_v6 = vpop.f32.mrf.mxu0 }
 0x2a2   : > { %4954 = vmatmul.msk.f32.gmra.mxu2 %vm194_vm1, %v3084_v57  ;;  %v4477_v21 = vadd.f32 %v4295_v52, %v3975_v58  ;;  %v2590_v57 = vld [vmem:[%s5155_s25 + $0x10a] sm:$0xff] }
 0x2a3   : > { %5004 = vmatmul.msk.f32.gmra.mxu3 %vm194_vm1, %v3586_v59  ;;  %v2929_v59 = vld [vmem:[%s5384_s11 + $0x58] sm:$0xff] }
 0x2a4   : > { %4525 = vst [vmem:[%s5384_s11 + $0x28] sm:$0xff] %v4477_v21  ;;  %5054 = vmatmul.msk.f32.gmra.mxu0 %vm194_vm1, %v2585_v33 }
 0x2a5   : > { %v3294_v51 = vpop.f32.mrf.mxu2 }
 0x2a6   : > { %v3474_v60 = vadd.f32 %v3294_v51, %v2972_v40  ;;  %v3796_v61 = vpop.f32.mrf.mxu3  ;;  %v2795_v62 = vpop.f32.mrf.mxu1  ;;  %v3090_v51 = vld [vmem:[%s5155_s25 + $0x110] sm:$0xff] }
 0x2a7   : > { %v2973_v5 = vadd.f32 %v2925_v47, %v2795_v62 }
 0x2a8   : > { %v3976_v0 = vadd.f32 %v3796_v61, %v3474_v60  ;;  %v3592_v61 = vld [vmem:[%s5155_s25 + $0x111] sm:$0xff] }
 0x2a9   : > { %4905 = vmatmul.msk.f32.gmra.mxu1 %vm194_vm1, %v2583_v38  ;;  %v4301_v10 = vpop.f32.mrf.mxu0 }
 0x2aa   : > { %4955 = vmatmul.msk.f32.gmra.mxu2 %vm194_vm1, %v3085_v63  ;;  %v4478_v39 = vadd.f32 %v4298_v6, %v3976_v0  ;;  %v2591_v63 = vld [vmem:[%s5155_s25 + $0x112] sm:$0xff] }
 0x2ab   : > { %5005 = vmatmul.msk.f32.gmra.mxu3 %vm194_vm1, %v3587_v1  ;;  %v2930_v1 = vld [vmem:[%s5384_s11 + $0x60] sm:$0xff] }
 0x2ac   : > { %4526 = vst [vmem:[%s5384_s11 + $0x30] sm:$0xff] %v4478_v39  ;;  %5055 = vmatmul.msk.f32.gmra.mxu0 %vm194_vm1, %v2586_v2 }
 0x2ad   : > { %v3297_v37 = vpop.f32.mrf.mxu2 }
 0x2ae   : > { %v3475_v3 = vadd.f32 %v3297_v37, %v2973_v5  ;;  %v3799_v20 = vpop.f32.mrf.mxu3  ;;  %v2798_v7 = vpop.f32.mrf.mxu1  ;;  %v3091_v37 = vld [vmem:[%s5155_s25 + $0x118] sm:$0xff] }
 0x2af   : > { %v2974_v9 = vadd.f32 %v2926_v19, %v2798_v7 }
 0x2b0   : > { %v3977_v12 = vadd.f32 %v3799_v20, %v3475_v3  ;;  %v3593_v20 = vld [vmem:[%s5155_s25 + $0x119] sm:$0xff] }
 0x2b1   : > { %4906 = vmatmul.msk.f32.gmra.mxu1 %vm194_vm1, %v2584_v50  ;;  %v4304_v14 = vpop.f32.mrf.mxu0 }
 0x2b2   : > { %4956 = vmatmul.msk.f32.gmra.mxu2 %vm194_vm1, %v3086_v8  ;;  %v4479_v4 = vadd.f32 %v4301_v10, %v3977_v12  ;;  %v2592_v8 = vld [vmem:[%s5155_s25 + $0x11a] sm:$0xff] }
 0x2b3   : > { %5006 = vmatmul.msk.f32.gmra.mxu3 %vm194_vm1, %v3588_v15  ;;  %v2931_v15 = vld [vmem:[%s5384_s11 + $0x68] sm:$0xff] }
 0x2b4   : > { %4527 = vst [vmem:[%s5384_s11 + $0x38] sm:$0xff] %v4479_v4  ;;  %5056 = vmatmul.msk.f32.gmra.mxu0 %vm194_vm1, %v2587_v18 }
 0x2b5   : > { %v3300_v22 = vpop.f32.mrf.mxu2 }
 0x2b6   : > { %v3476_v43 = vadd.f32 %v3300_v22, %v2974_v9  ;;  %v3802_v23 = vpop.f32.mrf.mxu3  ;;  %v2801_v28 = vpop.f32.mrf.mxu1  ;;  %v3092_v22 = vld [vmem:[%s5155_s25 + $0x120] sm:$0xff] }
 0x2b7   : > { %v2975_v13 = vadd.f32 %v2927_v35, %v2801_v28 }
 0x2b8   : > { %v3978_v27 = vadd.f32 %v3802_v23, %v3476_v43  ;;  %v3594_v23 = vld [vmem:[%s5155_s25 + $0x121] sm:$0xff] }
 0x2b9   : > { %4907 = vmatmul.msk.f32.gmra.mxu1 %vm194_vm1, %v2585_v33  ;;  %v4307_v34 = vpop.f32.mrf.mxu0 }
 0x2ba   : > { %4957 = vmatmul.msk.f32.gmra.mxu2 %vm194_vm1, %v3087_v26  ;;  %v4480_v30 = vadd.f32 %v4304_v14, %v3978_v27  ;;  %v2593_v26 = vld [vmem:[%s5155_s25 + $0x122] sm:$0xff] }
 0x2bb   : > { %5007 = vmatmul.msk.f32.gmra.mxu3 %vm194_vm1, %v3589_v16  ;;  %v2932_v16 = vld [vmem:[%s5384_s11 + $0x70] sm:$0xff] }
 0x2bc   : > { %4528 = vst [vmem:[%s5384_s11 + $0x40] sm:$0xff] %v4480_v30  ;;  %5057 = vmatmul.msk.f32.gmra.mxu0 %vm194_vm1, %v2588_v31 }
 0x2bd   : > { %v3303_v38 = vpop.f32.mrf.mxu2 }
 0x2be   : > { %v3477_v48 = vadd.f32 %v3303_v38, %v2975_v13  ;;  %v3805_v25 = vpop.f32.mrf.mxu3  ;;  %v2804_v36 = vpop.f32.mrf.mxu1  ;;  %v3093_v38 = vld [vmem:[%s5155_s25 + $0x128] sm:$0xff] }
 0x2bf   : > { %v2976_v17 = vadd.f32 %v2928_v29, %v2804_v36 }
 0x2c0   : > { %v3979_v24 = vadd.f32 %v3805_v25, %v3477_v48  ;;  %v3595_v25 = vld [vmem:[%s5155_s25 + $0x129] sm:$0xff] }
 0x2c1   : > { %4908 = vmatmul.msk.f32.gmra.mxu1 %vm194_vm1, %v2586_v2  ;;  %v4310_v49 = vpop.f32.mrf.mxu0 }
 0x2c2   : > { %4958 = vmatmul.msk.f32.gmra.mxu2 %vm194_vm1, %v3088_v41  ;;  %v4481_v45 = vadd.f32 %v4307_v34, %v3979_v24  ;;  %v2594_v41 = vld [vmem:[%s5155_s25 + $0x12a] sm:$0xff] }
 0x2c3   : > { %5008 = vmatmul.msk.f32.gmra.mxu3 %vm194_vm1, %v3590_v42  ;;  %v2933_v42 = vld [vmem:[%s5384_s11 + $0x78] sm:$0xff] }
 0x2c4   : > { %4529 = vst [vmem:[%s5384_s11 + $0x48] sm:$0xff] %v4481_v45  ;;  %5058 = vmatmul.msk.f32.gmra.mxu0 %vm194_vm1, %v2589_v46 }
 0x2c5   : > { %v3306_v50 = vpop.f32.mrf.mxu2 }
 0x2c6   : > { %v3478_v52 = vadd.f32 %v3306_v50, %v2976_v17  ;;  %v3808_v53 = vpop.f32.mrf.mxu3  ;;  %v2807_v44 = vpop.f32.mrf.mxu1  ;;  %v3094_v50 = vld [vmem:[%s5155_s25 + $0x130] sm:$0xff] }
 0x2c7   : > { %v2977_v21 = vadd.f32 %v2929_v59, %v2807_v44 }
 0x2c8   : > { %v3980_v54 = vadd.f32 %v3808_v53, %v3478_v52  ;;  %v3596_v53 = vld [vmem:[%s5155_s25 + $0x131] sm:$0xff] }
 0x2c9   : > { %4909 = vmatmul.msk.f32.gmra.mxu1 %vm194_vm1, %v2587_v18  ;;  %v4313_v58 = vpop.f32.mrf.mxu0 }
 0x2ca   : > { %4959 = vmatmul.msk.f32.gmra.mxu2 %vm194_vm1, %v3089_v32  ;;  %v4482_v56 = vadd.f32 %v4310_v49, %v3980_v54  ;;  %v2595_v32 = vld [vmem:[%s5155_s25 + $0x132] sm:$0xff] }
 0x2cb   : > { %5009 = vmatmul.msk.f32.gmra.mxu3 %vm194_vm1, %v3591_v55  ;;  %v2934_v55 = vld [vmem:[%s5384_s11 + $0x80] sm:$0xff] }
 0x2cc   : > { %4530 = vst [vmem:[%s5384_s11 + $0x50] sm:$0xff] %v4482_v56  ;;  %5059 = vmatmul.msk.f32.gmra.mxu0 %vm194_vm1, %v2590_v57 }
 0x2cd   : > { %v3309_v33 = vpop.f32.mrf.mxu2 }
 0x2ce   : > { %v3479_v6 = vadd.f32 %v3309_v33, %v2977_v21  ;;  %v3811_v11 = vpop.f32.mrf.mxu3  ;;  %v2810_v40 = vpop.f32.mrf.mxu1  ;;  %v3095_v33 = vld [vmem:[%s5155_s25 + $0x138] sm:$0xff] }
 0x2cf   : > { %v2978_v39 = vadd.f32 %v2930_v1, %v2810_v40 }
 0x2d0   : > { %v3981_v60 = vadd.f32 %v3811_v11, %v3479_v6  ;;  %v3597_v11 = vld [vmem:[%s5155_s25 + $0x139] sm:$0xff] }
 0x2d1   : > { %4910 = vmatmul.msk.f32.gmra.mxu1 %vm194_vm1, %v2588_v31  ;;  %v4316_v0 = vpop.f32.mrf.mxu0 }
 0x2d2   : > { %4960 = vmatmul.msk.f32.gmra.mxu2 %vm194_vm1, %v3090_v51  ;;  %v4483_v62 = vadd.f32 %v4313_v58, %v3981_v60  ;;  %v2596_v51 = vld [vmem:[%s5155_s25 + $0x13a] sm:$0xff] }
 0x2d3   : > { %5010 = vmatmul.msk.f32.gmra.mxu3 %vm194_vm1, %v3592_v61  ;;  %v2935_v61 = vld [vmem:[%s5384_s11 + $0x88] sm:$0xff] }
 0x2d4   : > { %4531 = vst [vmem:[%s5384_s11 + $0x58] sm:$0xff] %v4483_v62  ;;  %5060 = vmatmul.msk.f32.gmra.mxu0 %vm194_vm1, %v2591_v63 }
 0x2d5   : > { %v3312_v2 = vpop.f32.mrf.mxu2 }
 0x2d6   : > { %v3480_v10 = vadd.f32 %v3312_v2, %v2978_v39  ;;  %v3814_v47 = vpop.f32.mrf.mxu3  ;;  %v2813_v5 = vpop.f32.mrf.mxu1  ;;  %v3096_v2 = vld [vmem:[%s5155_s25 + $0x140] sm:$0xff] }
 0x2d7   : > { %v2979_v4 = vadd.f32 %v2931_v15, %v2813_v5 }
 0x2d8   : > { %v3982_v3 = vadd.f32 %v3814_v47, %v3480_v10  ;;  %v3598_v47 = vld [vmem:[%s5155_s25 + $0x141] sm:$0xff] }
 0x2d9   : > { %4911 = vmatmul.msk.f32.gmra.mxu1 %vm194_vm1, %v2589_v46  ;;  %v4319_v12 = vpop.f32.mrf.mxu0 }
 0x2da   : > { %4961 = vmatmul.msk.f32.gmra.mxu2 %vm194_vm1, %v3091_v37  ;;  %v4484_v7 = vadd.f32 %v4316_v0, %v3982_v3  ;;  %v2597_v37 = vld [vmem:[%s5155_s25 + $0x142] sm:$0xff] }
 0x2db   : > { %5011 = vmatmul.msk.f32.gmra.mxu3 %vm194_vm1, %v3593_v20  ;;  %v2936_v20 = vld [vmem:[%s5384_s11 + $0x90] sm:$0xff] }
 0x2dc   : > { %4532 = vst [vmem:[%s5384_s11 + $0x60] sm:$0xff] %v4484_v7  ;;  %5061 = vmatmul.msk.f32.gmra.mxu0 %vm194_vm1, %v2592_v8 }
 0x2dd   : > { %v3315_v18 = vpop.f32.mrf.mxu2 }
 0x2de   : > { %v3481_v14 = vadd.f32 %v3315_v18, %v2979_v4  ;;  %v3817_v19 = vpop.f32.mrf.mxu3  ;;  %v2816_v9 = vpop.f32.mrf.mxu1  ;;  %v3097_v18 = vld [vmem:[%s5155_s25 + $0x148] sm:$0xff] }
 0x2df   : > { %v2980_v30 = vadd.f32 %v2932_v16, %v2816_v9 }
 0x2e0   : > { %v3983_v43 = vadd.f32 %v3817_v19, %v3481_v14  ;;  %v3599_v19 = vld [vmem:[%s5155_s25 + $0x149] sm:$0xff] }
 0x2e1   : > { %4912 = vmatmul.msk.f32.gmra.mxu1 %vm194_vm1, %v2590_v57  ;;  %v4322_v27 = vpop.f32.mrf.mxu0 }
 0x2e2   : > { %4962 = vmatmul.msk.f32.gmra.mxu2 %vm194_vm1, %v3092_v22  ;;  %v4485_v28 = vadd.f32 %v4319_v12, %v3983_v43  ;;  %v2598_v22 = vld [vmem:[%s5155_s25 + $0x14a] sm:$0xff] }
 0x2e3   : > { %5012 = vmatmul.msk.f32.gmra.mxu3 %vm194_vm1, %v3594_v23  ;;  %v2937_v23 = vld [vmem:[%s5384_s11 + $0x98] sm:$0xff] }
 0x2e4   : > { %4533 = vst [vmem:[%s5384_s11 + $0x68] sm:$0xff] %v4485_v28  ;;  %5062 = vmatmul.msk.f32.gmra.mxu0 %vm194_vm1, %v2593_v26 }
 0x2e5   : > { %v3318_v31 = vpop.f32.mrf.mxu2 }
 0x2e6   : > { %v3482_v34 = vadd.f32 %v3318_v31, %v2980_v30  ;;  %v3820_v35 = vpop.f32.mrf.mxu3  ;;  %v2819_v13 = vpop.f32.mrf.mxu1  ;;  %v3098_v31 = vld [vmem:[%s5155_s25 + $0x150] sm:$0xff] }
 0x2e7   : > { %v2981_v45 = vadd.f32 %v2933_v42, %v2819_v13 }
 0x2e8   : > { %v3984_v48 = vadd.f32 %v3820_v35, %v3482_v34  ;;  %v3600_v35 = vld [vmem:[%s5155_s25 + $0x151] sm:$0xff] }
 0x2e9   : > { %4913 = vmatmul.msk.f32.gmra.mxu1 %vm194_vm1, %v2591_v63  ;;  %v4325_v24 = vpop.f32.mrf.mxu0 }
 0x2ea   : > { %4963 = vmatmul.msk.f32.gmra.mxu2 %vm194_vm1, %v3093_v38  ;;  %v4486_v36 = vadd.f32 %v4322_v27, %v3984_v48  ;;  %v2599_v38 = vld [vmem:[%s5155_s25 + $0x152] sm:$0xff] }
 0x2eb   : > { %5013 = vmatmul.msk.f32.gmra.mxu3 %vm194_vm1, %v3595_v25  ;;  %v2938_v25 = vld [vmem:[%s5384_s11 + $0xa0] sm:$0xff] }
 0x2ec   : > { %4534 = vst [vmem:[%s5384_s11 + $0x70] sm:$0xff] %v4486_v36  ;;  %5063 = vmatmul.msk.f32.gmra.mxu0 %vm194_vm1, %v2594_v41 }
 0x2ed   : > { %v3321_v46 = vpop.f32.mrf.mxu2 }
 0x2ee   : > { %v3483_v49 = vadd.f32 %v3321_v46, %v2981_v45  ;;  %v3823_v29 = vpop.f32.mrf.mxu3  ;;  %v2822_v17 = vpop.f32.mrf.mxu1  ;;  %v3099_v46 = vld [vmem:[%s5155_s25 + $0x158] sm:$0xff] }
 0x2ef   : > { %v2982_v56 = vadd.f32 %v2934_v55, %v2822_v17 }
 0x2f0   : > { %v3985_v52 = vadd.f32 %v3823_v29, %v3483_v49  ;;  %v3601_v29 = vld [vmem:[%s5155_s25 + $0x159] sm:$0xff] }
 0x2f1   : > { %4914 = vmatmul.msk.f32.gmra.mxu1 %vm194_vm1, %v2592_v8  ;;  %v4328_v54 = vpop.f32.mrf.mxu0 }
 0x2f2   : > { %4964 = vmatmul.msk.f32.gmra.mxu2 %vm194_vm1, %v3094_v50  ;;  %v4487_v44 = vadd.f32 %v4325_v24, %v3985_v52  ;;  %v2600_v50 = vld [vmem:[%s5155_s25 + $0x15a] sm:$0xff] }
 0x2f3   : > { %5014 = vmatmul.msk.f32.gmra.mxu3 %vm194_vm1, %v3596_v53  ;;  %v2939_v53 = vld [vmem:[%s5384_s11 + $0xa8] sm:$0xff] }
 0x2f4   : > { %4535 = vst [vmem:[%s5384_s11 + $0x78] sm:$0xff] %v4487_v44  ;;  %5064 = vmatmul.msk.f32.gmra.mxu0 %vm194_vm1, %v2595_v32 }
 0x2f5   : > { %v3324_v57 = vpop.f32.mrf.mxu2 }
 0x2f6   : > { %v3484_v58 = vadd.f32 %v3324_v57, %v2982_v56  ;;  %v3826_v59 = vpop.f32.mrf.mxu3  ;;  %v2825_v21 = vpop.f32.mrf.mxu1  ;;  %v3100_v57 = vld [vmem:[%s5155_s25 + $0x160] sm:$0xff] }
 0x2f7   : > { %v2983_v62 = vadd.f32 %v2935_v61, %v2825_v21 }
 0x2f8   : > { %v3986_v6 = vadd.f32 %v3826_v59, %v3484_v58  ;;  %v3602_v59 = vld [vmem:[%s5155_s25 + $0x161] sm:$0xff] }
 0x2f9   : > { %4915 = vmatmul.msk.f32.gmra.mxu1 %vm194_vm1, %v2593_v26  ;;  %v4331_v60 = vpop.f32.mrf.mxu0 }
 0x2fa   : > { %4965 = vmatmul.msk.f32.gmra.mxu2 %vm194_vm1, %v3095_v33  ;;  %v4488_v40 = vadd.f32 %v4328_v54, %v3986_v6  ;;  %v2601_v33 = vld [vmem:[%s5155_s25 + $0x162] sm:$0xff] }
 0x2fb   : > { %5015 = vmatmul.msk.f32.gmra.mxu3 %vm194_vm1, %v3597_v11  ;;  %v2940_v11 = vld [vmem:[%s5384_s11 + $0xb0] sm:$0xff] }
 0x2fc   : > { %4536 = vst [vmem:[%s5384_s11 + $0x80] sm:$0xff] %v4488_v40  ;;  %5065 = vmatmul.msk.f32.gmra.mxu0 %vm194_vm1, %v2596_v51 }
 0x2fd   : > { %v3327_v63 = vpop.f32.mrf.mxu2 }
 0x2fe   : > { %v3485_v0 = vadd.f32 %v3327_v63, %v2983_v62  ;;  %v3829_v1 = vpop.f32.mrf.mxu3  ;;  %v2828_v39 = vpop.f32.mrf.mxu1  ;;  %v3101_v63 = vld [vmem:[%s5155_s25 + $0x168] sm:$0xff] }
 0x2ff   : > { %v2984_v7 = vadd.f32 %v2936_v20, %v2828_v39 }
 0x300   : > { %v3987_v10 = vadd.f32 %v3829_v1, %v3485_v0  ;;  %v3603_v1 = vld [vmem:[%s5155_s25 + $0x169] sm:$0xff] }
 0x301   : > { %4916 = vmatmul.msk.f32.gmra.mxu1 %vm194_vm1, %v2594_v41  ;;  %v4334_v3 = vpop.f32.mrf.mxu0 }
 0x302   : > { %4966 = vmatmul.msk.f32.gmra.mxu2 %vm194_vm1, %v3096_v2  ;;  %v4489_v5 = vadd.f32 %v4331_v60, %v3987_v10  ;;  %v2602_v2 = vld [vmem:[%s5155_s25 + $0x16a] sm:$0xff] }
 0x303   : > { %5016 = vmatmul.msk.f32.gmra.mxu3 %vm194_vm1, %v3598_v47  ;;  %v2941_v47 = vld [vmem:[%s5384_s11 + $0xb8] sm:$0xff] }
 0x304   : > { %4537 = vst [vmem:[%s5384_s11 + $0x88] sm:$0xff] %v4489_v5  ;;  %5066 = vmatmul.msk.f32.gmra.mxu0 %vm194_vm1, %v2597_v37 }
 0x305   : > { %v3330_v8 = vpop.f32.mrf.mxu2 }
 0x306   : > { %v3486_v12 = vadd.f32 %v3330_v8, %v2984_v7  ;;  %v3832_v15 = vpop.f32.mrf.mxu3  ;;  %v2831_v4 = vpop.f32.mrf.mxu1  ;;  %v3102_v8 = vld [vmem:[%s5155_s25 + $0x170] sm:$0xff] }
 0x307   : > { %v2985_v28 = vadd.f32 %v2937_v23, %v2831_v4 }
 0x308   : > { %v3988_v14 = vadd.f32 %v3832_v15, %v3486_v12  ;;  %v3604_v15 = vld [vmem:[%s5155_s25 + $0x171] sm:$0xff] }
 0x309   : > { %4917 = vmatmul.msk.f32.gmra.mxu1 %vm194_vm1, %v2595_v32  ;;  %v4337_v43 = vpop.f32.mrf.mxu0 }
 0x30a   : > { %4967 = vmatmul.msk.f32.gmra.mxu2 %vm194_vm1, %v3097_v18  ;;  %v4490_v9 = vadd.f32 %v4334_v3, %v3988_v14  ;;  %v2603_v18 = vld [vmem:[%s5155_s25 + $0x172] sm:$0xff] }
 0x30b   : > { %5017 = vmatmul.msk.f32.gmra.mxu3 %vm194_vm1, %v3599_v19  ;;  %v2942_v19 = vld [vmem:[%s5384_s11 + $0xc0] sm:$0xff] }
 0x30c   : > { %4538 = vst [vmem:[%s5384_s11 + $0x90] sm:$0xff] %v4490_v9  ;;  %5067 = vmatmul.msk.f32.gmra.mxu0 %vm194_vm1, %v2598_v22 }
 0x30d   : > { %v3333_v26 = vpop.f32.mrf.mxu2 }
 0x30e   : > { %v3487_v27 = vadd.f32 %v3333_v26, %v2985_v28  ;;  %v3835_v16 = vpop.f32.mrf.mxu3  ;;  %v2834_v30 = vpop.f32.mrf.mxu1  ;;  %v3103_v26 = vld [vmem:[%s5155_s25 + $0x178] sm:$0xff] }
 0x30f   : > { %v2986_v36 = vadd.f32 %v2938_v25, %v2834_v30 }
 0x310   : > { %v3989_v34 = vadd.f32 %v3835_v16, %v3487_v27  ;;  %v3605_v16 = vld [vmem:[%s5155_s25 + $0x179] sm:$0xff] }
 0x311   : > { %4918 = vmatmul.msk.f32.gmra.mxu1 %vm194_vm1, %v2596_v51  ;;  %v4340_v48 = vpop.f32.mrf.mxu0 }
 0x312   : > { %4968 = vmatmul.msk.f32.gmra.mxu2 %vm194_vm1, %v3098_v31  ;;  %v4491_v13 = vadd.f32 %v4337_v43, %v3989_v34  ;;  %v2604_v31 = vld [vmem:[%s5155_s25 + $0x17a] sm:$0xff] }
 0x313   : > { %5018 = vmatmul.msk.f32.gmra.mxu3 %vm194_vm1, %v3600_v35  ;;  %v2943_v35 = vld [vmem:[%s5384_s11 + $0xc8] sm:$0xff] }
 0x314   : > { %4539 = vst [vmem:[%s5384_s11 + $0x98] sm:$0xff] %v4491_v13  ;;  %5068 = vmatmul.msk.f32.gmra.mxu0 %vm194_vm1, %v2599_v38 }
 0x315   : > { %v3336_v41 = vpop.f32.mrf.mxu2 }
 0x316   : > { %v3488_v24 = vadd.f32 %v3336_v41, %v2986_v36  ;;  %v3838_v42 = vpop.f32.mrf.mxu3  ;;  %v2837_v45 = vpop.f32.mrf.mxu1  ;;  %v3104_v41 = vld [vmem:[%s5155_s25 + $0x180] sm:$0xff] }
 0x317   : > { %v2987_v44 = vadd.f32 %v2939_v53, %v2837_v45 }
 0x318   : > { %v3990_v49 = vadd.f32 %v3838_v42, %v3488_v24  ;;  %v3606_v42 = vld [vmem:[%s5155_s25 + $0x181] sm:$0xff] }
 0x319   : > { %4919 = vmatmul.msk.f32.gmra.mxu1 %vm194_vm1, %v2597_v37  ;;  %v4343_v52 = vpop.f32.mrf.mxu0 }
 0x31a   : > { %4969 = vmatmul.msk.f32.gmra.mxu2 %vm194_vm1, %v3099_v46  ;;  %v4492_v17 = vadd.f32 %v4340_v48, %v3990_v49  ;;  %v2605_v46 = vld [vmem:[%s5155_s25 + $0x182] sm:$0xff] }
 0x31b   : > { %5019 = vmatmul.msk.f32.gmra.mxu3 %vm194_vm1, %v3601_v29  ;;  %v2944_v29 = vld [vmem:[%s5384_s11 + $0xd0] sm:$0xff] }
 0x31c   : > { %4540 = vst [vmem:[%s5384_s11 + $0xa0] sm:$0xff] %v4492_v17  ;;  %5069 = vmatmul.msk.f32.gmra.mxu0 %vm194_vm1, %v2600_v50 }
 0x31d   : > { %v3339_v32 = vpop.f32.mrf.mxu2 }
 0x31e   : > { %v3489_v54 = vadd.f32 %v3339_v32, %v2987_v44  ;;  %v3841_v55 = vpop.f32.mrf.mxu3  ;;  %v2840_v56 = vpop.f32.mrf.mxu1  ;;  %v3105_v32 = vld [vmem:[%s5155_s25 + $0x188] sm:$0xff] }
 0x31f   : > { %v2988_v40 = vadd.f32 %v2940_v11, %v2840_v56 }
 0x320   : > { %v3991_v58 = vadd.f32 %v3841_v55, %v3489_v54  ;;  %v3607_v55 = vld [vmem:[%s5155_s25 + $0x189] sm:$0xff] }
 0x321   : > { %4920 = vmatmul.msk.f32.gmra.mxu1 %vm194_vm1, %v2598_v22  ;;  %v4346_v6 = vpop.f32.mrf.mxu0 }
 0x322   : > { %4970 = vmatmul.msk.f32.gmra.mxu2 %vm194_vm1, %v3100_v57  ;;  %v4493_v21 = vadd.f32 %v4343_v52, %v3991_v58  ;;  %v2606_v57 = vld [vmem:[%s5155_s25 + $0x18a] sm:$0xff] }
 0x323   : > { %5020 = vmatmul.msk.f32.gmra.mxu3 %vm194_vm1, %v3602_v59  ;;  %v2945_v59 = vld [vmem:[%s5384_s11 + $0xd8] sm:$0xff] }
 0x324   : > { %4541 = vst [vmem:[%s5384_s11 + $0xa8] sm:$0xff] %v4493_v21  ;;  %5070 = vmatmul.msk.f32.gmra.mxu0 %vm194_vm1, %v2601_v33 }
 0x325   : > { %v3342_v51 = vpop.f32.mrf.mxu2 }
 0x326   : > { %v3490_v60 = vadd.f32 %v3342_v51, %v2988_v40  ;;  %v3844_v61 = vpop.f32.mrf.mxu3  ;;  %v2843_v62 = vpop.f32.mrf.mxu1  ;;  %v3106_v51 = vld [vmem:[%s5155_s25 + $0x190] sm:$0xff] }
 0x327   : > { %v2989_v5 = vadd.f32 %v2941_v47, %v2843_v62 }
 0x328   : > { %v3992_v0 = vadd.f32 %v3844_v61, %v3490_v60  ;;  %v3608_v61 = vld [vmem:[%s5155_s25 + $0x191] sm:$0xff] }
 0x329   : > { %4921 = vmatmul.msk.f32.gmra.mxu1 %vm194_vm1, %v2599_v38  ;;  %v4349_v10 = vpop.f32.mrf.mxu0 }
 0x32a   : > { %4971 = vmatmul.msk.f32.gmra.mxu2 %vm194_vm1, %v3101_v63  ;;  %v4494_v39 = vadd.f32 %v4346_v6, %v3992_v0  ;;  %v2607_v63 = vld [vmem:[%s5155_s25 + $0x192] sm:$0xff] }
 0x32b   : > { %5021 = vmatmul.msk.f32.gmra.mxu3 %vm194_vm1, %v3603_v1  ;;  %v2946_v1 = vld [vmem:[%s5384_s11 + $0xe0] sm:$0xff] }
 0x32c   : > { %4542 = vst [vmem:[%s5384_s11 + $0xb0] sm:$0xff] %v4494_v39  ;;  %5071 = vmatmul.msk.f32.gmra.mxu0 %vm194_vm1, %v2602_v2 }
 0x32d   : > { %v3345_v37 = vpop.f32.mrf.mxu2 }
 0x32e   : > { %v3491_v3 = vadd.f32 %v3345_v37, %v2989_v5  ;;  %v3847_v20 = vpop.f32.mrf.mxu3  ;;  %v2846_v7 = vpop.f32.mrf.mxu1  ;;  %v3107_v37 = vld [vmem:[%s5155_s25 + $0x198] sm:$0xff] }
 0x32f   : > { %v2990_v9 = vadd.f32 %v2942_v19, %v2846_v7 }
 0x330   : > { %v3993_v12 = vadd.f32 %v3847_v20, %v3491_v3  ;;  %v3609_v20 = vld [vmem:[%s5155_s25 + $0x199] sm:$0xff] }
 0x331   : > { %4922 = vmatmul.msk.f32.gmra.mxu1 %vm194_vm1, %v2600_v50  ;;  %v4352_v14 = vpop.f32.mrf.mxu0 }
 0x332   : > { %4972 = vmatmul.msk.f32.gmra.mxu2 %vm194_vm1, %v3102_v8  ;;  %v4495_v4 = vadd.f32 %v4349_v10, %v3993_v12  ;;  %v4111_v12 = vld [vmem:[%s5155_s25 + $0x19a] sm:$0xff] }
 0x333   : > { %5022 = vmatmul.msk.f32.gmra.mxu3 %vm194_vm1, %v3604_v15  ;;  %v2947_v15 = vld [vmem:[%s5384_s11 + $0xe8] sm:$0xff] }
 0x334   : > { %4543 = vst [vmem:[%s5384_s11 + $0xb8] sm:$0xff] %v4495_v4  ;;  %5072 = vmatmul.msk.f32.gmra.mxu0 %vm194_vm1, %v2603_v18 }
 0x335   : > { %v3348_v22 = vpop.f32.mrf.mxu2 }
 0x336   : > { %v3492_v43 = vadd.f32 %v3348_v22, %v2990_v9  ;;  %v3850_v23 = vpop.f32.mrf.mxu3  ;;  %v2849_v28 = vpop.f32.mrf.mxu1  ;;  %v3108_v22 = vld [vmem:[%s5155_s25 + $0x1a0] sm:$0xff] }
 0x337   : > { %v2991_v13 = vadd.f32 %v2943_v35, %v2849_v28 }
 0x338   : > { %v3994_v27 = vadd.f32 %v3850_v23, %v3492_v43  ;;  %v3610_v23 = vld [vmem:[%s5155_s25 + $0x1a1] sm:$0xff] }
 0x339   : > { %4923 = vmatmul.msk.f32.gmra.mxu1 %vm194_vm1, %v2601_v33  ;;  %v4355_v34 = vpop.f32.mrf.mxu0 }
 0x33a   : > { %4973 = vmatmul.msk.f32.gmra.mxu2 %vm194_vm1, %v3103_v26  ;;  %v4496_v30 = vadd.f32 %v4352_v14, %v3994_v27  ;;  %v4112_v27 = vld [vmem:[%s5155_s25 + $0x1a2] sm:$0xff] }
 0x33b   : > { %5023 = vmatmul.msk.f32.gmra.mxu3 %vm194_vm1, %v3605_v16  ;;  %v2948_v16 = vld [vmem:[%s5384_s11 + $0xf0] sm:$0xff] }
 0x33c   : > { %4544 = vst [vmem:[%s5384_s11 + $0xc0] sm:$0xff] %v4496_v30  ;;  %5073 = vmatmul.msk.f32.gmra.mxu0 %vm194_vm1, %v2604_v31 }
 0x33d   : > { %v3351_v38 = vpop.f32.mrf.mxu2 }
 0x33e   : > { %v3493_v48 = vadd.f32 %v3351_v38, %v2991_v13  ;;  %v3853_v25 = vpop.f32.mrf.mxu3  ;;  %v2852_v36 = vpop.f32.mrf.mxu1  ;;  %v3109_v38 = vld [vmem:[%s5155_s25 + $0x1a8] sm:$0xff] }
 0x33f   : > { %v2992_v17 = vadd.f32 %v2944_v29, %v2852_v36 }
 0x340   : > { %v3995_v24 = vadd.f32 %v3853_v25, %v3493_v48  ;;  %v3611_v25 = vld [vmem:[%s5155_s25 + $0x1a9] sm:$0xff] }
 0x341   : > { %4924 = vmatmul.msk.f32.gmra.mxu1 %vm194_vm1, %v2602_v2  ;;  %v4358_v49 = vpop.f32.mrf.mxu0 }
 0x342   : > { %4974 = vmatmul.msk.f32.gmra.mxu2 %vm194_vm1, %v3104_v41  ;;  %v4497_v45 = vadd.f32 %v4355_v34, %v3995_v24  ;;  %v4113_v24 = vld [vmem:[%s5155_s25 + $0x1aa] sm:$0xff] }
 0x343   : > { %5024 = vmatmul.msk.f32.gmra.mxu3 %vm194_vm1, %v3606_v42  ;;  %v2949_v42 = vld [vmem:[%s5384_s11 + $0xf8] sm:$0xff] }
 0x344   : > { %4545 = vst [vmem:[%s5384_s11 + $0xc8] sm:$0xff] %v4497_v45  ;;  %5074 = vmatmul.msk.f32.gmra.mxu0 %vm194_vm1, %v2605_v46 }
 0x345   : > { %v3354_v50 = vpop.f32.mrf.mxu2 }
 0x346   : > { %v3494_v52 = vadd.f32 %v3354_v50, %v2992_v17  ;;  %v3856_v53 = vpop.f32.mrf.mxu3  ;;  %v2855_v44 = vpop.f32.mrf.mxu1 }
 0x347   : > { %v2993_v21 = vadd.f32 %v2945_v59, %v2855_v44  ;;  %v2950_v44 = vld [vmem:[%s5384_s11 + $0x100] sm:$0xff] }
 0x348   : > { %v3996_v54 = vadd.f32 %v3856_v53, %v3494_v52 }
 0x349   : > { %4925 = vmatmul.msk.f32.gmra.mxu1 %vm194_vm1, %v2603_v18  ;;  %v4361_v58 = vpop.f32.mrf.mxu0 }
 0x34a   : > { %4975 = vmatmul.msk.f32.gmra.mxu2 %vm194_vm1, %v3105_v32  ;;  %v4498_v56 = vadd.f32 %v4358_v49, %v3996_v54 }
 0x34b   : > { %5025 = vmatmul.msk.f32.gmra.mxu3 %vm194_vm1, %v3607_v55 }
 0x34c   : > { %4546 = vst [vmem:[%s5384_s11 + $0xd0] sm:$0xff] %v4498_v56  ;;  %5075 = vmatmul.msk.f32.gmra.mxu0 %vm194_vm1, %v2606_v57 }
 0x34d   : > { %v3357_v33 = vpop.f32.mrf.mxu2 }
 0x34e   : > { %v3495_v6 = vadd.f32 %v3357_v33, %v2993_v21  ;;  %v3859_v11 = vpop.f32.mrf.mxu3  ;;  %v2858_v40 = vpop.f32.mrf.mxu1  ;;  %v2951_v33 = vld [vmem:[%s5384_s11 + $0x108] sm:$0xff] }
 0x34f   : > { %v2994_v39 = vadd.f32 %v2946_v1, %v2858_v40 }
 0x350   : > { %v3997_v60 = vadd.f32 %v3859_v11, %v3495_v6 }
 0x351   : > { %4926 = vmatmul.msk.f32.gmra.mxu1 %vm194_vm1, %v2604_v31  ;;  %v4364_v0 = vpop.f32.mrf.mxu0 }
 0x352   : > { %4976 = vmatmul.msk.f32.gmra.mxu2 %vm194_vm1, %v3106_v51  ;;  %v4499_v62 = vadd.f32 %v4361_v58, %v3997_v60 }
 0x353   : > { %5026 = vmatmul.msk.f32.gmra.mxu3 %vm194_vm1, %v3608_v61 }
 0x354   : > { %4547 = vst [vmem:[%s5384_s11 + $0xd8] sm:$0xff] %v4499_v62  ;;  %5076 = vmatmul.msk.f32.gmra.mxu0 %vm194_vm1, %v2607_v63 }
 0x355   : > { %v3360_v2 = vpop.f32.mrf.mxu2 }
 0x356   : > { %v3496_v10 = vadd.f32 %v3360_v2, %v2994_v39  ;;  %v3862_v47 = vpop.f32.mrf.mxu3  ;;  %v2861_v5 = vpop.f32.mrf.mxu1 }
 0x357   : > { %v2995_v4 = vadd.f32 %v2947_v15, %v2861_v5 }
 0x358   : > { %v3998_v3 = vadd.f32 %v3862_v47, %v3496_v10 }
 0x359   : > { %4927 = vmatmul.msk.f32.gmra.mxu1 %vm194_vm1, %v2605_v46  ;;  %v4367_v8 = vpop.f32.mrf.mxu0 }
 0x35a   : > { %4977 = vmatmul.msk.f32.gmra.mxu2 %vm194_vm1, %v3107_v37  ;;  %v4500_v7 = vadd.f32 %v4364_v0, %v3998_v3  ;;  %v2952_v0 = vld [vmem:[%s5384_s11 + $0x110] sm:$0xff] }
 0x35b   : > { %5027 = vmatmul.msk.f32.gmra.mxu3 %vm194_vm1, %v3609_v20  ;;  %v2953_v20 = vld [vmem:[%s5384_s11 + $0x118] sm:$0xff] }
 0x35c   : > { %4548 = vst [vmem:[%s5384_s11 + $0xe0] sm:$0xff] %v4500_v7  ;;  %5077 = vmatmul.msk.f32.gmra.mxu0 %vm194_vm1, %v4111_v12 }
 0x35d   : > { %v3363_v18 = vpop.f32.mrf.mxu2 }
 0x35e   : > { %v3497_v14 = vadd.f32 %v3363_v18, %v2995_v4  ;;  %v3865_v19 = vpop.f32.mrf.mxu3  ;;  %v2864_v9 = vpop.f32.mrf.mxu1 }
 0x35f   : > { %v2996_v30 = vadd.f32 %v2948_v16, %v2864_v9  ;;  %v2954_v9 = vld [vmem:[%s5384_s11 + $0x120] sm:$0xff] }
 0x360   : > { %v3999_v43 = vadd.f32 %v3865_v19, %v3497_v14 }
 0x361   : > { %4928 = vmatmul.msk.f32.gmra.mxu1 %vm194_vm1, %v2606_v57  ;;  %v4370_v26 = vpop.f32.mrf.mxu0 }
 0x362   : > { %4978 = vmatmul.msk.f32.gmra.mxu2 %vm194_vm1, %v3108_v22  ;;  %v4501_v28 = vadd.f32 %v4367_v8, %v3999_v43 }
 0x363   : > { %5028 = vmatmul.msk.f32.gmra.mxu3 %vm194_vm1, %v3610_v23 }
 0x364   : > { %4549 = vst [vmem:[%s5384_s11 + $0xe8] sm:$0xff] %v4501_v28  ;;  %5078 = vmatmul.msk.f32.gmra.mxu0 %vm194_vm1, %v4112_v27 }
 0x365   : > { %v3366_v31 = vpop.f32.mrf.mxu2 }
 0x366   : > { %v3498_v34 = vadd.f32 %v3366_v31, %v2996_v30  ;;  %v3868_v35 = vpop.f32.mrf.mxu3  ;;  %v2867_v13 = vpop.f32.mrf.mxu1  ;;  %v2955_v31 = vld [vmem:[%s5384_s11 + $0x128] sm:$0xff] }
 0x367   : > { %v2997_v45 = vadd.f32 %v2949_v42, %v2867_v13 }
 0x368   : > { %v4000_v48 = vadd.f32 %v3868_v35, %v3498_v34 }
 0x369   : > { %4929 = vmatmul.msk.f32.gmra.mxu1 %vm194_vm1, %v2607_v63  ;;  %v4373_v41 = vpop.f32.mrf.mxu0 }
 0x36a   : > { %4979 = vmatmul.msk.f32.gmra.mxu2 %vm194_vm1, %v3109_v38  ;;  %v4502_v36 = vadd.f32 %v4370_v26, %v4000_v48 }
 0x36b   : > { %5029 = vmatmul.msk.f32.gmra.mxu3 %vm194_vm1, %v3611_v25 }
 0x36c   : > { %4550 = vst [vmem:[%s5384_s11 + $0xf0] sm:$0xff] %v4502_v36  ;;  %5079 = vmatmul.msk.f32.gmra.mxu0 %vm194_vm1, %v4113_v24  ;;  %v2956_v24 = vld [vmem:[%s5384_s11 + $0x130] sm:$0xff] }
 0x36d   : > { %v3369_v46 = vpop.f32.mrf.mxu2 }
 0x36e   : > { %v3499_v49 = vadd.f32 %v3369_v46, %v2997_v45  ;;  %v3871_v29 = vpop.f32.mrf.mxu3  ;;  %v2870_v17 = vpop.f32.mrf.mxu1 }
 0x36f   : > { %v2998_v32 = vadd.f32 %v2950_v44, %v2870_v17 }
 0x370   : > { %v4001_v50 = vadd.f32 %v3871_v29, %v3499_v49 }
 0x371   : > { %v4376_v53 = vpop.f32.mrf.mxu0 }
 0x372   : > { %v4503_v52 = vadd.f32 %v4373_v41, %v4001_v50 }
 0x374   : > { %4551 = vst [vmem:[%s5384_s11 + $0xf8] sm:$0xff] %v4503_v52 }
 0x375   : > { %v3372_v54 = vpop.f32.mrf.mxu2 }
 0x376   : > { %v3500_v55 = vadd.f32 %v3372_v54, %v2998_v32  ;;  %v3874_v56 = vpop.f32.mrf.mxu3  ;;  %v2873_v57 = vpop.f32.mrf.mxu1 }
 0x377   : > { %v2999_v6 = vadd.f32 %v2951_v33, %v2873_v57 }
 0x378   : > { %v4002_v58 = vadd.f32 %v3874_v56, %v3500_v55 }
 0x379   : > { %v4379_v21 = vpop.f32.mrf.mxu0 }
 0x37a   : > { %v4504_v59 = vadd.f32 %v4376_v53, %v4002_v58  ;;  %v2957_v53 = vld [vmem:[%s5384_s11 + $0x138] sm:$0xff] }
 0x37c   : > { %4552 = vst [vmem:[%s5384_s11 + $0x100] sm:$0xff] %v4504_v59 }
 0x37d   : > { %v3375_v11 = vpop.f32.mrf.mxu2 }
 0x37e   : > { %v3501_v40 = vadd.f32 %v3375_v11, %v2999_v6  ;;  %v3877_v51 = vpop.f32.mrf.mxu3  ;;  %v2876_v60 = vpop.f32.mrf.mxu1 }
 0x37f   : > { %v3000_v1 = vadd.f32 %v2952_v0, %v2876_v60 }
 0x380   : > { %v4003_v61 = vadd.f32 %v3877_v51, %v3501_v40 }
 0x381   : > { %v4382_v63 = vpop.f32.mrf.mxu0 }
 0x382   : > { %v4505_v62 = vadd.f32 %v4379_v21, %v4003_v61  ;;  %v2958_v21 = vld [vmem:[%s5384_s11 + $0x140] sm:$0xff] }
 0x384   : > { %4553 = vst [vmem:[%s5384_s11 + $0x108] sm:$0xff] %v4505_v62 }
 0x385   : > { %v3378_v39 = vpop.f32.mrf.mxu2 }
 0x386   : > { %v3502_v2 = vadd.f32 %v3378_v39, %v3000_v1  ;;  %v3880_v10 = vpop.f32.mrf.mxu3  ;;  %v2879_v47 = vpop.f32.mrf.mxu1 }
 0x387   : > { %v3001_v7 = vadd.f32 %v2953_v20, %v2879_v47 }
 0x388   : > { %v4004_v5 = vadd.f32 %v3880_v10, %v3502_v2 }
 0x389   : > { %v4385_v3 = vpop.f32.mrf.mxu0 }
 0x38a   : > { %v4506_v37 = vadd.f32 %v4382_v63, %v4004_v5  ;;  %v2959_v63 = vld [vmem:[%s5384_s11 + $0x148] sm:$0xff] }
 0x38c   : > { %4554 = vst [vmem:[%s5384_s11 + $0x110] sm:$0xff] %v4506_v37 }
 0x38d   : > { %v3381_v8 = vpop.f32.mrf.mxu2 }
 0x38e   : > { %v3503_v12 = vadd.f32 %v3381_v8, %v3001_v7  ;;  %v3883_v15 = vpop.f32.mrf.mxu3  ;;  %v2882_v4 = vpop.f32.mrf.mxu1 }
 0x38f   : > { %v3002_v22 = vadd.f32 %v2954_v9, %v2882_v4 }
 0x390   : > { %v4005_v18 = vadd.f32 %v3883_v15, %v3503_v12 }
 0x391   : > { %v4388_v19 = vpop.f32.mrf.mxu0 }
 0x392   : > { %v4507_v14 = vadd.f32 %v4385_v3, %v4005_v18  ;;  %v2960_v3 = vld [vmem:[%s5384_s11 + $0x150] sm:$0xff] }
 0x394   : > { %4555 = vst [vmem:[%s5384_s11 + $0x118] sm:$0xff] %v4507_v14 }
 0x395   : > { %v3384_v43 = vpop.f32.mrf.mxu2 }
 0x396   : > { %v3504_v23 = vadd.f32 %v3384_v43, %v3002_v22  ;;  %v3886_v28 = vpop.f32.mrf.mxu3  ;;  %v2885_v26 = vpop.f32.mrf.mxu1 }
 0x397   : > { %v3003_v34 = vadd.f32 %v2955_v31, %v2885_v26 }
 0x398   : > { %v4006_v27 = vadd.f32 %v3886_v28, %v3504_v23 }
 0x399   : > { %v4391_v30 = vpop.f32.mrf.mxu0 }
 0x39a   : > { %v4508_v16 = vadd.f32 %v4388_v19, %v4006_v27  ;;  %v2961_v19 = vld [vmem:[%s5384_s11 + $0x158] sm:$0xff] }
 0x39c   : > { %4556 = vst [vmem:[%s5384_s11 + $0x120] sm:$0xff] %v4508_v16 }
 0x39d   : > { %v3387_v35 = vpop.f32.mrf.mxu2 }
 0x39e   : > { %v3505_v13 = vadd.f32 %v3387_v35, %v3003_v34  ;;  %v3889_v38 = vpop.f32.mrf.mxu3  ;;  %v2888_v48 = vpop.f32.mrf.mxu1 }
 0x39f   : > { %v3004_v42 = vadd.f32 %v2956_v24, %v2888_v48 }
 0x3a0   : > { %v4007_v25 = vadd.f32 %v3889_v38, %v3505_v13 }
 0x3a1   : > { %v4394_v41 = vpop.f32.mrf.mxu0 }
 0x3a2   : > { %v4509_v36 = vadd.f32 %v4391_v30, %v4007_v25  ;;  %v2962_v30 = vld [vmem:[%s5384_s11 + $0x160] sm:$0xff] }
 0x3a4   : > { %4557 = vst [vmem:[%s5384_s11 + $0x128] sm:$0xff] %v4509_v36  ;;  %v2963_v36 = vld [vmem:[%s5384_s11 + $0x168] sm:$0xff] }
 0x3a5   : > { %v3390_v45 = vpop.f32.mrf.mxu2 }
 0x3a6   : > { %v3506_v46 = vadd.f32 %v3390_v45, %v3004_v42  ;;  %v3892_v49 = vpop.f32.mrf.mxu3  ;;  %v2891_v29 = vpop.f32.mrf.mxu1 }
 0x3a7   : > { %v3005_v44 = vadd.f32 %v2957_v53, %v2891_v29 }
 0x3a8   : > { %v4008_v17 = vadd.f32 %v3892_v49, %v3506_v46 }
 0x3a9   : > { %v4397_v52 = vpop.f32.mrf.mxu0 }
 0x3aa   : > { %v4510_v50 = vadd.f32 %v4394_v41, %v4008_v17 }
 0x3ac   : > { %4558 = vst [vmem:[%s5384_s11 + $0x130] sm:$0xff] %v4510_v50  ;;  %v2964_v50 = vld [vmem:[%s5384_s11 + $0x170] sm:$0xff] }
 0x3ad   : > { %v3393_v32 = vpop.f32.mrf.mxu2 }
 0x3ae   : > { %v3507_v54 = vadd.f32 %v3393_v32, %v3005_v44  ;;  %v3895_v55 = vpop.f32.mrf.mxu3  ;;  %v2894_v56 = vpop.f32.mrf.mxu1 }
 0x3af   : > { %v3006_v33 = vadd.f32 %v2958_v21, %v2894_v56 }
 0x3b0   : > { %v4009_v57 = vadd.f32 %v3895_v55, %v3507_v54 }
 0x3b1   : > { %v4400_v59 = vpop.f32.mrf.mxu0 }
 0x3b2   : > { %v4511_v58 = vadd.f32 %v4397_v52, %v4009_v57 }
 0x3b4   : > { %4559 = vst [vmem:[%s5384_s11 + $0x138] sm:$0xff] %v4511_v58  ;;  %v2965_v58 = vld [vmem:[%s5384_s11 + $0x178] sm:$0xff] }
 0x3b5   : > { %v3396_v6 = vpop.f32.mrf.mxu2 }
 0x3b6   : > { %v3508_v11 = vadd.f32 %v3396_v6, %v3006_v33  ;;  %v3898_v40 = vpop.f32.mrf.mxu3  ;;  %v2897_v51 = vpop.f32.mrf.mxu1 }
 0x3b7   : > { %v3007_v0 = vadd.f32 %v2959_v63, %v2897_v51 }
 0x3b8   : > { %v4010_v60 = vadd.f32 %v3898_v40, %v3508_v11 }
 0x3b9   : > { %v4403_v62 = vpop.f32.mrf.mxu0 }
 0x3ba   : > { %v4512_v61 = vadd.f32 %v4400_v59, %v4010_v60 }
 0x3bc   : > { %4560 = vst [vmem:[%s5384_s11 + $0x140] sm:$0xff] %v4512_v61 }
 0x3bd   : > { %v3399_v1 = vpop.f32.mrf.mxu2 }
 0x3be   : > { %v3509_v39 = vadd.f32 %v3399_v1, %v3007_v0  ;;  %v3901_v2 = vpop.f32.mrf.mxu3  ;;  %v2900_v10 = vpop.f32.mrf.mxu1 }
 0x3bf   : > { %v3008_v20 = vadd.f32 %v2960_v3, %v2900_v10 }
 0x3c0   : > { %v4011_v47 = vadd.f32 %v3901_v2, %v3509_v39 }
 0x3c1   : > { %v4406_v37 = vpop.f32.mrf.mxu0 }
 0x3c2   : > { %v4513_v5 = vadd.f32 %v4403_v62, %v4011_v47 }
 0x3c4   : > { %4561 = vst [vmem:[%s5384_s11 + $0x148] sm:$0xff] %v4513_v5 }
 0x3c5   : > { %v3402_v7 = vpop.f32.mrf.mxu2 }
 0x3c6   : > { %v3510_v8 = vadd.f32 %v3402_v7, %v3008_v20  ;;  %v3904_v12 = vpop.f32.mrf.mxu3  ;;  %v2903_v15 = vpop.f32.mrf.mxu1 }
 0x3c7   : > { %v3009_v9 = vadd.f32 %v2961_v19, %v2903_v15 }
 0x3c8   : > { %v4012_v4 = vadd.f32 %v3904_v12, %v3510_v8 }
 0x3c9   : > { %v4409_v14 = vpop.f32.mrf.mxu0 }
 0x3ca   : > { %v4514_v18 = vadd.f32 %v4406_v37, %v4012_v4 }
 0x3cc   : > { %4562 = vst [vmem:[%s5384_s11 + $0x150] sm:$0xff] %v4514_v18 }
 0x3cd   : > { %v3405_v22 = vpop.f32.mrf.mxu2 }
 0x3ce   : > { %v3511_v43 = vadd.f32 %v3405_v22, %v3009_v9  ;;  %v3907_v23 = vpop.f32.mrf.mxu3  ;;  %v2906_v28 = vpop.f32.mrf.mxu1 }
 0x3cf   : > { %v3010_v31 = vadd.f32 %v2962_v30, %v2906_v28 }
 0x3d0   : > { %v4013_v26 = vadd.f32 %v3907_v23, %v3511_v43 }
 0x3d1   : > { %v4412_v16 = vpop.f32.mrf.mxu0 }
 0x3d2   : > { %v4515_v27 = vadd.f32 %v4409_v14, %v4013_v26 }
 0x3d4   : > { %4563 = vst [vmem:[%s5384_s11 + $0x158] sm:$0xff] %v4515_v27 }
 0x3d5   : > { %v3408_v34 = vpop.f32.mrf.mxu2 }
 0x3d6   : > { %v3512_v35 = vadd.f32 %v3408_v34, %v3010_v31  ;;  %v3910_v13 = vpop.f32.mrf.mxu3  ;;  %v2909_v38 = vpop.f32.mrf.mxu1 }
 0x3d7   : > { %v3011_v24 = vadd.f32 %v2963_v36, %v2909_v38 }
 0x3d8   : > { %v4014_v48 = vadd.f32 %v3910_v13, %v3512_v35 }
 0x3d9   : > { %v4415_v41 = vpop.f32.mrf.mxu0 }
 0x3da   : > { %v4516_v25 = vadd.f32 %v4412_v16, %v4014_v48 }
 0x3dc   : > { %4564 = vst [vmem:[%s5384_s11 + $0x160] sm:$0xff] %v4516_v25 }
 0x3dd   : > { %v3411_v42 = vpop.f32.mrf.mxu2 }
 0x3de   : > { %v3513_v45 = vadd.f32 %v3411_v42, %v3011_v24  ;;  %v3913_v46 = vpop.f32.mrf.mxu3  ;;  %v2912_v49 = vpop.f32.mrf.mxu1 }
 0x3df   : > { %v3012_v52 = vadd.f32 %v2964_v50, %v2912_v49 }
 0x3e0   : > { %v4015_v29 = vadd.f32 %v3913_v46, %v3513_v45 }
 0x3e1   : > { %v4418_v44 = vpop.f32.mrf.mxu0 }
 0x3e2   : > { %v4517_v17 = vadd.f32 %v4415_v41, %v4015_v29 }
 0x3e4   : > { %4565 = vst [vmem:[%s5384_s11 + $0x168] sm:$0xff] %v4517_v17 }
 0x3e5   : > { %v3414_v53 = vpop.f32.mrf.mxu2 }
 0x3e6   : > { %v3514_v32 = vadd.f32 %v3414_v53, %v3012_v52  ;;  %v3916_v54 = vpop.f32.mrf.mxu3  ;;  %v2915_v56 = vpop.f32.mrf.mxu1 }
 0x3e7   : > { %v3013_v59 = vadd.f32 %v2965_v58, %v2915_v56 }
 0x3e8   : > { %v4016_v55 = vadd.f32 %v3916_v54, %v3514_v32 }
 0x3e9   : > { %v4421_v11 = vpop.f32.mrf.mxu0 }
 0x3ea   : > { %v4518_v57 = vadd.f32 %v4418_v44, %v4016_v55 }
 0x3ec   : > { %4566 = vst [vmem:[%s5384_s11 + $0x170] sm:$0xff] %v4518_v57 }
 0x3ed   : > { %v3417_v21 = vpop.f32.mrf.mxu2 }
 0x3ee   : > { %v3515_v33 = vadd.f32 %v3417_v21, %v3013_v59  ;;  %v3919_v6 = vpop.f32.mrf.mxu3 }
 0x3f0   : > { %v4017_v40 = vadd.f32 %v3919_v6, %v3515_v33 }
 0x3f2   : > { %v4519_v51 = vadd.f32 %v4421_v11, %v4017_v40 }
 0x3f4   : > { %4567 = vst [vmem:[%s5384_s11 + $0x178] sm:$0xff] %v4519_v51 }
 0x3f5 PF: > { %s12_s9 = sadd.s32 1, %s5100_s9  }
 0x3f6   : > { %p9_p5 = scmp.ge.s32.totalorder %s12_s9, 4  }
 0x3f8   :  { %11 = sbr.rel (!%p9_p5) target bundleno = 1 (0x1), region = 66 }

</bundles_post_ra>
